<compile_context>
chip_gen: v7x
topology: tpu7x:2x2x1
jax: 0.10.0
libtpu: 0.0.40
codegen_flags: <defaults>
</compile_context>

<pallas_src>
import math
import functools
import numpy as np
import jax
import jax.numpy as jnp
from jax.experimental import pallas as pl
from jax.experimental.pallas import tpu as pltpu


# --------------------------------------------------------------------------
# shared math helpers (used inside the kernel and by the pure-JAX reference)
# --------------------------------------------------------------------------
def _gelu(x):
    # exact (erf) GELU — matches torch.nn.GELU() default
    return 0.5 * x * (1.0 + jax.lax.erf(x * (1.0 / math.sqrt(2.0))))


def _layernorm(x, gamma, beta, eps=1e-5):
    mu = jnp.mean(x, axis=-1, keepdims=True)
    var = jnp.mean((x - mu) ** 2, axis=-1, keepdims=True)
    return (x - mu) * jax.lax.rsqrt(var + eps) * gamma + beta


# --------------------------------------------------------------------------
# Fused kernel: conv-embedding -> tAPE + eRPE attention -> FFN -> GAP.
# One grid step == Bb sequences; all intermediates live in VMEM.
# --------------------------------------------------------------------------
def convtran_kernel(xw_ref, wc1_ref, bn1_ref, w2f_ref, cd_ref, pe_ref,
                    wqkv_ref, hmask_ref, bias_ref, wf1_ref, bf1_ref, wf2_ref,
                    out_ref, *, Bb, T, H, D):
    BT = Bb * T

    # ---------------- embed_layer + embed_layer2 : two matmuls ----------------
    # conv(k,1) over time  == host im2col windows x block-diagonal (F*k, F*C1)
    # conv(1,F) over feats == one (BT, F*C1) x (F*C1, D) matmul
    y1 = jnp.dot(xw_ref[...], wc1_ref[...],
                 preferred_element_type=jnp.float32)              # (BT, F*C1)
    y1 = _gelu(y1 * bn1_ref[0:1, :] + bn1_ref[1:2, :])            # BN1 folded
    y2 = jnp.dot(y1.astype(jnp.bfloat16), w2f_ref[...],
                 preferred_element_type=jnp.float32)              # (BT, D)
    x_src = _gelu(y2 * cd_ref[0:1, :] + cd_ref[1:2, :])           # BN2 folded

    # ---------------- tAPE + Attention_Rel_Scl (eRPE) ----------------
    xq = (x_src.reshape(Bb, T, D) + pe_ref[...]).reshape(BT, D)
    qkv = jnp.dot(xq.astype(jnp.bfloat16), wqkv_ref[...],
                  preferred_element_type=jnp.float32)             # (BT, 3D)
    q3 = qkv[:, 0 * D:1 * D].reshape(Bb, T, D)
    k3 = qkv[:, 1 * D:2 * D].reshape(Bb, T, D)
    v3 = qkv[:, 2 * D:3 * D].reshape(Bb, T, D)
    hm = hmask_ref[...]                                           # (H*T, D) 0/1

    # All heads in ONE matmul per sequence: replicate q along a (head, qt) row
    # axis, zero out the channels that do not belong to that head, then contract
    # the full D (K=D instead of H tiny K=head_dim matmuls).
    qm = jnp.tile(q3, (1, H, 1)) * hm                             # (Bb, H*T, D)
    s = jnp.einsum('bmc,bkc->bmk', qm, k3,
                   preferred_element_type=jnp.float32)            # (Bb, H*T, T)
    mx = jnp.max(s, axis=-1, keepdims=True)
    e = jnp.exp(s - mx)
    p = e / jnp.sum(e, axis=-1, keepdims=True)                    # exact softmax
    p = p + bias_ref[...]                        # eRPE bias added AFTER softmax
    o4 = jnp.einsum('bmk,bkc->bmc', p, v3,
                    preferred_element_type=jnp.float32)           # (Bb, H*T, D)
    om = o4 * hm                                 # keep each head's own channels
    o = om[:, 0:T, :]
    for h in range(1, H):                        # head merge = masked row-block sum
        o = o + om[:, h * T:(h + 1) * T, :]
    o = o.reshape(BT, D)
    o = _layernorm(o, cd_ref[2:3, :], cd_ref[3:4, :])             # to_out LN
    att = _layernorm(x_src + o, cd_ref[4:5, :], cd_ref[5:6, :])   # LayerNorm1

    # ---------------- FeedForward + LayerNorm2 + GAP ----------------
    h1 = jnp.maximum(
        jnp.dot(att.astype(jnp.bfloat16), wf1_ref[...],
                preferred_element_type=jnp.float32) + bf1_ref[...], 0.0)
    ff = jnp.dot(h1.astype(jnp.bfloat16), wf2_ref[...],
                 preferred_element_type=jnp.float32) + cd_ref[6:7, :]
    o2 = _layernorm(att + ff, cd_ref[7:8, :], cd_ref[8:9, :])     # LayerNorm2
    out_ref[...] = jnp.mean(o2.reshape(Bb, T, D), axis=1)         # GAP -> (Bb, D)


# --------------------------------------------------------------------------
# Parameter init (deterministic, synthetic) + tAPE table.
# --------------------------------------------------------------------------
def init_params(key, *, F, T, D, H, dff, k):
    C1 = 4 * D
    ks = jax.random.split(key, 26)

    def nrm(i, shape, scale):
        return jax.random.normal(ks[i], shape, jnp.float32) * scale

    p = dict(
        w1=nrm(0, (C1, k), 0.3),            # Conv2d(1, 4D, (k,1)) weight (squeezed)
        b1=nrm(1, (C1,), 0.1),
        bn1_gamma=1.0 + nrm(2, (C1,), 0.1), bn1_beta=nrm(3, (C1,), 0.1),
        bn1_mean=nrm(4, (C1,), 0.1), bn1_var=0.5 + jnp.abs(nrm(5, (C1,), 0.2)),
        w2=nrm(6, (D, C1, F), 0.05),        # Conv2d(4D, D, (1,F)) weight (squeezed)
        b2=nrm(7, (D,), 0.1),
        bn2_gamma=1.0 + nrm(8, (D,), 0.1), bn2_beta=nrm(9, (D,), 0.1),
        bn2_mean=nrm(10, (D,), 0.1), bn2_var=0.5 + jnp.abs(nrm(11, (D,), 0.2)),
        wq_t=nrm(12, (D, D), D ** -0.5),    # already (in, out) = W.T of nn.Linear
        wk_t=nrm(13, (D, D), D ** -0.5),
        wv_t=nrm(14, (D, D), D ** -0.5),
        rel_bias_table=nrm(15, (2 * T - 1, H), 0.1),
        g_attn=1.0 + nrm(16, (D,), 0.1), b_attn=nrm(17, (D,), 0.1),
        g_ln1=1.0 + nrm(18, (D,), 0.1), b_ln1=nrm(19, (D,), 0.1),
        g_ln2=1.0 + nrm(20, (D,), 0.1), b_ln2=nrm(21, (D,), 0.1),
        w_ff1=nrm(22, (D, dff), D ** -0.5), b_ff1=nrm(23, (dff,), 0.1),
        w_ff2=nrm(24, (dff, D), dff ** -0.5), b_ff2=nrm(25, (D,), 0.1),
    )
    return p


def tape_pe(T, D):
    position = np.arange(T, dtype=np.float32)[:, None]
    div_term = np.exp(np.arange(0, D, 2, dtype=np.float32) * (-math.log(10000.0) / D))
    pe = np.zeros((T, D), np.float32)
    pe[:, 0::2] = np.sin((position * div_term) * (D / T))
    pe[:, 1::2] = np.cos((position * div_term) * (D / T))
    return jnp.asarray(pe)


def _largest_divisor_leq(n, cap):
    for d in range(min(n, cap), 0, -1):
        if n % d == 0:
            return d
    return 1


# --------------------------------------------------------------------------
# Host-side glue (fold / rearrange) + the single fused pallas_call.
# --------------------------------------------------------------------------
def convtran_forward(x, p, *, T, F, D, H, dff, k, block_b=8):
    """Full ConvTran forward in one fused Pallas kernel; returns {'rep': (B, D)}."""
    eps = 1e-5
    B = x.shape[0]
    C1 = 4 * D
    assert D % H == 0
    hd = D // H
    # Batch Bb sequences per grid step: matmuls get M = Bb*T rows (fills the MXU
    # M-dim and f32 sublanes) and the per-step pipeline prologue is amortized.
    Bb = _largest_divisor_leq(B, block_b)
    pad_l = (k - 1) // 2                        # torch padding='same' split
    pad_r = (k - 1) - pad_l

    # ---- fold conv biases + eval-mode BatchNorm into per-channel scale/shift ----
    s1 = p['bn1_gamma'] * jax.lax.rsqrt(p['bn1_var'] + eps)
    sh1 = p['bn1_beta'] + (p['b1'] - p['bn1_mean']) * s1
    s2 = p['bn2_gamma'] * jax.lax.rsqrt(p['bn2_var'] + eps)
    sh2 = p['bn2_beta'] + (p['b2'] - p['bn2_mean']) * s2

    # ---- host-side im2col of the (k,1) 'same' conv: (B*T, F*k), cast to bf16 once ----
    xpad = jnp.pad(x, ((0, 0), (pad_l, pad_r), (0, 0)))
    xw = jnp.stack([xpad[:, dt:dt + T, :] for dt in range(k)], axis=-1)   # (B,T,F,k)
    xw = xw.reshape(B * T, F * k).astype(jnp.bfloat16)

    # ---- weights rearranged / folded on the host ----
    # conv1 as block-diagonal (F*k, F*C1): the (k,1) conv does not mix features;
    # K = F*k is tiny so the zero blocks cost nothing on the MXU.
    wc1 = jnp.kron(jnp.eye(F, dtype=jnp.float32),
                   jnp.transpose(p['w1'])).astype(jnp.bfloat16)           # (F*k, F*C1)
    bn1 = jnp.stack([jnp.tile(s1, F), jnp.tile(sh1, F)], axis=0)          # (2, F*C1)
    w2f = jnp.transpose(p['w2'], (2, 1, 0)).reshape(F * C1, D).astype(jnp.bfloat16)
    # fused qkv; the emb_size**-0.5 attention scale is folded into the Q columns.
    wqkv = jnp.concatenate([p['wq_t'] * (float(D) ** -0.5), p['wk_t'], p['wv_t']],
                           axis=1).astype(jnp.bfloat16)                   # (D, 3D)
    # per-channel rows consolidated into one (9, D) array (fewer inputs / DMAs)
    cd = jnp.stack([s2, sh2, p['g_attn'], p['b_attn'], p['g_ln1'], p['b_ln1'],
                    p['b_ff2'], p['g_ln2'], p['b_ln2']], axis=0)          # (9, D)
    pe = tape_pe(T, D)                                                    # (T, D)
    # head mask: row (h, qt) keeps the channels belonging to head h
    hmask = (jnp.arange(D)[None, :] // hd ==
             jnp.repeat(jnp.arange(H), T)[:, None]).astype(jnp.float32)   # (H*T, D)
    # eRPE relative bias gathered once on the host: (H*T, T), rows (h, qt).
    # TODO(synk): for large T gather the (2T-1, H) table per KV tile in-kernel
    # (flash-style) instead of materializing O(H*T^2) — needed on v7x (64 MiB VMEM).
    idx = np.arange(T)[:, None] - np.arange(T)[None, :] + (T - 1)
    bias_rel = jnp.transpose(p['rel_bias_table'][jnp.asarray(idx)],
                             (2, 0, 1)).reshape(H * T, T)
    wf1 = p['w_ff1'].astype(jnp.bfloat16)                                 # (D, dff)
    bf1 = p['b_ff1'].reshape(1, dff)
    wf2 = p['w_ff2'].astype(jnp.bfloat16)                                 # (dff, D)

    args = (xw, wc1, bn1, w2f, cd, pe, wqkv, hmask, bias_rel, wf1, bf1, wf2)

    # TODO(synk): these grid-invariant constants could be single-buffered
    # (pipeline_mode=pl.Buffered(1)) when D/dff/T are scaled up.
    def const_spec(a):
        zeros = (0,) * a.ndim
        return pl.BlockSpec(a.shape, lambda i: zeros)

    in_specs = ([pl.BlockSpec((Bb * T, F * k), lambda i: (i, 0))]
                + [const_spec(a) for a in args[1:]])

    kernel = functools.partial(convtran_kernel, Bb=Bb, T=T, H=H, D=D)

    flops = (2 * B * T * (F * k * F * C1 + F * C1 * D + D * 3 * D + 2 * D * dff)
             + 2 * B * H * T * T * 2 * D)
    trans = B * T * (F * C1 + D) + B * H * T * T
    bytes_acc = int(sum(int(np.prod(a.shape)) * a.dtype.itemsize for a in args)
                    + B * D * 4)

    rep = pl.pallas_call(
        kernel,
        out_shape=jax.ShapeDtypeStruct((B, D), jnp.float32),
        grid=(B // Bb,),
        in_specs=in_specs,
        out_specs=pl.BlockSpec((Bb, D), lambda i: (i, 0)),
        compiler_params=pltpu.CompilerParams(
            dimension_semantics=("parallel",),       # keep B//Bb even for v7x's 2 TCs
            vmem_limit_bytes=32 * 1024 * 1024),      # above v5e's 16 MiB scoped default
        cost_estimate=pl.CostEstimate(flops=int(flops), transcendentals=int(trans),
                                      bytes_accessed=bytes_acc),
    )(*args)
    return {'rep': rep}


# --------------------------------------------------------------------------
# Pure-JAX f32 reference (mirrors the PyTorch forward) for verification.
# --------------------------------------------------------------------------
def ref_forward(x, p, *, T, F, D, H, dff, k):
    eps = 1e-5
    B = x.shape[0]
    hd = D // H
    pad_l, pad_r = (k - 1) // 2, (k - 1) - (k - 1) // 2
    xpad = jnp.pad(x, ((0, 0), (pad_l, pad_r), (0, 0)))
    C1 = 4 * D
    y1 = jnp.zeros((B, T, C1, F), jnp.float32)
    for dt in range(k):
        y1 = y1 + xpad[:, dt:dt + T, None, :] * p['w1'][None, None, :, dt, None]
    y1 = y1 + p['b1'][None, None, :, None]
    y1 = ((y1 - p['bn1_mean'][None, None, :, None])
          / jnp.sqrt(p['bn1_var'][None, None, :, None] + eps)
          * p['bn1_gamma'][None, None, :, None] + p['bn1_beta'][None, None, :, None])
    y1 = _gelu(y1)
    y2 = jnp.einsum('btcf,dcf->btd', y1, p['w2']) + p['b2']
    y2 = ((y2 - p['bn2_mean']) / jnp.sqrt(p['bn2_var'] + eps)
          * p['bn2_gamma'] + p['bn2_beta'])
    x_src = _gelu(y2)                                                # (B, T, D)

    xp = x_src + tape_pe(T, D)[None]
    q = xp @ p['wq_t']
    kk = xp @ p['wk_t']
    v = xp @ p['wv_t']
    qh = q.reshape(B, T, H, hd).transpose(0, 2, 1, 3)
    kh = kk.reshape(B, T, H, hd).transpose(0, 2, 1, 3)
    vh = v.reshape(B, T, H, hd).transpose(0, 2, 1, 3)
    s = jnp.einsum('bhqd,bhkd->bhqk', qh, kh) * (float(D) ** -0.5)
    a = jax.nn.softmax(s, axis=-1)
    idx = np.arange(T)[:, None] - np.arange(T)[None, :] + (T - 1)
    bias_rel = jnp.transpose(p['rel_bias_table'][jnp.asarray(idx)], (2, 0, 1))
    a = a + bias_rel[None]
    o = jnp.einsum('bhqk,bhkd->bhqd', a, vh).transpose(0, 2, 1, 3).reshape(B, T, D)
    o = _layernorm(o, p['g_attn'], p['b_attn'])
    att = _layernorm(x_src + o, p['g_ln1'], p['b_ln1'])
    h1 = jax.nn.relu(att @ p['w_ff1'] + p['b_ff1'])
    ff = h1 @ p['w_ff2'] + p['b_ff2']
    out2 = _layernorm(att + ff, p['g_ln2'], p['b_ln2'])
    return {'rep': out2.mean(axis=1)}


# --------------------------------------------------------------------------
if __name__ == "__main__":
    # Small, consistent shapes: feature_size=4, layer_size=32, len_max_seq=8,
    # num_heads=8, dim_feedforward=64.  batch=16 so each grid step carries
    # Bb=8 sequences (Bb*T = 64 matmul rows) and the grid stays even (v7x 2 TCs).
    B, T, F, D, H, dff = 16, 8, 4, 32, 8, 64
    k = min(8, T)

    key = jax.random.PRNGKey(0)
    kx, kp = jax.random.split(key)
    x = jax.random.normal(kx, (B, T, F), jnp.float32)
    params = init_params(kp, F=F, T=T, D=D, H=H, dff=dff, k=k)

    fwd = jax.jit(lambda xx, pp: convtran_forward(xx, pp, T=T, F=F, D=D, H=H,
                                                  dff=dff, k=k))
    rep = jax.block_until_ready(fwd(x, params)['rep'])
    assert rep.shape == (B, D)

    ref = ref_forward(x, params, T=T, F=F, D=D, H=H, dff=dff, k=k)['rep']
    # bf16 matmul weights (f32 accumulation, f32 attention math) vs. f32 reference
    np.testing.assert_allclose(np.asarray(rep), np.asarray(ref), rtol=5e-2, atol=3e-2)

    print("KERNEL_OK")
</pallas_src>

<mosaic_0001>
module attributes {stable_mosaic.version = 11 : i64} {
  func.func @convtran_kernel(%arg0: i32, %arg1: memref<64x32xbf16, #tpu.memory_space<vmem>>, %arg2: memref<32x512xbf16, #tpu.memory_space<vmem>>, %arg3: memref<2x512xf32, #tpu.memory_space<vmem>>, %arg4: memref<512x32xbf16, #tpu.memory_space<vmem>>, %arg5: memref<9x32xf32, #tpu.memory_space<vmem>>, %arg6: memref<8x32xf32, #tpu.memory_space<vmem>>, %arg7: memref<32x96xbf16, #tpu.memory_space<vmem>>, %arg8: memref<64x32xf32, #tpu.memory_space<vmem>>, %arg9: memref<64x8xf32, #tpu.memory_space<vmem>>, %arg10: memref<32x64xbf16, #tpu.memory_space<vmem>>, %arg11: memref<1x64xf32, #tpu.memory_space<vmem>>, %arg12: memref<64x32xbf16, #tpu.memory_space<vmem>>, %arg13: memref<8x32xf32, #tpu.memory_space<vmem>>) attributes {dimension_semantics = [#tpu.dimension_semantics<parallel>], iteration_bounds = array<i64: 2>, scalar_prefetch = 0 : i64, scratch_operands = 0 : i64, tpu.core_type = #tpu.core_type<tc>, window_params = [{transform_indices = @transform_0, window_bounds = array<i64: 64, 32>}, {pipeline_mode = #tpu.pipeline_mode<synchronous>, transform_indices = @transform_1, window_bounds = array<i64: 32, 512>}, {pipeline_mode = #tpu.pipeline_mode<synchronous>, transform_indices = @transform_2, window_bounds = array<i64: 2, 512>}, {pipeline_mode = #tpu.pipeline_mode<synchronous>, transform_indices = @transform_3, window_bounds = array<i64: 512, 32>}, {pipeline_mode = #tpu.pipeline_mode<synchronous>, transform_indices = @transform_4, window_bounds = array<i64: 9, 32>}, {pipeline_mode = #tpu.pipeline_mode<synchronous>, transform_indices = @transform_5, window_bounds = array<i64: 8, 32>}, {pipeline_mode = #tpu.pipeline_mode<synchronous>, transform_indices = @transform_6, window_bounds = array<i64: 32, 96>}, {pipeline_mode = #tpu.pipeline_mode<synchronous>, transform_indices = @transform_7, window_bounds = array<i64: 64, 32>}, {pipeline_mode = #tpu.pipeline_mode<synchronous>, transform_indices = @transform_8, window_bounds = array<i64: 64, 8>}, {pipeline_mode = #tpu.pipeline_mode<synchronous>, transform_indices = @transform_9, window_bounds = array<i64: 32, 64>}, {pipeline_mode = #tpu.pipeline_mode<synchronous>, transform_indices = @transform_10, window_bounds = array<i64: 1, 64>}, {pipeline_mode = #tpu.pipeline_mode<synchronous>, transform_indices = @transform_11, window_bounds = array<i64: 64, 32>}, {transform_indices = @transform_12, window_bounds = array<i64: 8, 32>}]} {
    %c0 = arith.constant 0 : index
    %c0_0 = arith.constant 0 : index
    %0 = vector.load %arg1[%c0, %c0_0] : memref<64x32xbf16, #tpu.memory_space<vmem>>, vector<64x32xbf16>
    %c0_1 = arith.constant 0 : index
    %c0_2 = arith.constant 0 : index
    %1 = vector.load %arg2[%c0_1, %c0_2] : memref<32x512xbf16, #tpu.memory_space<vmem>>, vector<32x512xbf16>
    %cst = arith.constant dense<0.000000e+00> : vector<64x512xf32>
    %2 = tpu.matmul %0, %1, %cst {dimension_numbers = #tpu.dot_dimension_numbers<[1], [0], [0], [1], [0, 0, 1, 1], [], []>} : vector<64x32xbf16>, vector<32x512xbf16>, vector<64x512xf32> -> vector<64x512xf32>
    %c0_3 = arith.constant 0 : index
    %c0_4 = arith.constant 0 : index
    %3 = vector.load %arg3[%c0_3, %c0_4] : memref<2x512xf32, #tpu.memory_space<vmem>>, vector<1x512xf32>
    %4 = vector.broadcast %3 : vector<1x512xf32> to vector<64x512xf32>
    %5 = arith.mulf %2, %4 : vector<64x512xf32>
    %c1 = arith.constant 1 : index
    %c0_5 = arith.constant 0 : index
    %6 = vector.load %arg3[%c1, %c0_5] : memref<2x512xf32, #tpu.memory_space<vmem>>, vector<1x512xf32>
    %7 = vector.broadcast %6 : vector<1x512xf32> to vector<64x512xf32>
    %8 = arith.addf %5, %7 : vector<64x512xf32>
    %cst_6 = arith.constant 5.000000e-01 : f32
    %9 = vector.broadcast %cst_6 : f32 to vector<64x512xf32>
    %10 = arith.mulf %9, %8 : vector<64x512xf32>
    %cst_7 = arith.constant 0.707106769 : f32
    %11 = vector.broadcast %cst_7 : f32 to vector<64x512xf32>
    %12 = arith.mulf %8, %11 : vector<64x512xf32>
    %13 = math.erf %12 : vector<64x512xf32>
    %cst_8 = arith.constant 1.000000e+00 : f32
    %14 = vector.broadcast %cst_8 : f32 to vector<64x512xf32>
    %15 = arith.addf %14, %13 : vector<64x512xf32>
    %16 = arith.mulf %10, %15 : vector<64x512xf32>
    %17 = arith.truncf %16 : vector<64x512xf32> to vector<64x512xbf16>
    %c0_9 = arith.constant 0 : index
    %c0_10 = arith.constant 0 : index
    %18 = vector.load %arg4[%c0_9, %c0_10] : memref<512x32xbf16, #tpu.memory_space<vmem>>, vector<512x32xbf16>
    %cst_11 = arith.constant dense<0.000000e+00> : vector<64x32xf32>
    %19 = tpu.matmul %17, %18, %cst_11 {dimension_numbers = #tpu.dot_dimension_numbers<[1], [0], [0], [1], [0, 0, 1, 1], [], []>} : vector<64x512xbf16>, vector<512x32xbf16>, vector<64x32xf32> -> vector<64x32xf32>
    %c0_12 = arith.constant 0 : index
    %c0_13 = arith.constant 0 : index
    %20 = vector.load %arg5[%c0_12, %c0_13] : memref<9x32xf32, #tpu.memory_space<vmem>>, vector<1x32xf32>
    %21 = vector.broadcast %20 : vector<1x32xf32> to vector<64x32xf32>
    %22 = arith.mulf %19, %21 : vector<64x32xf32>
    %c1_14 = arith.constant 1 : index
    %c0_15 = arith.constant 0 : index
    %23 = vector.load %arg5[%c1_14, %c0_15] : memref<9x32xf32, #tpu.memory_space<vmem>>, vector<1x32xf32>
    %24 = vector.broadcast %23 : vector<1x32xf32> to vector<64x32xf32>
    %25 = arith.addf %22, %24 : vector<64x32xf32>
    %cst_16 = arith.constant 5.000000e-01 : f32
    %26 = vector.broadcast %cst_16 : f32 to vector<64x32xf32>
    %27 = arith.mulf %26, %25 : vector<64x32xf32>
    %cst_17 = arith.constant 0.707106769 : f32
    %28 = vector.broadcast %cst_17 : f32 to vector<64x32xf32>
    %29 = arith.mulf %25, %28 : vector<64x32xf32>
    %30 = math.erf %29 : vector<64x32xf32>
    %cst_18 = arith.constant 1.000000e+00 : f32
    %31 = vector.broadcast %cst_18 : f32 to vector<64x32xf32>
    %32 = arith.addf %31, %30 : vector<64x32xf32>
    %33 = arith.mulf %27, %32 : vector<64x32xf32>
    %34 = vector.shape_cast %33 : vector<64x32xf32> to vector<8x8x32xf32>
    %c0_19 = arith.constant 0 : index
    %c0_20 = arith.constant 0 : index
    %35 = vector.load %arg6[%c0_19, %c0_20] : memref<8x32xf32, #tpu.memory_space<vmem>>, vector<8x32xf32>
    %36 = vector.shape_cast %35 : vector<8x32xf32> to vector<1x8x32xf32>
    %37 = vector.broadcast %36 : vector<1x8x32xf32> to vector<8x8x32xf32>
    %38 = arith.addf %34, %37 : vector<8x8x32xf32>
    %39 = vector.shape_cast %38 : vector<8x8x32xf32> to vector<64x32xf32>
    %40 = arith.truncf %39 : vector<64x32xf32> to vector<64x32xbf16>
    %c0_21 = arith.constant 0 : index
    %c0_22 = arith.constant 0 : index
    %41 = vector.load %arg7[%c0_21, %c0_22] : memref<32x96xbf16, #tpu.memory_space<vmem>>, vector<32x96xbf16>
    %cst_23 = arith.constant dense<0.000000e+00> : vector<64x96xf32>
    %42 = tpu.matmul %40, %41, %cst_23 {dimension_numbers = #tpu.dot_dimension_numbers<[1], [0], [0], [1], [0, 0, 1, 1], [], []>} : vector<64x32xbf16>, vector<32x96xbf16>, vector<64x96xf32> -> vector<64x96xf32>
    %43 = vector.extract_strided_slice %42 {offsets = [0, 0], sizes = [64, 32], strides = [1, 1]} : vector<64x96xf32> to vector<64x32xf32>
    %44 = vector.shape_cast %43 : vector<64x32xf32> to vector<8x8x32xf32>
    %45 = vector.extract_strided_slice %42 {offsets = [0, 32], sizes = [64, 32], strides = [1, 1]} : vector<64x96xf32> to vector<64x32xf32>
    %46 = vector.shape_cast %45 : vector<64x32xf32> to vector<8x8x32xf32>
    %47 = vector.extract_strided_slice %42 {offsets = [0, 64], sizes = [64, 32], strides = [1, 1]} : vector<64x96xf32> to vector<64x32xf32>
    %48 = vector.shape_cast %47 : vector<64x32xf32> to vector<8x8x32xf32>
    %c0_24 = arith.constant 0 : index
    %c0_25 = arith.constant 0 : index
    %49 = vector.load %arg8[%c0_24, %c0_25] : memref<64x32xf32, #tpu.memory_space<vmem>>, vector<64x32xf32>
    %50 = tpu.concatenate %44, %44, %44, %44, %44, %44, %44, %44 in 1 : vector<8x8x32xf32>, vector<8x8x32xf32>, vector<8x8x32xf32>, vector<8x8x32xf32>, vector<8x8x32xf32>, vector<8x8x32xf32>, vector<8x8x32xf32>, vector<8x8x32xf32> -> vector<8x64x32xf32>
    %51 = vector.shape_cast %49 : vector<64x32xf32> to vector<1x64x32xf32>
    %52 = vector.broadcast %51 : vector<1x64x32xf32> to vector<8x64x32xf32>
    %53 = arith.mulf %50, %52 : vector<8x64x32xf32>
    "tpu.trace_start"() <{level = 10 : i32, message = "bmc,bkc->bmk"}> : () -> ()
    %cst_26 = arith.constant dense<0.000000e+00> : vector<8x64x8xf32>
    %54 = tpu.matmul %53, %46, %cst_26 {dimension_numbers = #tpu.dot_dimension_numbers<[2], [2], [1], [1], [0, 0, 0, 1, 1, 1], [0], [0]>} : vector<8x64x32xf32>, vector<8x8x32xf32>, vector<8x64x8xf32> -> vector<8x64x8xf32>
    "tpu.trace_stop"() : () -> ()
    %cst_27 = arith.constant dense<0xFF800000> : vector<8x64xf32>
    %55 = vector.multi_reduction <maximumf>, %54, %cst_27 [2] : vector<8x64x8xf32> to vector<8x64xf32>
    %56 = vector.shape_cast %55 : vector<8x64xf32> to vector<8x64x1xf32>
    %57 = vector.broadcast %56 : vector<8x64x1xf32> to vector<8x64x8xf32>
    %58 = arith.subf %54, %57 : vector<8x64x8xf32>
    %59 = math.exp %58 : vector<8x64x8xf32>
    %cst_28 = arith.constant dense<0.000000e+00> : vector<8x64xf32>
    %60 = vector.multi_reduction <add>, %59, %cst_28 [2] : vector<8x64x8xf32> to vector<8x64xf32>
    %61 = vector.shape_cast %60 : vector<8x64xf32> to vector<8x64x1xf32>
    %62 = vector.broadcast %61 : vector<8x64x1xf32> to vector<8x64x8xf32>
    %63 = arith.divf %59, %62 : vector<8x64x8xf32>
    %c0_29 = arith.constant 0 : index
    %c0_30 = arith.constant 0 : index
    %64 = vector.load %arg9[%c0_29, %c0_30] : memref<64x8xf32, #tpu.memory_space<vmem>>, vector<64x8xf32>
    %65 = vector.shape_cast %64 : vector<64x8xf32> to vector<1x64x8xf32>
    %66 = vector.broadcast %65 : vector<1x64x8xf32> to vector<8x64x8xf32>
    %67 = arith.addf %63, %66 : vector<8x64x8xf32>
    "tpu.trace_start"() <{level = 10 : i32, message = "bmk,bkc->bmc"}> : () -> ()
    %cst_31 = arith.constant dense<0.000000e+00> : vector<8x64x32xf32>
    %68 = tpu.matmul %67, %48, %cst_31 {dimension_numbers = #tpu.dot_dimension_numbers<[2], [1], [1], [2], [0, 0, 0, 1, 1, 2], [0], [0]>} : vector<8x64x8xf32>, vector<8x8x32xf32>, vector<8x64x32xf32> -> vector<8x64x32xf32>
    "tpu.trace_stop"() : () -> ()
    %69 = vector.shape_cast %49 : vector<64x32xf32> to vector<1x64x32xf32>
    %70 = vector.broadcast %69 : vector<1x64x32xf32> to vector<8x64x32xf32>
    %71 = arith.mulf %68, %70 : vector<8x64x32xf32>
    %72 = vector.extract_strided_slice %71 {offsets = [0, 0, 0], sizes = [8, 8, 32], strides = [1, 1, 1]} : vector<8x64x32xf32> to vector<8x8x32xf32>
    %73 = vector.extract_strided_slice %71 {offsets = [0, 8, 0], sizes = [8, 8, 32], strides = [1, 1, 1]} : vector<8x64x32xf32> to vector<8x8x32xf32>
    %74 = arith.addf %72, %73 : vector<8x8x32xf32>
    %75 = vector.extract_strided_slice %71 {offsets = [0, 16, 0], sizes = [8, 8, 32], strides = [1, 1, 1]} : vector<8x64x32xf32> to vector<8x8x32xf32>
    %76 = arith.addf %74, %75 : vector<8x8x32xf32>
    %77 = vector.extract_strided_slice %71 {offsets = [0, 24, 0], sizes = [8, 8, 32], strides = [1, 1, 1]} : vector<8x64x32xf32> to vector<8x8x32xf32>
    %78 = arith.addf %76, %77 : vector<8x8x32xf32>
    %79 = vector.extract_strided_slice %71 {offsets = [0, 32, 0], sizes = [8, 8, 32], strides = [1, 1, 1]} : vector<8x64x32xf32> to vector<8x8x32xf32>
    %80 = arith.addf %78, %79 : vector<8x8x32xf32>
    %81 = vector.extract_strided_slice %71 {offsets = [0, 40, 0], sizes = [8, 8, 32], strides = [1, 1, 1]} : vector<8x64x32xf32> to vector<8x8x32xf32>
    %82 = arith.addf %80, %81 : vector<8x8x32xf32>
    %83 = vector.extract_strided_slice %71 {offsets = [0, 48, 0], sizes = [8, 8, 32], strides = [1, 1, 1]} : vector<8x64x32xf32> to vector<8x8x32xf32>
    %84 = arith.addf %82, %83 : vector<8x8x32xf32>
    %85 = vector.extract_strided_slice %71 {offsets = [0, 56, 0], sizes = [8, 8, 32], strides = [1, 1, 1]} : vector<8x64x32xf32> to vector<8x8x32xf32>
    %86 = arith.addf %84, %85 : vector<8x8x32xf32>
    %87 = vector.shape_cast %86 : vector<8x8x32xf32> to vector<64x32xf32>
    %c2 = arith.constant 2 : index
    %c0_32 = arith.constant 0 : index
    %88 = vector.load %arg5[%c2, %c0_32] : memref<9x32xf32, #tpu.memory_space<vmem>>, vector<1x32xf32>
    %c3 = arith.constant 3 : index
    %c0_33 = arith.constant 0 : index
    %89 = vector.load %arg5[%c3, %c0_33] : memref<9x32xf32, #tpu.memory_space<vmem>>, vector<1x32xf32>
    %cst_34 = arith.constant dense<0.000000e+00> : vector<64xf32>
    %90 = vector.multi_reduction <add>, %87, %cst_34 [1] : vector<64x32xf32> to vector<64xf32>
    %91 = vector.shape_cast %90 : vector<64xf32> to vector<64x1xf32>
    %cst_35 = arith.constant 3.200000e+01 : f32
    %92 = vector.broadcast %cst_35 : f32 to vector<64x1xf32>
    %93 = arith.divf %91, %92 : vector<64x1xf32>
    %94 = vector.broadcast %93 : vector<64x1xf32> to vector<64x32xf32>
    %95 = arith.subf %87, %94 : vector<64x32xf32>
    %96 = arith.mulf %95, %95 : vector<64x32xf32>
    %cst_36 = arith.constant dense<0.000000e+00> : vector<64xf32>
    %97 = vector.multi_reduction <add>, %96, %cst_36 [1] : vector<64x32xf32> to vector<64xf32>
    %98 = vector.shape_cast %97 : vector<64xf32> to vector<64x1xf32>
    %cst_37 = arith.constant 3.200000e+01 : f32
    %99 = vector.broadcast %cst_37 : f32 to vector<64x1xf32>
    %100 = arith.divf %98, %99 : vector<64x1xf32>
    %101 = vector.broadcast %93 : vector<64x1xf32> to vector<64x32xf32>
    %102 = arith.subf %87, %101 : vector<64x32xf32>
    %cst_38 = arith.constant 9.99999974E-6 : f32
    %103 = vector.broadcast %cst_38 : f32 to vector<64x1xf32>
    %104 = arith.addf %100, %103 : vector<64x1xf32>
    %105 = math.rsqrt %104 : vector<64x1xf32>
    %106 = vector.broadcast %105 : vector<64x1xf32> to vector<64x32xf32>
    %107 = arith.mulf %102, %106 : vector<64x32xf32>
    %108 = vector.broadcast %88 : vector<1x32xf32> to vector<64x32xf32>
    %109 = arith.mulf %107, %108 : vector<64x32xf32>
    %110 = vector.broadcast %89 : vector<1x32xf32> to vector<64x32xf32>
    %111 = arith.addf %109, %110 : vector<64x32xf32>
    %112 = arith.addf %33, %111 : vector<64x32xf32>
    %c4 = arith.constant 4 : index
    %c0_39 = arith.constant 0 : index
    %113 = vector.load %arg5[%c4, %c0_39] : memref<9x32xf32, #tpu.memory_space<vmem>>, vector<1x32xf32>
    %c5 = arith.constant 5 : index
    %c0_40 = arith.constant 0 : index
    %114 = vector.load %arg5[%c5, %c0_40] : memref<9x32xf32, #tpu.memory_space<vmem>>, vector<1x32xf32>
    %cst_41 = arith.constant dense<0.000000e+00> : vector<64xf32>
    %115 = vector.multi_reduction <add>, %112, %cst_41 [1] : vector<64x32xf32> to vector<64xf32>
    %116 = vector.shape_cast %115 : vector<64xf32> to vector<64x1xf32>
    %cst_42 = arith.constant 3.200000e+01 : f32
    %117 = vector.broadcast %cst_42 : f32 to vector<64x1xf32>
    %118 = arith.divf %116, %117 : vector<64x1xf32>
    %119 = vector.broadcast %118 : vector<64x1xf32> to vector<64x32xf32>
    %120 = arith.subf %112, %119 : vector<64x32xf32>
    %121 = arith.mulf %120, %120 : vector<64x32xf32>
    %cst_43 = arith.constant dense<0.000000e+00> : vector<64xf32>
    %122 = vector.multi_reduction <add>, %121, %cst_43 [1] : vector<64x32xf32> to vector<64xf32>
    %123 = vector.shape_cast %122 : vector<64xf32> to vector<64x1xf32>
    %cst_44 = arith.constant 3.200000e+01 : f32
    %124 = vector.broadcast %cst_44 : f32 to vector<64x1xf32>
    %125 = arith.divf %123, %124 : vector<64x1xf32>
    %126 = vector.broadcast %118 : vector<64x1xf32> to vector<64x32xf32>
    %127 = arith.subf %112, %126 : vector<64x32xf32>
    %cst_45 = arith.constant 9.99999974E-6 : f32
    %128 = vector.broadcast %cst_45 : f32 to vector<64x1xf32>
    %129 = arith.addf %125, %128 : vector<64x1xf32>
    %130 = math.rsqrt %129 : vector<64x1xf32>
    %131 = vector.broadcast %130 : vector<64x1xf32> to vector<64x32xf32>
    %132 = arith.mulf %127, %131 : vector<64x32xf32>
    %133 = vector.broadcast %113 : vector<1x32xf32> to vector<64x32xf32>
    %134 = arith.mulf %132, %133 : vector<64x32xf32>
    %135 = vector.broadcast %114 : vector<1x32xf32> to vector<64x32xf32>
    %136 = arith.addf %134, %135 : vector<64x32xf32>
    %137 = arith.truncf %136 : vector<64x32xf32> to vector<64x32xbf16>
    %c0_46 = arith.constant 0 : index
    %c0_47 = arith.constant 0 : index
    %138 = vector.load %arg10[%c0_46, %c0_47] : memref<32x64xbf16, #tpu.memory_space<vmem>>, vector<32x64xbf16>
    %cst_48 = arith.constant dense<0.000000e+00> : vector<64x64xf32>
    %139 = tpu.matmul %137, %138, %cst_48 {dimension_numbers = #tpu.dot_dimension_numbers<[1], [0], [0], [1], [0, 0, 1, 1], [], []>} : vector<64x32xbf16>, vector<32x64xbf16>, vector<64x64xf32> -> vector<64x64xf32>
    %c0_49 = arith.constant 0 : index
    %c0_50 = arith.constant 0 : index
    %140 = vector.load %arg11[%c0_49, %c0_50] : memref<1x64xf32, #tpu.memory_space<vmem>>, vector<1x64xf32>
    %141 = vector.broadcast %140 : vector<1x64xf32> to vector<64x64xf32>
    %142 = arith.addf %139, %141 : vector<64x64xf32>
    %cst_51 = arith.constant 0.000000e+00 : f32
    %143 = vector.broadcast %cst_51 : f32 to vector<64x64xf32>
    %144 = arith.maximumf %142, %143 : vector<64x64xf32>
    %145 = arith.truncf %144 : vector<64x64xf32> to vector<64x64xbf16>
    %c0_52 = arith.constant 0 : index
    %c0_53 = arith.constant 0 : index
    %146 = vector.load %arg12[%c0_52, %c0_53] : memref<64x32xbf16, #tpu.memory_space<vmem>>, vector<64x32xbf16>
    %cst_54 = arith.constant dense<0.000000e+00> : vector<64x32xf32>
    %147 = tpu.matmul %145, %146, %cst_54 {dimension_numbers = #tpu.dot_dimension_numbers<[1], [0], [0], [1], [0, 0, 1, 1], [], []>} : vector<64x64xbf16>, vector<64x32xbf16>, vector<64x32xf32> -> vector<64x32xf32>
    %c6 = arith.constant 6 : index
    %c0_55 = arith.constant 0 : index
    %148 = vector.load %arg5[%c6, %c0_55] : memref<9x32xf32, #tpu.memory_space<vmem>>, vector<1x32xf32>
    %149 = vector.broadcast %148 : vector<1x32xf32> to vector<64x32xf32>
    %150 = arith.addf %147, %149 : vector<64x32xf32>
    %151 = arith.addf %136, %150 : vector<64x32xf32>
    %c7 = arith.constant 7 : index
    %c0_56 = arith.constant 0 : index
    %152 = vector.load %arg5[%c7, %c0_56] : memref<9x32xf32, #tpu.memory_space<vmem>>, vector<1x32xf32>
    %c8 = arith.constant 8 : index
    %c0_57 = arith.constant 0 : index
    %153 = vector.load %arg5[%c8, %c0_57] : memref<9x32xf32, #tpu.memory_space<vmem>>, vector<1x32xf32>
    %cst_58 = arith.constant dense<0.000000e+00> : vector<64xf32>
    %154 = vector.multi_reduction <add>, %151, %cst_58 [1] : vector<64x32xf32> to vector<64xf32>
    %155 = vector.shape_cast %154 : vector<64xf32> to vector<64x1xf32>
    %cst_59 = arith.constant 3.200000e+01 : f32
    %156 = vector.broadcast %cst_59 : f32 to vector<64x1xf32>
    %157 = arith.divf %155, %156 : vector<64x1xf32>
    %158 = vector.broadcast %157 : vector<64x1xf32> to vector<64x32xf32>
    %159 = arith.subf %151, %158 : vector<64x32xf32>
    %160 = arith.mulf %159, %159 : vector<64x32xf32>
    %cst_60 = arith.constant dense<0.000000e+00> : vector<64xf32>
    %161 = vector.multi_reduction <add>, %160, %cst_60 [1] : vector<64x32xf32> to vector<64xf32>
    %162 = vector.shape_cast %161 : vector<64xf32> to vector<64x1xf32>
    %cst_61 = arith.constant 3.200000e+01 : f32
    %163 = vector.broadcast %cst_61 : f32 to vector<64x1xf32>
    %164 = arith.divf %162, %163 : vector<64x1xf32>
    %165 = vector.broadcast %157 : vector<64x1xf32> to vector<64x32xf32>
    %166 = arith.subf %151, %165 : vector<64x32xf32>
    %cst_62 = arith.constant 9.99999974E-6 : f32
    %167 = vector.broadcast %cst_62 : f32 to vector<64x1xf32>
    %168 = arith.addf %164, %167 : vector<64x1xf32>
    %169 = math.rsqrt %168 : vector<64x1xf32>
    %170 = vector.broadcast %169 : vector<64x1xf32> to vector<64x32xf32>
    %171 = arith.mulf %166, %170 : vector<64x32xf32>
    %172 = vector.broadcast %152 : vector<1x32xf32> to vector<64x32xf32>
    %173 = arith.mulf %171, %172 : vector<64x32xf32>
    %174 = vector.broadcast %153 : vector<1x32xf32> to vector<64x32xf32>
    %175 = arith.addf %173, %174 : vector<64x32xf32>
    %176 = vector.shape_cast %175 : vector<64x32xf32> to vector<8x8x32xf32>
    %cst_63 = arith.constant dense<0.000000e+00> : vector<8x32xf32>
    %177 = vector.multi_reduction <add>, %176, %cst_63 [1] : vector<8x8x32xf32> to vector<8x32xf32>
    %cst_64 = arith.constant 8.000000e+00 : f32
    %178 = vector.broadcast %cst_64 : f32 to vector<8x32xf32>
    %179 = arith.divf %177, %178 : vector<8x32xf32>
    %c0_65 = arith.constant 0 : index
    %c0_66 = arith.constant 0 : index
    %180 = vector.load %arg13[%c0_65, %c0_66] : memref<8x32xf32, #tpu.memory_space<vmem>>, vector<8x32xf32>
    tpu.vector_store %arg13[%c0_65, %c0_66], %179 {strides = array<i32>} : memref<8x32xf32, #tpu.memory_space<vmem>>, vector<8x32xf32>,
    return
  }
  func.func @transform_0(%arg0: i32) -> (i32, i32) {
    %c0_i32 = arith.constant 0 : i32
    %c0_i32_0 = arith.constant 0 : i32
    return %arg0, %c0_i32 : i32, i32
  }
  func.func @transform_1(%arg0: i32) -> (i32, i32) {
    %c0_i32 = arith.constant 0 : i32
    %c0_i32_0 = arith.constant 0 : i32
    %c0_i32_1 = arith.constant 0 : i32
    return %c0_i32, %c0_i32_0 : i32, i32
  }
  func.func @transform_2(%arg0: i32) -> (i32, i32) {
    %c0_i32 = arith.constant 0 : i32
    %c0_i32_0 = arith.constant 0 : i32
    %c0_i32_1 = arith.constant 0 : i32
    return %c0_i32, %c0_i32_0 : i32, i32
  }
  func.func @transform_3(%arg0: i32) -> (i32, i32) {
    %c0_i32 = arith.constant 0 : i32
    %c0_i32_0 = arith.constant 0 : i32
    %c0_i32_1 = arith.constant 0 : i32
    return %c0_i32, %c0_i32_0 : i32, i32
  }
  func.func @transform_4(%arg0: i32) -> (i32, i32) {
    %c0_i32 = arith.constant 0 : i32
    %c0_i32_0 = arith.constant 0 : i32
    %c0_i32_1 = arith.constant 0 : i32
    return %c0_i32, %c0_i32_0 : i32, i32
  }
  func.func @transform_5(%arg0: i32) -> (i32, i32) {
    %c0_i32 = arith.constant 0 : i32
    %c0_i32_0 = arith.constant 0 : i32
    %c0_i32_1 = arith.constant 0 : i32
    return %c0_i32, %c0_i32_0 : i32, i32
  }
  func.func @transform_6(%arg0: i32) -> (i32, i32) {
    %c0_i32 = arith.constant 0 : i32
    %c0_i32_0 = arith.constant 0 : i32
    %c0_i32_1 = arith.constant 0 : i32
    return %c0_i32, %c0_i32_0 : i32, i32
  }
  func.func @transform_7(%arg0: i32) -> (i32, i32) {
    %c0_i32 = arith.constant 0 : i32
    %c0_i32_0 = arith.constant 0 : i32
    %c0_i32_1 = arith.constant 0 : i32
    return %c0_i32, %c0_i32_0 : i32, i32
  }
  func.func @transform_8(%arg0: i32) -> (i32, i32) {
    %c0_i32 = arith.constant 0 : i32
    %c0_i32_0 = arith.constant 0 : i32
    %c0_i32_1 = arith.constant 0 : i32
    return %c0_i32, %c0_i32_0 : i32, i32
  }
  func.func @transform_9(%arg0: i32) -> (i32, i32) {
    %c0_i32 = arith.constant 0 : i32
    %c0_i32_0 = arith.constant 0 : i32
    %c0_i32_1 = arith.constant 0 : i32
    return %c0_i32, %c0_i32_0 : i32, i32
  }
  func.func @transform_10(%arg0: i32) -> (i32, i32) {
    %c0_i32 = arith.constant 0 : i32
    %c0_i32_0 = arith.constant 0 : i32
    %c0_i32_1 = arith.constant 0 : i32
    return %c0_i32, %c0_i32_0 : i32, i32
  }
  func.func @transform_11(%arg0: i32) -> (i32, i32) {
    %c0_i32 = arith.constant 0 : i32
    %c0_i32_0 = arith.constant 0 : i32
    %c0_i32_1 = arith.constant 0 : i32
    return %c0_i32, %c0_i32_0 : i32, i32
  }
  func.func @transform_12(%arg0: i32) -> (i32, i32) {
    %c0_i32 = arith.constant 0 : i32
    %c0_i32_0 = arith.constant 0 : i32
    return %arg0, %c0_i32 : i32, i32
  }
}

</mosaic_0001>

<bundles_post_ra>
// kernel: tile.13
= control target key start
LH: loop header
LB: loop body
LE: loop exit
PB: predicated region body
PF: predicated region fallthrough
CT: control target
= control target key end

     0   :  { %s22_s0 = inlined_call_operand.vmem [shape: f32[128], index: 0, kind: input, shape index: {}]   ;;  %s23_s1 = inlined_call_operand.vmem [shape: f32[4,128], index: 1, kind: output, shape index: {}]  }
   0x1   :  { %v4_v0 = vld [vmem:[%s22_s0] ss:$0 sm:$0xff] }
   0x2   :  { %5 = vst [vmem:[%s23_s1] sm:$0xf] %v4_v0 }

// kernel: eq.13
= control target key start
LH: loop header
LB: loop body
LE: loop exit
PB: predicated region body
PF: predicated region fallthrough
CT: control target
= control target key end

     0   :  { %s67_s10 = smov 56   ;;  %s68_s11 = smov 40   ;;  %vm3_vm0 = vcmask 64512   ;;  %vm9_vm1 = vcmask 523712   ;;  %vm15_vm2 = vcmask 458112   ;;  %vm21_vm3 = vcmask 392512   ;;  %s111_s0 = inlined_call_operand.vmem [shape: s32[8,8], index: 0, kind: input, shape index: {}]   ;;  %s112_s1 = inlined_call_operand.vmem [shape: s32[64], index: 1, kind: output, shape index: {}]  }
   0x1   :  { %v53_v0 = vld [vmem:[%s111_s0 + $0x7] sm:$0x1]   ;;  %v55_v1 = vld [vmem:[%s111_s0 + $0x5] sm:$0x1]   ;;  %v54_v2 = vld [vmem:[%s111_s0 + $0x6] sm:$0x1]  }
   0x2   :  { %7 = vrot.lane.b32.xlu0 %v53_v0, %s67_s10  ;;  %19 = vrot.lane.b32.xlu1 %v55_v1, %s68_s11  ;;  %v56_v3 = vld [vmem:[%s111_s0 + $0x4] sm:$0x1]   ;;  %v2_v4 = vld [vmem:[%s111_s0] sm:$0x1]   ;;  %s69_s18 = smov 48   ;;  %s70_s19 = smov 32  }
   0x3   :  { %4 = vst.msk [vmem:[#allocation0] sm:$0x1] %vm3_vm0, %v2_v4   ;;  %v57_v5 = vld [vmem:[%s111_s0 + $0x3] sm:$0x1]   ;;  %v58_v6 = vld [vmem:[%s111_s0 + $0x2] sm:$0x1]  }
   0x4   :  { %s71_s24 = smov 24   ;;  %s72_s25 = smov 16   ;;  %v59_v7 = vld [vmem:[%s111_s0 + $0x1] sm:$0x1]   ;;  %vm27_vm4 = vcmask 326912   ;;  %vm33_vm5 = vcmask 261312  }
   0x5   :  { %s73_s0 = smov 8   ;;  %vm39_vm6 = vcmask 195712   ;;  %vm45_vm7 = vcmask 130112  }
   0x6   :  { %13 = vrot.lane.b32.xlu0 %v54_v2, %s69_s18  ;;  %25 = vrot.lane.b32.xlu1 %v56_v3, %s70_s19 }
   0xa   :  { %31 = vrot.lane.b32.xlu0 %v57_v5, %s71_s24  ;;  %37 = vrot.lane.b32.xlu1 %v58_v6, %s72_s25 }
   0xe   :  { %43 = vrot.lane.b32.xlu0 %v59_v7, %s73_s0 }
  0x74   :  { %v8_v8 = vpop.permute.xlu0 %7   ;;  %v20_v9 = vpop.permute.xlu1 %19  }
  0x75   :  { %10 = vst.msk [vmem:[#allocation0] sm:$0x1] %vm9_vm1, %v8_v8  }
  0x78   :  { %v14_v10 = vpop.permute.xlu0 %13   ;;  %v26_v11 = vpop.permute.xlu1 %25  }
  0x79   :  { %16 = vst.msk [vmem:[#allocation0] sm:$0x1] %vm15_vm2, %v14_v10  }
  0x7a   :  { %22 = vst.msk [vmem:[#allocation0] sm:$0x1] %vm21_vm3, %v20_v9  }
  0x7b   :  { %28 = vst.msk [vmem:[#allocation0] sm:$0x1] %vm27_vm4, %v26_v11  }
  0x7c   :  { %v32_v12 = vpop.permute.xlu0 %31   ;;  %v38_v13 = vpop.permute.xlu1 %37  }
  0x7d   :  { %34 = vst.msk [vmem:[#allocation0] sm:$0x1] %vm33_vm5, %v32_v12  }
  0x7e   :  { %40 = vst.msk [vmem:[#allocation0] sm:$0x1] %vm39_vm6, %v38_v13  }
  0x80   :  { %v44_v14 = vpop.permute.xlu0 %43  }
  0x81   :  { %46 = vst.msk [vmem:[#allocation0] sm:$0x1] %vm45_vm7, %v44_v14  }
  0x88   :  { %v50_v15 = vld [vmem:[#allocation0] sm:$0x1] }
  0x89   :  { %52 = vst [vmem:[%s112_s1] sm:$0x1] %v50_v15 }

// kernel: _lambda_.1
= control target key start
LH: loop header
LB: loop body
LE: loop exit
PB: predicated region body
PF: predicated region fallthrough
CT: control target
= control target key end

     0   :  { %17 = vsyncpa [#allocation3], 0  ;;  %s8846_s0 = inlined_call_operand.vmem [shape: bf16[128,32], index: 0, kind: input, shape index: {}]   ;;  %s8847_s1 = inlined_call_operand.vmem [shape: bf16[32,512], index: 1, kind: input, shape index: {}]   ;;  %s8848_s2 = inlined_call_operand.vmem [shape: f32[2,512], index: 2, kind: input, shape index: {}]   ;;  %s8849_s3 = inlined_call_operand.vmem [shape: bf16[512,32], index: 3, kind: input, shape index: {}]   ;;  %s8850_s4 = inlined_call_operand.vmem [shape: f32[9,32], index: 4, kind: input, shape index: {}]   ;;  %s8851_s5 = inlined_call_operand.vmem [shape: f32[8,32], index: 5, kind: input, shape index: {}]   ;;  %s8852_s6 = inlined_call_operand.vmem [shape: bf16[32,96], index: 6, kind: input, shape index: {}]   ;;  %s8853_s7 = inlined_call_operand.vmem [shape: f32[64,32], index: 7, kind: input, shape index: {}]   ;;  %s8854_s8 = inlined_call_operand.vmem [shape: f32[64,8], index: 8, kind: input, shape index: {}]   ;;  %s8855_s9 = inlined_call_operand.vmem [shape: bf16[32,64], index: 9, kind: input, shape index: {}]   ;;  %s8856_s10 = inlined_call_operand.vmem [shape: f32[1,64], index: 10, kind: input, shape index: {}]   ;;  %s8857_s11 = inlined_call_operand.vmem [shape: bf16[64,32], index: 11, kind: input, shape index: {}]   ;;  %s8858_s12 = inlined_call_operand.hbm [shape: f32[16,32], index: 12, kind: output, shape index: {}]  }
   0x1   :  { %19 = vsyncpa [#allocation3 + $0x1], 0  ;;  %s6755_s21 = smov 0   ;;  %s6757_s22 = smov 0  }
   0x2   :  { %s6759_s23 = smov 0   ;;  %s6761_s24 = smov 0  }
   0x3 LB: > { %8904 = sst [smem:[#allocation5_spill]] %s6680_s23  ;;  %s6776_s25 = sadd.s32 4294967295, %s6684_s24   ;;  %s6684_s24 = sphi %s6761_s24, %s9003_s24   ;;  %s6680_s23 = sphi %s6759_s23, %s9005_s23   ;;  %s6676_s22 = sphi %s6757_s22, %s9007_s22   ;;  %s6672_s21 = sphi %s6755_s21, %s9006_s21  }
   0x4   : > { %s5390_s26 = sadd.s32 4294967294, %s6684_s24   ;;  %s6780_s27 = sadd.s32 1, %s6684_s24  }
   0x5   : > { %8905 = sst [smem:[#allocation6_spill]] %s6780_s27  ;;  %s289_s28 = sadd.s32 1, %s6680_s23 }
   0x6   : > { %s286_s29 = ssub.s32 %s6684_s24, %s6780_s27  ;;  %p299_p0 = scmp.ne.s32.totalorder %s6680_s23, %s6676_s22 }
   0x7   : > { %p287_p1 = scmp.eq.s32.totalorder %s286_s29, 0  ;;  %p300_p2 = scmp.eq.s32.totalorder %s6776_s25, 1 }
   0x8   : > { %p305_p3 = scmp.ne.s32.totalorder %s6676_s22, %s6672_s21  ;;  %p306_p4 = scmp.eq.s32.totalorder %s5390_s26, 1 }
   0x9   : > { %s6791_s30 = scalar_select %p287_p1, %s6680_s23, %s289_s28  }
   0xa   : > { %p6793_p5 = por %p300_p2, %p299_p0  ;;  %p6797_p6 = por %p306_p4, %p305_p3 }
   0xb   : > { %8906 = sst [smem:[#allocation7_spill]] %s6791_s30  ;;  %p5393_p7 = scmp.ge.s32.totalorder %s6684_s24, 1 }
   0xc   : > { %p366_p8 = scmp.lt.s32.totalorder %s6684_s24, 3 }
   0xe   : > { %p367_p9 = pnand %p5393_p7, %p366_p8 }
  0x10   : > { %370 = sbr.rel (%p367_p9) target bundleno = 3182 (0xc6e), region = 68 }
  0x17   : > { %v6174_v0 = vld [vmem:[%s8847_s1 + $0x4] ss:$16 sps:$4 sm:$0xff]   ;;  %s5395_s17 = sshll.u32 %s6776_s25, 3  ;;  %v6176_v1 = vld [vmem:[%s8847_s1 + $0xc] ss:$16 sps:$4 sm:$0xff]   ;;  %v6686_v2 = vmov 0   ;;  %v652_v45 = vlaneseq }
  0x18   : > { %536 = vmatprep.mubr.bf16.mxu0 %v6686_v2  ;;  %609 = vmatprep.mubr.bf16.mxu1 %v6686_v2  ;;  %p409_p10 = scmp.lt.s32.totalorder %s5395_s17, 15  ;;  %v6178_v3 = vld [vmem:[%s8847_s1] ss:$16 sps:$4 sm:$0xff]   ;;  %v6179_v4 = vld [vmem:[%s8847_s1 + $0x8] ss:$16 sps:$4 sm:$0xff]   ;;  %vm491_vm0 = vcmask 261120  }
  0x19   : > { %504 = vmatprep.subr.bf16.mxu0 %v6174_v0  ;;  %577 = vmatprep.subr.bf16.mxu1 %v6176_v1  ;;  %v6180_v5 = vld [vmem:[%s8847_s1 + $0x24] ss:$16 sps:$4 sm:$0xff]   ;;  %v6182_v6 = vld [vmem:[%s8847_s1 + $0x2c] ss:$16 sps:$4 sm:$0xff]   ;;  %v6184_v7 = vld [vmem:[%s8847_s1 + $0x20] ss:$16 sps:$4 sm:$0xff]  }
  0x1a   : > { %s9009_s17 = smov (!%p409_p10, %s5395_s17), 15  ;;  %505 = vmatpush1.bf16.msra.mxu0 %v6178_v3  ;;  %578 = vmatpush1.bf16.msra.mxu1 %v6179_v4  ;;  %v6185_v8 = vld [vmem:[%s8847_s1 + $0x28] ss:$16 sps:$4 sm:$0xff]   ;;  %v6190_v9 = vld [vmem:[%s8849_s3 + $0x40] sm:$0xff]   ;;  %v6198_v21 = vld [vmem:[%s8849_s3 + $0x50] sm:$0xff]   ;;  %v653_v46 = vshrl.u32 %v652_v45, 7 }
  0x1b   : > { %506 = vmatprep.subr.bf16.mxu0 %v6180_v5  ;;  %s5396_s28 = sshll.u32 %s9009_s17, 2  ;;  %579 = vmatprep.subr.bf16.mxu1 %v6182_v6  ;;  %v6191_v11 = vld [vmem:[%s8849_s3 + $0xc0] sm:$0xff]   ;;  %v6194_v17 = vld [vmem:[%s8849_s3 + $0x48] sm:$0xff]   ;;  %v6199_v22 = vld [vmem:[%s8849_s3 + $0xd0] sm:$0xff]   ;;  %s6687_s26 = smov 96   ;;  %vm2637_vm1 = vcmask 64512  }
  0x1c   : > { %s412_s18 = scalar_lea.vmem %s8846_s0, %s5396_s28  ;;  %v6192_v12 = vld [vmem:[%s8849_s3] sm:$0xff]   ;;  %v6195_v18 = vld [vmem:[%s8849_s3 + $0xc8] sm:$0xff]   ;;  %v6200_v23 = vld [vmem:[%s8849_s3 + $0x10] sm:$0xff]   ;;  %v654_v47 = vsub.s32 0, %v653_v46  ;;  %v662_v48 = vsub.s32 2, %v653_v46  ;;  %v658_v50 = vsub.s32 1, %v653_v46 }
  0x1d   : > { %v6186_v10 = vld [vmem:[%s412_s18] sm:$0xff]   ;;  %v6187_v13 = vld [vmem:[%s412_s18 + $0x8] sm:$0xff]   ;;  %v6188_v15 = vld [vmem:[%s412_s18 + $0x10] sm:$0xff]   ;;  %v666_v51 = vsub.s32 3, %v653_v46  ;;  %s6688_s28 = smov 64   ;;  %vm5012_vm2 = vcmask 523264  }
  0x1e   : > { %507 = vmatpush1.bf16.msra.mxu0 %v6184_v7  ;;  %580 = vmatpush1.bf16.msra.mxu1 %v6185_v8  ;;  %v6193_v14 = vld [vmem:[%s8849_s3 + $0x80] sm:$0xff]   ;;  %v6189_v16 = vld [vmem:[%s412_s18 + $0x18] sm:$0xff]   ;;  %v6196_v19 = vld [vmem:[%s8849_s3 + $0x8] sm:$0xff]   ;;  %vm5301_vm3 = vcmask 1041409   ;;  %vm5303_vm4 = vcmask 1042434   ;;  %s405_s23 = sand.u32 1, %s6676_s22  }
  0x1f   : > { %5620 = vmatprep.subr.bf16.mxu0 %v6190_v9  ;;  %5660 = vmatprep.subr.bf16.mxu1 %v6191_v11  ;;  %v6197_v20 = vld [vmem:[%s8849_s3 + $0x88] sm:$0xff]   ;;  %v6201_v24 = vld [vmem:[%s8849_s3 + $0x90] sm:$0xff]   ;;  %v6202_v25 = vld [vmem:[%s8849_s3 + $0x58] sm:$0xff]   ;;  %vm5305_vm5 = vcmask 1043459   ;;  %s8794_s30 = sshll.u32 %s405_s23, 3  ;;  %vm5307_vm6 = vcmask 1044484  }
  0x20   : > { %v6203_v26 = vld [vmem:[%s8849_s3 + $0xd8] sm:$0xff]   ;;  %v6206_v29 = vld [vmem:[%s8849_s3 + $0x60] sm:$0xff]   ;;  %v6210_v33 = vld [vmem:[%s8849_s3 + $0x68] sm:$0xff]   ;;  %vm5309_vm7 = vcmask 1045509   ;;  %vm5311_vm8 = vcmask 1046534   ;;  %s5617_s18 = sshll.u32 %s6776_s25, 7 }
  0x21   : > { %5409 = vmatmul.mubr.msk.bf16.vlgmr.msra.gmra.mrb[0].mxu0 %vm491_vm0, %v6186_v10  ;;  %5413 = vmatmul.mubr.msk.bf16.vlgmr.msra.gmra.mrb[0].mxu1 %vm491_vm0, %v6186_v10  ;;  %v6204_v27 = vld [vmem:[%s8849_s3 + $0x18] sm:$0xff]   ;;  %v6207_v30 = vld [vmem:[%s8849_s3 + $0xe0] sm:$0xff]   ;;  %v6211_v34 = vld [vmem:[%s8849_s3 + $0xe8] sm:$0xff]   ;;  %s407_s17 = scalar_lea.vmem [#allocation2], %s8794_s30  ;;  %vm5313_vm9 = vcmask 1047559   ;;  %s8801_s20 = scalar_lea.hbm %s8858_s12, %s5617_s18 }
  0x22   : > { %546 = vmatprep.mubr.bf16.mxu0 %v6686_v2  ;;  %619 = vmatprep.mubr.bf16.mxu1 %v6686_v2  ;;  %v6205_v28 = vld [vmem:[%s8849_s3 + $0x98] sm:$0xff]   ;;  %v6208_v31 = vld [vmem:[%s8849_s3 + $0x20] sm:$0xff]   ;;  %v6212_v35 = vld [vmem:[%s8849_s3 + $0x28] sm:$0xff]   ;;  %s5318_s25 = scalar_lea.sflag [#allocation3], %s405_s23  ;;  %s6689_s29 = smov [#allocation2]  }
  0x23   : > { %5621 = vmatpush3.bf16.msra.mxu0 %v6192_v12  ;;  %5661 = vmatpush3.bf16.msra.mxu1 %v6193_v14  ;;  %v6209_v32 = vld [vmem:[%s8849_s3 + $0xa0] sm:$0xff]   ;;  %v6213_v36 = vld [vmem:[%s8849_s3 + $0xa8] sm:$0xff]   ;;  %v6214_v37 = vld [vmem:[%s8849_s3 + $0x70] sm:$0xff]   ;;  %s6626_s15 = sshll.u32 %s6689_s29, 4  ;;  %s6627_s15 = int_to_ptr.vmem [resolvable:$false] %s6626_s15 }
  0x24   : > { %5622 = vmatprep.subr.bf16.mxu0 %v6194_v17  ;;  %5662 = vmatprep.subr.bf16.mxu1 %v6195_v18  ;;  %v6215_v38 = vld [vmem:[%s8849_s3 + $0xf0] sm:$0xff]   ;;  %v6218_v41 = vld [vmem:[%s8849_s3 + $0x78] sm:$0xff]   ;;  %v650_v49 = vld [vmem:[%s8848_s2] ss:$2 sm:$0xf]  ;;  %s6628_s16 = scalar_lea.vmem %s6627_s15, 256 }
  0x25   : > { %v6216_v39 = vld [vmem:[%s8849_s3 + $0x30] sm:$0xff]   ;;  %v6219_v42 = vld [vmem:[%s8849_s3 + $0xf8] sm:$0xff]   ;;  %v5417_v52 = vld [vmem:[%s8848_s2 + $0x1] ss:$2 sm:$0xf]  ;;  %v6941_v53 = vrot.slane %v650_v49, %v654_v47  ;;  %v6943_v54 = vrot.slane %v650_v49, %v662_v48  ;;  %v6945_v55 = vrot.slane %v650_v49, %v658_v50  ;;  %v6947_v56 = vrot.slane %v650_v49, %v666_v51 }
  0x26   : > { %v6217_v40 = vld [vmem:[%s8849_s3 + $0xb0] sm:$0xff]   ;;  %v6220_v43 = vld [vmem:[%s8849_s3 + $0x38] sm:$0xff]   ;;  %v6949_v57 = vrot.slane %v5417_v52, %v654_v47  ;;  %v6951_v58 = vrot.slane %v5417_v52, %v662_v48  ;;  %v6953_v61 = vrot.slane %v5417_v52, %v658_v50  ;;  %v6955_v62 = vrot.slane %v5417_v52, %v666_v51 }
  0x27   : > { %5623 = vmatpush3.bf16.msra.mxu0 %v6196_v19  ;;  %5663 = vmatpush3.bf16.msra.mxu1 %v6197_v20  ;;  %v6221_v44 = vld [vmem:[%s8849_s3 + $0xb8] sm:$0xff]  }
  0x28   : > { %5624 = vmatprep.subr.bf16.mxu0 %v6198_v21  ;;  %5664 = vmatprep.subr.bf16.mxu1 %v6199_v22 }
  0x29   : > { %5410 = vmatmul.mubr.msk.bf16.gmra.mrb[4].mxu0 %vm491_vm0, %v6187_v13  ;;  %5414 = vmatmul.mubr.msk.bf16.gmra.mrb[4].mxu1 %vm491_vm0, %v6187_v13 }
  0x2a   : > { %556 = vmatprep.mubr.bf16.mxu0 %v6686_v2  ;;  %629 = vmatprep.mubr.bf16.mxu1 %v6686_v2 }
  0x2b   : > { %5625 = vmatpush3.bf16.msra.mxu0 %v6200_v23  ;;  %5665 = vmatpush3.bf16.msra.mxu1 %v6201_v24 }
  0x2c   : > { %5626 = vmatprep.subr.bf16.mxu0 %v6202_v25  ;;  %5666 = vmatprep.subr.bf16.mxu1 %v6203_v26 }
  0x2f   : > { %5627 = vmatpush3.bf16.msra.mxu0 %v6204_v27  ;;  %5667 = vmatpush3.bf16.msra.mxu1 %v6205_v28 }
  0x30   : > { %5628 = vmatprep.subr.bf16.mxu0 %v6206_v29  ;;  %5668 = vmatprep.subr.bf16.mxu1 %v6207_v30 }
  0x31   : > { %5411 = vmatmul.mubr.msk.bf16.gmra.mrb[8].mxu0 %vm491_vm0, %v6188_v15  ;;  %5415 = vmatmul.mubr.msk.bf16.gmra.mrb[8].mxu1 %vm491_vm0, %v6188_v15 }
  0x32   : > { %566 = vmatprep.mubr.bf16.mxu0 %v6686_v2  ;;  %639 = vmatprep.mubr.bf16.mxu1 %v6686_v2 }
  0x33   : > { %5629 = vmatpush3.bf16.msra.mxu0 %v6208_v31  ;;  %5669 = vmatpush3.bf16.msra.mxu1 %v6209_v32 }
  0x34   : > { %5630 = vmatprep.subr.bf16.mxu0 %v6210_v33  ;;  %5670 = vmatprep.subr.bf16.mxu1 %v6211_v34 }
  0x37   : > { %5631 = vmatpush3.bf16.msra.mxu0 %v6212_v35  ;;  %5671 = vmatpush3.bf16.msra.mxu1 %v6213_v36 }
  0x38   : > { %5632 = vmatprep.subr.bf16.mxu0 %v6214_v37  ;;  %5672 = vmatprep.subr.bf16.mxu1 %v6215_v38 }
  0x39   : > { %5412 = vmatmul.mubr.msk.bf16.gmra.mrb[12].mxu0 %vm491_vm0, %v6189_v16  ;;  %5416 = vmatmul.mubr.msk.bf16.gmra.mrb[12].mxu1 %vm491_vm0, %v6189_v16 }
  0x3b   : > { %5633 = vmatpush3.bf16.msra.mxu0 %v6216_v39  ;;  %5673 = vmatpush3.bf16.msra.mxu1 %v6217_v40 }
  0x3c   : > { %5634 = vmatprep.subr.bf16.mxu0 %v6218_v41  ;;  %5674 = vmatprep.subr.bf16.mxu1 %v6219_v42 }
  0x3f   : > { %5635 = vmatpush3.bf16.msra.mxu0 %v6220_v43  ;;  %5675 = vmatpush3.bf16.msra.mxu1 %v6221_v44 }
  0xf4   : > { %v538_v59 = vpop.f32.mrb[0].mxu0  ;;  %v611_v60 = vpop.f32.mrb[0].mxu1 }
  0xf5   : > { %v672_v63 = vmul.f32 %v6941_v53, %v538_v59  ;;  %v674_v0 = vmul.f32 %v6943_v54, %v611_v60  ;;  %v540_v1 = vpop.f32.mrb[1].mxu0  ;;  %v613_v2 = vpop.f32.mrb[1].mxu1 }
  0xf6   : > { %v673_v3 = vmul.f32 %v6945_v55, %v540_v1  ;;  %v675_v4 = vmul.f32 %v6947_v56, %v613_v2  ;;  %v542_v5 = vpop.f32.mrb[2].mxu0  ;;  %v615_v6 = vpop.f32.mrb[2].mxu1 }
  0xf7   : > { %v727_v7 = vadd.f32 %v6949_v57, %v672_v63  ;;  %v729_v8 = vadd.f32 %v6951_v58, %v674_v0  ;;  %v676_v9 = vmul.f32 %v6941_v53, %v542_v5  ;;  %v678_v10 = vmul.f32 %v6943_v54, %v615_v6  ;;  %v544_v11 = vpop.f32.mrb[3].mxu0  ;;  %v617_v12 = vpop.f32.mrb[3].mxu1 }
  0xf8   : > { %v728_v13 = vadd.f32 %v6953_v61, %v673_v3  ;;  %v730_v14 = vadd.f32 %v6955_v62, %v675_v4  ;;  %v677_v15 = vmul.f32 %v6945_v55, %v544_v11  ;;  %v679_v16 = vmul.f32 %v6947_v56, %v617_v12 }
  0xf9   : > { %v791_v17 = vmul.f32 0.70710677, %v727_v7  ;;  %v793_v18 = vmul.f32 0.70710677, %v729_v8  ;;  %v731_v21 = vadd.f32 %v6949_v57, %v676_v9  ;;  %v733_v22 = vadd.f32 %v6951_v58, %v678_v10 }
  0xfa   : > { %v792_v19 = vmul.f32 0.70710677, %v728_v13  ;;  %v794_v20 = vmul.f32 0.70710677, %v730_v14  ;;  %v732_v23 = vadd.f32 %v6953_v61, %v677_v15  ;;  %v734_v24 = vadd.f32 %v6955_v62, %v679_v16 }
  0xfb   : > { %6230 = verf.f32 %v791_v17  ;;  %v6973_v27 = vmul.f32 0.5, %v727_v7  ;;  %v6975_v28 = vmul.f32 0.5, %v729_v8  ;;  %v795_v29 = vmul.f32 0.70710677, %v731_v21 }
  0xfc   : > { %6232 = verf.f32 %v793_v18  ;;  %v548_v25 = vpop.f32.mrb[4].mxu0  ;;  %v621_v26 = vpop.f32.mrb[4].mxu1  ;;  %v6977_v32 = vmul.f32 0.5, %v728_v13  ;;  %v6979_v33 = vmul.f32 0.5, %v730_v14  ;;  %v797_v34 = vmul.f32 0.70710677, %v733_v22 }
  0xfd   : > { %6234 = verf.f32 %v792_v19  ;;  %v550_v30 = vpop.f32.mrb[5].mxu0  ;;  %v623_v31 = vpop.f32.mrb[5].mxu1  ;;  %v796_v36 = vmul.f32 0.70710677, %v732_v23  ;;  %v798_v37 = vmul.f32 0.70710677, %v734_v24  ;;  %v680_v38 = vmul.f32 %v6941_v53, %v548_v25 }
  0xfe   : > { %6236 = verf.f32 %v794_v20  ;;  %v552_v35 = vpop.f32.mrb[6].mxu0  ;;  %v625_v39 = vpop.f32.mrb[6].mxu1  ;;  %v682_v41 = vmul.f32 %v6943_v54, %v621_v26  ;;  %v681_v42 = vmul.f32 %v6945_v55, %v550_v30  ;;  %v683_v43 = vmul.f32 %v6947_v56, %v623_v31 }
  0xff   : > { %6238 = verf.f32 %v795_v29  ;;  %v554_v40 = vpop.f32.mrb[7].mxu0  ;;  %v627_v44 = vpop.f32.mrb[7].mxu1  ;;  %v763_v45 = vmul.f32 0.5, %v731_v21  ;;  %v735_v46 = vadd.f32 %v6949_v57, %v680_v38  ;;  %v684_v47 = vmul.f32 %v6941_v53, %v552_v35 }
 0x100   : > { %6240 = verf.f32 %v797_v34  ;;  %v686_v48 = vmul.f32 %v6943_v54, %v625_v39  ;;  %v765_v49 = vmul.f32 0.5, %v733_v22  ;;  %v737_v50 = vadd.f32 %v6951_v58, %v682_v41 }
 0x101   : > { %v736_v51 = vadd.f32 %v6953_v61, %v681_v42  ;;  %v738_v52 = vadd.f32 %v6955_v62, %v683_v43  ;;  %v6991_v59 = vmul.f32 0.5, %v732_v23  ;;  %6242 = verf.f32 %v796_v36 }
 0x102   : > { %v799_v60 = vmul.f32 0.70710677, %v735_v46  ;;  %v739_v63 = vadd.f32 %v6949_v57, %v684_v47  ;;  %6244 = verf.f32 %v798_v37  ;;  %v801_v0 = vmul.f32 0.70710677, %v737_v50 }
 0x103   : > { %v800_v1 = vmul.f32 0.70710677, %v736_v51  ;;  %v741_v2 = vadd.f32 %v6951_v58, %v686_v48  ;;  %v6995_v4 = vmul.f32 0.5, %v734_v24  ;;  %v6997_v5 = vmul.f32 0.5, %v735_v46 }
 0x104   : > { %6246 = verf.f32 %v799_v60  ;;  %v6999_v6 = vmul.f32 0.5, %v737_v50  ;;  %v558_v7 = vpop.f32.mrb[8].mxu0  ;;  %v631_v8 = vpop.f32.mrb[8].mxu1  ;;  %v7001_v11 = vmul.f32 0.5, %v736_v51  ;;  %v802_v12 = vmul.f32 0.70710677, %v738_v52 }
 0x105   : > { %v6231_v3 = vpop.eup %6230  ;;  %v560_v13 = vpop.f32.mrb[9].mxu0  ;;  %6248 = verf.f32 %v801_v0  ;;  %v7003_v16 = vmul.f32 0.5, %v738_v52  ;;  %v803_v17 = vmul.f32 0.70710677, %v739_v63  ;;  %v685_v18 = vmul.f32 %v6945_v55, %v554_v40 }
 0x106   : > { %v6233_v9 = vpop.eup %6232  ;;  %v855_v10 = vadd.f32 1.0, %v6231_v3  ;;  %v633_v14 = vpop.f32.mrb[9].mxu1  ;;  %6250 = verf.f32 %v800_v1  ;;  %v7008_v22 = vmul.f32 0.5, %v739_v63  ;;  %v805_v23 = vmul.f32 0.70710677, %v741_v2 }
 0x107   : > { %v6235_v15 = vpop.eup %6234  ;;  %v562_v19 = vpop.f32.mrb[10].mxu0  ;;  %v687_v24 = vmul.f32 %v6947_v56, %v627_v44  ;;  %v857_v31 = vadd.f32 1.0, %v6233_v9  ;;  %v7018_v34 = vmul.f32 0.5, %v741_v2  ;;  %v740_v35 = vadd.f32 %v6953_v61, %v685_v18 }
 0x108   : > { %v7006_v20 = vpop.f32.mrb[10].mxu1  ;;  %v6237_v21 = vpop.eup %6236  ;;  %v7016_v30 = vmul.f32 %v855_v10, %v6973_v27  ;;  %6252 = verf.f32 %v802_v12  ;;  %v688_v39 = vmul.f32 %v6941_v53, %v558_v7  ;;  %v690_v42 = vmul.f32 %v6943_v54, %v631_v8 }
 0x109   : > { %v7011_v25 = vpop.f32.mrb[11].mxu0  ;;  %v7013_v26 = vpop.f32.mrb[11].mxu1  ;;  %v742_v38 = vadd.f32 %v6955_v62, %v687_v24  ;;  %6254 = verf.f32 %v803_v17  ;;  %v804_v41 = vmul.f32 0.70710677, %v740_v35  ;;  %v7024_v43 = vadd.f32 1.0, %v6235_v15 }
 0x10a   : > { %v6239_v29 = vpop.eup %6238  ;;  %6256 = verf.f32 %v805_v23  ;;  %v7029_v50 = vmul.f32 %v857_v31, %v6975_v28  ;;  %v7031_v51 = vadd.f32 1.0, %v6237_v21  ;;  %v743_v60 = vadd.f32 %v6949_v57, %v688_v39 }
 0x10b   : > { %v6241_v36 = vpop.eup %6240  ;;  %v859_v37 = vadd.f32 1.0, %v6239_v29  ;;  %v806_v44 = vmul.f32 0.70710677, %v742_v38  ;;  %6258 = verf.f32 %v804_v41  ;;  %v745_v2 = vadd.f32 %v6951_v58, %v690_v42 }
 0x10c   : > { %v861_v40 = vadd.f32 1.0, %v6241_v36  ;;  %v568_v46 = vpop.f32.mrb[12].mxu0  ;;  %v641_v47 = vpop.f32.mrb[12].mxu1  ;;  %v689_v3 = vmul.f32 %v6945_v55, %v560_v13  ;;  %v7046_v9 = vmul.f32 0.5, %v740_v35  ;;  %v807_v10 = vmul.f32 0.70710677, %v743_v60 }
 0x10d   : > { %v7026_v27 = vmul.f32 %v859_v37, %v763_v45  ;;  %v6243_v48 = vpop.eup %6242  ;;  %v570_v63 = vpop.f32.mrb[13].mxu0  ;;  %v691_v12 = vmul.f32 %v6947_v56, %v633_v14  ;;  %6260 = verf.f32 %v806_v44  ;;  %v809_v13 = vmul.f32 0.70710677, %v745_v2 }
 0x10e   : > { %v7033_v52 = vmul.f32 %v861_v40, %v765_v49  ;;  %v643_v0 = vpop.f32.mrb[13].mxu1  ;;  %v6245_v1 = vpop.eup %6244  ;;  %v7053_v18 = vadd.f32 1.0, %v6243_v48  ;;  %v744_v21 = vadd.f32 %v6953_v61, %v689_v3  ;;  %v7058_v29 = vmul.f32 0.5, %v742_v38 }
 0x10f   : > { %v7040_v7 = vpop.f32.mrb[14].mxu0  ;;  %v7042_v28 = vpop.f32.mrb[14].mxu1  ;;  %v7056_v24 = vadd.f32 1.0, %v6245_v1  ;;  %v746_v31 = vadd.f32 %v6955_v62, %v691_v12  ;;  %v692_v35 = vmul.f32 %v6941_v53, %v562_v19  ;;  %v7064_v37 = vmul.f32 0.5, %v743_v60 }
 0x110   : > { %v6247_v8 = vpop.eup %6246  ;;  %v7049_v15 = vpop.f32.mrb[15].mxu0  ;;  %6262 = verf.f32 %v807_v10  ;;  %v808_v39 = vmul.f32 0.70710677, %v744_v21  ;;  %v7066_v40 = vmul.f32 0.5, %v745_v2  ;;  %v694_v19 = vmul.f32 %v6943_v54, %v7006_v20 }
 0x111   : > { %v7051_v17 = vpop.f32.mrb[15].mxu1  ;;  %v6249_v23 = vpop.eup %6248  ;;  %v7062_v36 = vadd.f32 1.0, %v6247_v8  ;;  %8909 = vst [vmem:[#allocation8_spill] sm:$0xff] %v7064_v37  ;;  %6264 = verf.f32 %v809_v13  ;;  %v810_v41 = vmul.f32 0.70710677, %v746_v31  ;;  %v747_v42 = vadd.f32 %v6949_v57, %v692_v35 }
 0x112   : > { %v6251_v14 = vpop.eup %6250  ;;  %8910 = vst [vmem:[#allocation9_spill] sm:$0xff] %v7066_v40  ;;  %v7069_v38 = vadd.f32 1.0, %v6249_v23  ;;  %6266 = verf.f32 %v808_v39  ;;  %v693_v48 = vmul.f32 %v6945_v55, %v7011_v25  ;;  %v7077_v3 = vmul.f32 0.5, %v744_v21 }
 0x113   : > { %v6253_v44 = vpop.eup %6252  ;;  %v7075_v1 = vadd.f32 1.0, %v6251_v14  ;;  %6268 = verf.f32 %v810_v41  ;;  %v811_v2 = vmul.f32 0.70710677, %v747_v42  ;;  %v749_v10 = vadd.f32 %v6951_v58, %v694_v19 }
 0x114   : > { %v6255_v60 = vpop.eup %6254  ;;  %v748_v12 = vadd.f32 %v6953_v61, %v693_v48  ;;  %v695_v13 = vmul.f32 %v6947_v56, %v7013_v26  ;;  %v696_v20 = vmul.f32 %v6941_v53, %v568_v46  ;;  %v7084_v23 = vadd.f32 1.0, %v6253_v44 }
 0x115   : > { %v6257_v8 = vpop.eup %6256  ;;  %v698_v25 = vmul.f32 %v6943_v54, %v641_v47  ;;  %v697_v35 = vmul.f32 %v6945_v55, %v570_v63  ;;  %v699_v21 = vmul.f32 %v6947_v56, %v643_v0  ;;  %v7089_v39 = vadd.f32 1.0, %v6255_v60 }
 0x116   : > { %v6259_v14 = vpop.eup %6258  ;;  %v7091_v41 = vmul.f32 0.5, %v746_v31  ;;  %6270 = verf.f32 %v811_v2  ;;  %v813_v19 = vmul.f32 0.70710677, %v749_v10  ;;  %v7093_v48 = vadd.f32 1.0, %v6257_v8 }
 0x117   : > { %v812_v26 = vmul.f32 0.70710677, %v748_v12  ;;  %v750_v46 = vadd.f32 %v6955_v62, %v695_v13  ;;  %v751_v44 = vadd.f32 %v6949_v57, %v696_v20  ;;  %v6261_v49 = vpop.eup %6260  ;;  %v7097_v47 = vmul.f32 0.5, %v747_v42 }
 0x118   : > { %8911 = vst [vmem:[#allocation10_spill] sm:$0xff] %v7091_v41  ;;  %v753_v63 = vadd.f32 %v6951_v58, %v698_v25  ;;  %v752_v0 = vadd.f32 %v6953_v61, %v697_v35  ;;  %v754_v60 = vadd.f32 %v6955_v62, %v699_v21  ;;  %v868_v31 = vadd.f32 1.0, %v6259_v14 }
 0x119   : > { %8912 = vst [vmem:[#allocation11_spill] sm:$0xff] %v7097_v47  ;;  %v7102_v45 = vmul.f32 0.5, %v749_v10  ;;  %6272 = verf.f32 %v812_v26  ;;  %v814_v2 = vmul.f32 0.70710677, %v750_v46  ;;  %v7104_v40 = vmul.f32 0.5, %v748_v12 }
 0x11a   : > { %v6263_v8 = vpop.eup %6262  ;;  %6274 = verf.f32 %v813_v19  ;;  %v815_v13 = vmul.f32 0.70710677, %v751_v44  ;;  %v817_v20 = vmul.f32 0.70710677, %v753_v63  ;;  %v870_v42 = vadd.f32 1.0, %v6261_v49 }
 0x11b   : > { %v6265_v37 = vpop.eup %6264  ;;  %v7106_v47 = vmul.f32 0.5, %v750_v46  ;;  %6276 = verf.f32 %v814_v2  ;;  %v816_v25 = vmul.f32 0.70710677, %v752_v0  ;;  %v7108_v41 = vmul.f32 0.5, %v751_v44 }
 0x11c   : > { %v6267_v35 = vpop.eup %6266  ;;  %6278 = verf.f32 %v815_v13  ;;  %v818_v10 = vmul.f32 0.70710677, %v754_v60  ;;  %v700_v21 = vmul.f32 %v6941_v53, %v7040_v7  ;;  %v7112_v19 = vadd.f32 1.0, %v6263_v8 }
 0x11d   : > { %v6269_v14 = vpop.eup %6268  ;;  %6280 = verf.f32 %v817_v20  ;;  %v702_v12 = vmul.f32 %v6943_v54, %v7042_v28  ;;  %v701_v49 = vmul.f32 %v6945_v55, %v7049_v15  ;;  %v7118_v26 = vmul.f32 0.5, %v753_v63 }
 0x11e   : > { %6282 = verf.f32 %v816_v25  ;;  %v755_v46 = vadd.f32 %v6949_v57, %v700_v21  ;;  %v703_v44 = vmul.f32 %v6947_v56, %v7051_v17  ;;  %v7123_v2 = vadd.f32 1.0, %v6265_v37 }
 0x11f   : > { %6284 = verf.f32 %v818_v10  ;;  %v7126_v53 = vadd.f32 %v6951_v58, %v702_v12  ;;  %v7129_v7 = vadd.f32 %v6953_v61, %v701_v49  ;;  %v7131_v28 = vmul.f32 0.5, %v752_v0 }
 0x120   : > { %v6271_v54 = vpop.eup %6270  ;;  %v7133_v55 = vmul.f32 0.5, %v754_v60  ;;  %v819_v15 = vmul.f32 0.70710677, %v755_v46  ;;  %v7136_v57 = vadd.f32 %v6955_v62, %v703_v44  ;;  %v872_v63 = vadd.f32 1.0, %v6267_v35 }
 0x121   : > { %v874_v56 = vadd.f32 1.0, %v6269_v14  ;;  %v821_v17 = vmul.f32 0.70710677, %v7126_v53  ;;  %v820_v37 = vmul.f32 0.70710677, %v7129_v7  ;;  %v888_v61 = vmul.f32 %v7024_v43, %v6977_v32 }
 0x122   : > { %6286 = verf.f32 %v819_v15  ;;  %v822_v58 = vmul.f32 0.70710677, %v7136_v57  ;;  %v892_v0 = vmul.f32 %v7053_v18, %v6991_v59  ;;  %v875_v8 = vadd.f32 1.0, %v6271_v54 }
 0x123   : > { %v6273_v60 = vpop.eup %6272  ;;  %6288 = verf.f32 %v821_v17  ;;  %v890_v62 = vmul.f32 %v7031_v51, %v6979_v33  ;;  %v894_v13 = vmul.f32 %v7056_v24, %v6995_v4  ;;  %v896_v10 = vmul.f32 %v7075_v1, %v7001_v11 }
 0x124   : > { %v6275_v20 = vpop.eup %6274  ;;  %v876_v25 = vadd.f32 1.0, %v6273_v60  ;;  %6290 = verf.f32 %v820_v37  ;;  %v920_v35 = vpack.c.bf16 %v892_v0, %v888_v61  ;;  %v900_v59 = vmul.f32 %v868_v31, %v7046_v9 }
 0x125   : > { %v6277_v32 = vpop.eup %6276  ;;  %6292 = verf.f32 %v822_v58  ;;  %v922_v43 = vpack.c.bf16 %v894_v13, %v890_v62  ;;  %v898_v18 = vmul.f32 %v7084_v23, %v7003_v16  ;;  %v902_v4 = vmul.f32 %v870_v42, %v7058_v29 }
 0x126   : > { %v6279_v21 = vpop.eup %6278  ;;  %v878_v33 = vadd.f32 1.0, %v6277_v32  ;;  %1223 = vmatprep.mubr.bf16.mxu0 %v920_v35  ;;  %v895_v51 = vmul.f32 %v7062_v36, %v6997_v5  ;;  %v899_v24 = vmul.f32 %v7089_v39, %v7008_v22  ;;  %v877_v1 = vadd.f32 1.0, %v6275_v20 }
 0x127   : > { %v6281_v11 = vpop.eup %6280  ;;  %1288 = vmatprep.mubr.bf16.mxu1 %v922_v43  ;;  %v8913_v9 = vpack.c.bf16 %v7026_v27, %v7016_v30  ;;  %v924_v31 = vpack.c.bf16 %v900_v59, %v896_v10  ;;  %v897_v16 = vmul.f32 %v7069_v38, %v6999_v6  ;;  %v901_v29 = vmul.f32 %v7093_v48, %v7018_v34  ;;  %v8915_v6 = vld [vmem:[#allocation10_spill] sm:$0xff]  ;;  %v8916_v48 = vld [vmem:[#allocation8_spill] sm:$0xff] }
 0x128   : > { %v6283_v23 = vpop.eup %6282  ;;  %v787_v42 = vmul.f32 0.5, %v755_v46  ;;  %v8914_v5 = vpack.c.bf16 %v7033_v52, %v7029_v50  ;;  %v926_v22 = vpack.c.bf16 %v902_v4, %v898_v18  ;;  %v923_v36 = vpack.c.bf16 %v899_v24, %v895_v51  ;;  %v8917_v52 = vld [vmem:[#allocation11_spill] sm:$0xff] }
 0x129   : > { %1224 = vmatmul.mubr.bf16.vlgmr.msra.gmra.mrb[16].mxu0 %v8913_v9  ;;  %v904_v39 = vmul.f32 %v872_v63, %v7077_v3  ;;  %v6285_v14 = vpop.eup %6284  ;;  %v879_v30 = vadd.f32 1.0, %v6279_v21  ;;  %v925_v27 = vpack.c.bf16 %v901_v29, %v897_v16  ;;  %v908_v12 = vmul.f32 %v876_v25, %v7104_v40  ;;  %v8918_v3 = vld [vmem:[#allocation9_spill] sm:$0xff] }
 0x12a   : > { %1289 = vmatmul.mubr.bf16.vlgmr.msra.gmra.mrb[16].mxu1 %v8914_v5  ;;  %1231 = vmatprep.mubr.bf16.mxu0 %v924_v31  ;;  %v906_v38 = vmul.f32 %v874_v56, %v8915_v6  ;;  %v881_v49 = vadd.f32 1.0, %v6281_v11  ;;  %v910_v34 = vmul.f32 %v878_v33, %v7106_v47  ;;  %v903_v50 = vmul.f32 %v7112_v19, %v8916_v48  ;;  %v7195_v31 = vld [vmem:[%s8850_s4] ss:$0 sm:$0xff]  ;;  %v7200_v5 = vld [vmem:[%s8850_s4 + $0x1] ss:$0 sm:$0xff] }
 0x12b   : > { %1296 = vmatprep.mubr.bf16.mxu1 %v926_v22  ;;  %v907_v46 = vmul.f32 %v875_v8, %v8917_v52  ;;  %v880_v44 = vadd.f32 1.0, %v6283_v23  ;;  %v928_v54 = vpack.c.bf16 %v908_v12, %v904_v39  ;;  %v905_v15 = vmul.f32 %v7123_v2, %v8918_v3 }
 0x12c   : > { %v909_v63 = vmul.f32 %v877_v1, %v7102_v45  ;;  %v6287_v17 = vpop.eup %6286  ;;  %v882_v40 = vadd.f32 1.0, %v6285_v14  ;;  %v789_v56 = vmul.f32 0.5, %v7126_v53  ;;  %v930_v37 = vpack.c.bf16 %v910_v34, %v906_v38 }
 0x12d   : > { %v927_v58 = vpack.c.bf16 %v907_v46, %v903_v50  ;;  %v6289_v61 = vpop.eup %6288  ;;  %v883_v47 = vadd.f32 1.0, %v6287_v17  ;;  %v788_v0 = vmul.f32 0.5, %v7129_v7  ;;  %v911_v60 = vmul.f32 %v879_v30, %v7108_v41 }
 0x12e   : > { %v929_v19 = vpack.c.bf16 %v909_v63, %v905_v15  ;;  %v6291_v8 = vpop.eup %6290  ;;  %v885_v62 = vadd.f32 1.0, %v6289_v61  ;;  %v790_v13 = vmul.f32 0.5, %v7136_v57  ;;  %v913_v2 = vmul.f32 %v881_v49, %v7118_v26  ;;  %v6222_v26 = vld [vmem:[%s8852_s6] sm:$0xff]  }
 0x12f   : > { %v6293_v45 = vpop.eup %6292  ;;  %v884_v20 = vadd.f32 1.0, %v6291_v8  ;;  %v912_v53 = vmul.f32 %v880_v44, %v7131_v28  ;;  %v915_v25 = vmul.f32 %v883_v47, %v787_v42  ;;  %v914_v7 = vmul.f32 %v882_v40, %v7133_v55  ;;  %5864 = vmatprep.subr.bf16.mxu0 %v6222_v26  ;;  %6128 = vmatprep.subr.bf16.mxu1 %v6222_v26  ;;  %v6223_v28 = vld [vmem:[%s8852_s6 + $0x8] sm:$0xff]  }
 0x130   : > { %v886_v35 = vadd.f32 1.0, %v6293_v45  ;;  %v917_v10 = vmul.f32 %v885_v62, %v789_v56  ;;  %5865 = vmatpush3.bf16.msra.mxu0 %v6222_v26  ;;  %6130 = vmatpush3.bf16.msra.mxu1 %v6222_v26 }
 0x131   : > { %1232 = vmatmul.mubr.bf16.gmra.mrb[20].mxu0 %v923_v36  ;;  %v916_v41 = vmul.f32 %v884_v20, %v788_v0  ;;  %v931_v32 = vpack.c.bf16 %v915_v25, %v911_v60  ;;  %5866 = vmatprep.subr.bf16.mxu0 %v6223_v28 }
 0x132   : > { %1297 = vmatmul.mubr.bf16.gmra.mrb[20].mxu1 %v925_v27  ;;  %1239 = vmatprep.mubr.bf16.mxu0 %v928_v54  ;;  %v918_v43 = vmul.f32 %v886_v35, %v790_v13  ;;  %v933_v59 = vpack.c.bf16 %v917_v10, %v913_v2 }
 0x133   : > { %1304 = vmatprep.mubr.bf16.mxu1 %v930_v37  ;;  %v932_v57 = vpack.c.bf16 %v916_v41, %v912_v53  ;;  %6129 = vmatprep.subr.bf16.mxu1 %v6223_v28 }
 0x134   : > { %v934_v18 = vpack.c.bf16 %v918_v43, %v914_v7  ;;  %5867 = vmatpush3.bf16.msra.mxu0 %v6223_v28  ;;  %6131 = vmatpush3.bf16.msra.mxu1 %v6223_v28 }
 0x139   : > { %1240 = vmatmul.mubr.bf16.gmra.mrb[24].mxu0 %v927_v58 }
 0x13a   : > { %1305 = vmatmul.mubr.bf16.gmra.mrb[24].mxu1 %v929_v19  ;;  %1247 = vmatprep.mubr.bf16.mxu0 %v932_v57 }
 0x13b   : > { %1312 = vmatprep.mubr.bf16.mxu1 %v934_v18 }
 0x141   : > { %1248 = vmatmul.mubr.bf16.gmra.mrb[28].mxu0 %v931_v32 }
 0x142   : > { %1313 = vmatmul.mubr.bf16.gmra.mrb[28].mxu1 %v933_v59 }
 0x1fc   : > { %v5636_v55 = vpop.f32.mrb[16].mxu0 }
 0x1fd   : > { %v5676_v21 = vpop.f32.mrb[16].mxu1  ;;  %v5637_v33 = vpop.f32.mrb[17].mxu0 }
 0x1fe   : > { %v5638_v4 = vadd.f32 %v5637_v33, %v5636_v55  ;;  %v5677_v51 = vpop.f32.mrb[17].mxu1  ;;  %v5639_v24 = vpop.f32.mrb[18].mxu0 }
 0x1ff   : > { %v5678_v11 = vadd.f32 %v5677_v51, %v5676_v21  ;;  %v5679_v1 = vpop.f32.mrb[18].mxu1  ;;  %v5640_v9 = vpop.f32.mrb[19].mxu0 }
 0x200   : > { %v5641_v16 = vadd.f32 %v5640_v9, %v5639_v24  ;;  %v5680_v29 = vpop.f32.mrb[19].mxu1  ;;  %v1387_v9 = vld [vmem:[%s8851_s5] sm:$0xff] }
 0x201   : > { %v1291_v23 = vadd.f32 %v5678_v11, %v5638_v4  ;;  %v5681_v42 = vadd.f32 %v5680_v29, %v5679_v1 }
 0x203   : > { %v1326_v22 = vmul.f32 %v7195_v31, %v1291_v23  ;;  %v1294_v36 = vadd.f32 %v5681_v42, %v5641_v16 }
 0x204   : > { %v5642_v39 = vpop.f32.mrb[20].mxu0 }
 0x205   : > { %v1339_v14 = vadd.f32 %v7200_v5, %v1326_v22  ;;  %v1327_v30 = vmul.f32 %v7195_v31, %v1294_v36  ;;  %v5682_v27 = vpop.f32.mrb[20].mxu1  ;;  %v5643_v12 = vpop.f32.mrb[21].mxu0 }
 0x206   : > { %v5644_v6 = vadd.f32 %v5643_v12, %v5642_v39  ;;  %v5683_v38 = vpop.f32.mrb[21].mxu1  ;;  %v5645_v49 = vpop.f32.mrb[22].mxu0 }
 0x207   : > { %v1355_v34 = vmul.f32 0.70710677, %v1339_v14  ;;  %v1340_v48 = vadd.f32 %v7200_v5, %v1327_v30  ;;  %v5684_v50 = vadd.f32 %v5683_v38, %v5682_v27  ;;  %v5685_v52 = vpop.f32.mrb[22].mxu1  ;;  %v5646_v46 = vpop.f32.mrb[23].mxu0  ;;  %v1347_v43 = vmul.f32 0.5, %v1339_v14 }
 0x208   : > { %v5647_v44 = vadd.f32 %v5646_v46, %v5645_v49  ;;  %v5686_v54 = vpop.f32.mrb[23].mxu1 }
 0x209   : > { %6294 = verf.f32 %v1355_v34  ;;  %v1356_v3 = vmul.f32 0.70710677, %v1340_v48  ;;  %v1299_v15 = vadd.f32 %v5684_v50, %v5644_v6  ;;  %v5687_v63 = vadd.f32 %v5686_v54, %v5685_v52 }
 0x20a   : > { %v1348_v4 = vmul.f32 0.5, %v1340_v48 }
 0x20b   : > { %6296 = verf.f32 %v1356_v3  ;;  %v1328_v17 = vmul.f32 %v7195_v31, %v1299_v15  ;;  %v1302_v40 = vadd.f32 %v5687_v63, %v5647_v44 }
 0x20c   : > { %v5648_v56 = vpop.f32.mrb[24].mxu0 }
 0x20d   : > { %v1341_v37 = vadd.f32 %v7200_v5, %v1328_v17  ;;  %v5688_v58 = vpop.f32.mrb[24].mxu1  ;;  %v5649_v61 = vpop.f32.mrb[25].mxu0  ;;  %v1329_v47 = vmul.f32 %v7195_v31, %v1302_v40 }
 0x20e   : > { %v5650_v0 = vadd.f32 %v5649_v61, %v5648_v56  ;;  %v5689_v19 = vpop.f32.mrb[25].mxu1  ;;  %v5651_v60 = vpop.f32.mrb[26].mxu0 }
 0x20f   : > { %v1357_v8 = vmul.f32 0.70710677, %v1341_v37  ;;  %v5690_v62 = vadd.f32 %v5689_v19, %v5688_v58  ;;  %v5691_v13 = vpop.f32.mrb[26].mxu1  ;;  %v5652_v2 = vpop.f32.mrb[27].mxu0  ;;  %v1342_v45 = vadd.f32 %v7200_v5, %v1329_v47  ;;  %v1349_v46 = vmul.f32 0.5, %v1341_v37 }
 0x210   : > { %v5653_v20 = vadd.f32 %v5652_v2, %v5651_v60  ;;  %v5692_v53 = vpop.f32.mrb[27].mxu1 }
 0x211   : > { %6298 = verf.f32 %v1357_v8  ;;  %v1307_v25 = vadd.f32 %v5690_v62, %v5650_v0  ;;  %v5693_v35 = vadd.f32 %v5692_v53, %v5691_v13  ;;  %v1358_v7 = vmul.f32 0.70710677, %v1342_v45 }
 0x212   : > { %v1350_v63 = vmul.f32 0.5, %v1342_v45 }
 0x213   : > { %v6295_v10 = vpop.eup %6294  ;;  %v1330_v41 = vmul.f32 %v7195_v31, %v1307_v25  ;;  %v1310_v32 = vadd.f32 %v5693_v35, %v5653_v20  ;;  %6300 = verf.f32 %v1358_v7 }
 0x214   : > { %v1371_v59 = vadd.f32 1.0, %v6295_v10  ;;  %v5654_v57 = vpop.f32.mrb[28].mxu0 }
 0x215   : > { %v6297_v18 = vpop.eup %6296  ;;  %v1343_v26 = vadd.f32 %v7200_v5, %v1330_v41  ;;  %v1331_v28 = vmul.f32 %v7195_v31, %v1310_v32  ;;  %v5694_v55 = vpop.f32.mrb[28].mxu1 }
 0x216   : > { %v5655_v21 = vpop.f32.mrb[29].mxu0  ;;  %v7213_v33 = vmul.f32 %v1371_v59, %v1347_v43  ;;  %v1372_v51 = vadd.f32 1.0, %v6297_v18  ;;  %v5695_v11 = vpop.f32.mrb[29].mxu1 }
 0x217   : > { %v5656_v24 = vadd.f32 %v5655_v21, %v5654_v57  ;;  %v5657_v1 = vpop.f32.mrb[30].mxu0  ;;  %v1359_v16 = vmul.f32 0.70710677, %v1343_v26  ;;  %v1344_v29 = vadd.f32 %v7200_v5, %v1331_v28  ;;  %v5696_v23 = vadd.f32 %v5695_v11, %v5694_v55  ;;  %v5697_v42 = vpop.f32.mrb[30].mxu1  ;;  %v7252_v28 = vld [vmem:[%s8853_s7] sm:$0xff] }
 0x218   : > { %8919 = vst [vmem:[#allocation10_spill] sm:$0xff] %v7213_v33  ;;  %v5658_v22 = vpop.f32.mrb[31].mxu0  ;;  %v7219_v36 = vmul.f32 %v1372_v51, %v1348_v4  ;;  %v5698_v14 = vpop.f32.mrb[31].mxu1  ;;  %v1388_v6 = vadd.f32 %v1387_v9, %v7213_v33  ;;  %v1351_v61 = vmul.f32 0.5, %v1343_v26 }
 0x219   : > { %v5659_v39 = vadd.f32 %v5658_v22, %v5657_v1  ;;  %6302 = verf.f32 %v1359_v16  ;;  %v1360_v30 = vmul.f32 0.70710677, %v1344_v29  ;;  %v1315_v27 = vadd.f32 %v5696_v23, %v5656_v24  ;;  %v7299_v22 = vld [vmem:[%s8853_s7 + $0x8] sm:$0xff] }
 0x21a   : > { %8920 = vst [vmem:[#allocation8_spill] sm:$0xff] %v7219_v36  ;;  %v5699_v12 = vadd.f32 %v5698_v14, %v5697_v42  ;;  %v1389_v38 = vadd.f32 %v1387_v9, %v7219_v36  ;;  %v1352_v60 = vmul.f32 0.5, %v1344_v29 }
 0x21b   : > { %v6299_v49 = vpop.eup %6298  ;;  %6304 = verf.f32 %v1360_v30  ;;  %v1332_v34 = vmul.f32 %v7195_v31, %v1315_v27 }
 0x21c   : > { %v1373_v48 = vadd.f32 1.0, %v6299_v49  ;;  %v1318_v50 = vadd.f32 %v5699_v12, %v5659_v39  ;;  %v1396_v52 = vpack.c.bf16 %v1389_v38, %v1388_v6  ;;  %v7305_v39 = vld [vmem:[%s8853_s7 + $0x10] sm:$0xff]  ;;  %v7316_v12 = vld [vmem:[%s8853_s7 + $0x18] sm:$0xff]  ;;  %v7323_v6 = vld [vmem:[%s8853_s7 + $0x20] sm:$0xff] }
 0x21d   : > { %v1345_v44 = vadd.f32 %v7200_v5, %v1332_v34  ;;  %v6301_v54 = vpop.eup %6300 }
 0x21e   : > { %v1333_v3 = vmul.f32 %v7195_v31, %v1318_v50  ;;  %5868 = vmatprep.mubr.msk.bf16.mxu0 %vm491_vm0, %v1396_v52  ;;  %v7227_v15 = vmul.f32 %v1373_v48, %v1349_v46  ;;  %v1374_v17 = vadd.f32 1.0, %v6301_v54  ;;  %v7340_v52 = vld [vmem:[%s8853_s7 + $0x28] sm:$0xff]  ;;  %v7347_v46 = vld [vmem:[%s8853_s7 + $0x30] sm:$0xff] }
 0x21f   : > { %v1361_v40 = vmul.f32 0.70710677, %v1345_v44  ;;  %v1353_v20 = vmul.f32 0.5, %v1345_v44 }
 0x220   : > { %8921 = vst [vmem:[#allocation11_spill] sm:$0xff] %v7227_v15  ;;  %v1346_v56 = vadd.f32 %v7200_v5, %v1333_v3  ;;  %v7230_v58 = vmul.f32 %v1374_v17, %v1350_v63  ;;  %v1390_v0 = vadd.f32 %v1387_v9, %v7227_v15  ;;  %v7363_v17 = vld [vmem:[%s8853_s7 + $0x38] sm:$0xff] }
 0x221   : > { %6306 = verf.f32 %v1361_v40 }
 0x222   : > { %8922 = vst [vmem:[#allocation9_spill] sm:$0xff] %v7230_v58  ;;  %v1362_v47 = vmul.f32 0.70710677, %v1346_v56  ;;  %v1391_v19 = vadd.f32 %v1387_v9, %v7230_v58  ;;  %v1354_v10 = vmul.f32 0.5, %v1346_v56 }
 0x223   : > { %v6303_v37 = vpop.eup %6302 }
 0x224   : > { %v1375_v31 = vadd.f32 1.0, %v6303_v37  ;;  %6308 = verf.f32 %v1362_v47  ;;  %v1397_v62 = vpack.c.bf16 %v1391_v19, %v1390_v0 }
 0x225   : > { %v6305_v8 = vpop.eup %6304 }
 0x226   : > { %v7234_v13 = vmul.f32 %v1375_v31, %v1351_v61  ;;  %v1376_v2 = vadd.f32 1.0, %v6305_v8  ;;  %5869 = vmatmul.mubr.msk.bf16.vlgmr.msra.gmra.mrb[32].mxu0 %vm491_vm0, %v1397_v62 }
 0x228   : > { %8923 = vst [vmem:[#allocation12_spill] sm:$0xff] %v7234_v13  ;;  %v7237_v5 = vmul.f32 %v1376_v2, %v1352_v60  ;;  %v1392_v45 = vadd.f32 %v1387_v9, %v7234_v13 }
 0x22a   : > { %8924 = vst [vmem:[#allocation13_spill] sm:$0xff] %v7237_v5  ;;  %v1393_v53 = vadd.f32 %v1387_v9, %v7237_v5 }
 0x22b   : > { %v6307_v25 = vpop.eup %6306 }
 0x22c   : > { %v1377_v35 = vadd.f32 1.0, %v6307_v25  ;;  %v1398_v7 = vpack.c.bf16 %v1393_v53, %v1392_v45 }
 0x22e   : > { %v6309_v41 = vpop.eup %6308  ;;  %v7241_v32 = vmul.f32 %v1377_v35, %v1353_v20  ;;  %5872 = vmatprep.mubr.msk.bf16.mxu1 %vm491_vm0, %v1398_v7 }
 0x22f   : > { %v1378_v43 = vadd.f32 1.0, %v6309_v41 }
 0x230   : > { %8925 = vst [vmem:[#allocation14_spill] sm:$0xff] %v7241_v32  ;;  %v1394_v59 = vadd.f32 %v1387_v9, %v7241_v32 }
 0x231   : > { %v7245_v57 = vmul.f32 %v1378_v43, %v1354_v10 }
 0x233   : > { %8926 = vst [vmem:[#allocation15_spill] sm:$0xff] %v7245_v57  ;;  %v1395_v18 = vadd.f32 %v1387_v9, %v7245_v57 }
 0x235   : > { %v1399_v26 = vpack.c.bf16 %v1395_v18, %v1394_v59 }
 0x237   : > { %5873 = vmatmul.mubr.msk.bf16.vlgmr.msra.gmra.mrb[32].mxu1 %vm491_vm0, %v1399_v26 }
 0x2f9   : > { %v7254_v55 = vpop.f32.mrb[32].mxu0 }
 0x2fa   : > { %1834 = vrot.lane.b32.xlu1 %v7254_v55, %s6687_s26  ;;  %v7257_v21 = vpop.f32.mrb[33].mxu0  ;;  %v1517_v47 = vmul.f32 %v7254_v55, %v7252_v28  ;;  %v1518_v31 = vmul.f32 %v7254_v55, %v7299_v22  ;;  %v1519_v60 = vmul.f32 %v7254_v55, %v7305_v39  ;;  %v1520_v2 = vmul.f32 %v7254_v55, %v7316_v12 }
 0x2fb   : > { %1566 = vrot.lane.b32.xlu0 %v7257_v21, %s6687_s26  ;;  %v7260_v4 = vpop.f32.mrb[34].mxu0  ;;  %v1501_v51 = vmul.f32 %v7252_v28, %v7257_v21  ;;  %v1502_v14 = vmul.f32 %v7299_v22, %v7257_v21  ;;  %v1503_v27 = vmul.f32 %v7305_v39, %v7257_v21  ;;  %v1504_v49 = vmul.f32 %v7316_v12, %v7257_v21 }
 0x2fc   : > { %v7264_v24 = vpop.f32.mrb[35].mxu0  ;;  %v1505_v48 = vmul.f32 %v7323_v6, %v7257_v21  ;;  %v1506_v44 = vmul.f32 %v7340_v52, %v7257_v21  ;;  %v1507_v3 = vmul.f32 %v7347_v46, %v7257_v21  ;;  %v1508_v40 = vmul.f32 %v7363_v17, %v7257_v21 }
 0x2fd   : > { %5878 = vmatprep.mubr.msk.f32.mxu1 %vm491_vm0, %v1501_v51  ;;  %v1509_v11 = vmul.f32 %v7252_v28, %v7264_v24  ;;  %v1510_v34 = vmul.f32 %v7299_v22, %v7264_v24  ;;  %v1511_v50 = vmul.f32 %v7305_v39, %v7264_v24  ;;  %v1512_v54 = vmul.f32 %v7316_v12, %v7264_v24 }
 0x2fe   : > { %1968 = vrot.lane.b32.xlu1 %v7260_v4, %s6687_s26  ;;  %v1513_v63 = vmul.f32 %v7323_v6, %v7264_v24  ;;  %v1514_v56 = vmul.f32 %v7340_v52, %v7264_v24  ;;  %v1515_v61 = vmul.f32 %v7347_v46, %v7264_v24  ;;  %v1516_v19 = vmul.f32 %v7363_v17, %v7264_v24 }
 0x2ff   : > { %1700 = vrot.lane.b32.xlu0 %v7264_v24, %s6687_s26  ;;  %5892 = vmatprep.mubr.msk.f32.mxu0 %vm491_vm0, %v1509_v11  ;;  %v1525_v8 = vmul.f32 %v7260_v4, %v7252_v28  ;;  %v1526_v45 = vmul.f32 %v7260_v4, %v7299_v22  ;;  %v1521_v20 = vmul.f32 %v7254_v55, %v7323_v6 }
 0x300   : > { %v1527_v53 = vmul.f32 %v7260_v4, %v7305_v39  ;;  %v1522_v35 = vmul.f32 %v7254_v55, %v7340_v52  ;;  %v1528_v7 = vmul.f32 %v7260_v4, %v7316_v12  ;;  %v1523_v10 = vmul.f32 %v7254_v55, %v7347_v46 }
 0x301   : > { %v1529_v41 = vmul.f32 %v7260_v4, %v7323_v6  ;;  %v1524_v43 = vmul.f32 %v7254_v55, %v7363_v17  ;;  %v1530_v59 = vmul.f32 %v7260_v4, %v7340_v52  ;;  %v1531_v18 = vmul.f32 %v7260_v4, %v7347_v46 }
 0x30a   : > { %v7272_v1 = vpop.f32.mrb[32].mxu1 }
 0x30b   : > { %8927 = vst [vmem:[#allocation16_spill] sm:$0xff] %v7272_v1  ;;  %v7274_v9 = vpop.f32.mrb[33].mxu1 }
 0x30c   : > { %2102 = vrot.lane.b32.xlu0 %v7274_v9, %s6687_s26  ;;  %v7277_v16 = vpop.f32.mrb[34].mxu1  ;;  %v1533_v26 = vmul.f32 %v7252_v28, %v7274_v9  ;;  %v1535_v51 = vmul.f32 %v7305_v39, %v7274_v9 }
 0x30d   : > { %8928 = vst [vmem:[#allocation17_spill] sm:$0xff] %v7277_v16  ;;  %v7279_v29 = vpop.f32.mrb[35].mxu1 }
 0x30e   : > { %2236 = vrot.lane.b32.xlu1 %v7279_v29, %s6687_s26 }
 0x310   : > { %2370 = vrot.lane.b32.xlu0 %v7272_v1, %s6687_s26 }
 0x312   : > { %2504 = vrot.lane.b32.xlu1 %v7277_v16, %s6687_s26 }
 0x314   : > { %3546 = vrot.lane.b32.xlu0 %v7264_v24, %s6688_s28  ;;  %v1541_v24 = vmul.f32 %v7252_v28, %v7279_v29 }
 0x316   : > { %3414 = vrot.lane.b32.xlu1 %v7257_v21, %s6688_s28  ;;  %v1534_v21 = vmul.f32 %v7299_v22, %v7274_v9 }
 0x318   : > { %3810 = vrot.lane.b32.xlu0 %v7260_v4, %s6688_s28 }
 0x31a   : > { %3678 = vrot.lane.b32.xlu1 %v7254_v55, %s6688_s28  ;;  %v1532_v55 = vmul.f32 %v7260_v4, %v7363_v17  ;;  %v1536_v4 = vmul.f32 %v7316_v12, %v7274_v9 }
 0x31c   : > { %4074 = vrot.lane.b32.xlu0 %v7279_v29, %s6688_s28 }
 0x31e   : > { %3942 = vrot.lane.b32.xlu1 %v7274_v9, %s6688_s28 }
 0x36c   : > { %v1835_v23 = vpop.permute.xlu1 %1834 }
 0x36d   : > { %v1567_v42 = vpop.permute.xlu0 %1566 }
 0x36e   : > { %5876 = vmatprep.subr.msk.mxu1 %vm491_vm0, %v1567_v42 }
 0x36f   : > { %5877 = vmatpush3.xpose.msk.msra.mxu1 %vm491_vm0, %v1567_v42  ;;  %v1537_v42 = vmul.f32 %v7323_v6, %v7274_v9 }
 0x370   : > { %5904 = vmatprep.subr.msk.mxu1 %vm491_vm0, %v1835_v23  ;;  %v1969_v38 = vpop.permute.xlu1 %1968 }
 0x371   : > { %v1701_v30 = vpop.permute.xlu0 %1700 }
 0x372   : > { %5879 = vmatmul.mubr.msk.f32.vlgmr.msra.gmra.mrb[36].mxu1 %vm491_vm0, %v1502_v14  ;;  %5890 = vmatprep.subr.msk.mxu0 %vm491_vm0, %v1701_v30  ;;  %v1543_v14 = vmul.f32 %v7305_v39, %v7279_v29 }
 0x373   : > { %5881 = vmatprep.mubr.msk.f32.mxu1 %vm491_vm0, %v1503_v27  ;;  %5891 = vmatpush3.xpose.msk.msra.mxu0 %vm491_vm0, %v1701_v30  ;;  %v1538_v27 = vmul.f32 %v7340_v52, %v7274_v9 }
 0x374   : > { %5905 = vmatpush3.xpose.msk.msra.mxu1 %vm491_vm0, %v1835_v23  ;;  %5918 = vmatprep.subr.msk.mxu0 %vm491_vm0, %v1969_v38  ;;  %v1542_v23 = vmul.f32 %v7299_v22, %v7279_v29 }
 0x376   : > { %5882 = vmatmul.mubr.msk.f32.gmra.mrb[38].mxu1 %vm491_vm0, %v1504_v49  ;;  %5893 = vmatmul.mubr.msk.f32.vlgmr.msra.gmra.mrb[36].mxu0 %vm491_vm0, %v1510_v34  ;;  %v1539_v49 = vmul.f32 %v7347_v46, %v7274_v9  ;;  %v1545_v34 = vmul.f32 %v7323_v6, %v7279_v29 }
 0x377   : > { %5884 = vmatprep.mubr.msk.f32.mxu1 %vm491_vm0, %v1505_v48  ;;  %5895 = vmatprep.mubr.msk.f32.mxu0 %vm491_vm0, %v1511_v50  ;;  %v1540_v48 = vmul.f32 %v7363_v17, %v7274_v9  ;;  %v1546_v50 = vmul.f32 %v7340_v52, %v7279_v29  ;;  %v1548_v9 = vmul.f32 %v7363_v17, %v7279_v29 }
 0x378   : > { %5919 = vmatpush3.xpose.msk.msra.mxu0 %vm491_vm0, %v1969_v38  ;;  %v1544_v38 = vmul.f32 %v7316_v12, %v7279_v29 }
 0x37a   : > { %5885 = vmatmul.mubr.msk.f32.gmra.mrb[40].mxu1 %vm491_vm0, %v1506_v44  ;;  %5896 = vmatmul.mubr.msk.f32.gmra.mrb[38].mxu0 %vm491_vm0, %v1512_v54  ;;  %v1547_v44 = vmul.f32 %v7347_v46, %v7279_v29  ;;  %v1549_v54 = vmul.f32 %v7272_v1, %v7252_v28  ;;  %v1552_v29 = vmul.f32 %v7272_v1, %v7316_v12 }
 0x37b   : > { %5887 = vmatprep.mubr.msk.f32.mxu1 %vm491_vm0, %v1507_v3  ;;  %5898 = vmatprep.mubr.msk.f32.mxu0 %vm491_vm0, %v1513_v63  ;;  %v1550_v3 = vmul.f32 %v7272_v1, %v7299_v22  ;;  %v1551_v63 = vmul.f32 %v7272_v1, %v7305_v39 }
 0x37e   : > { %v2103_v37 = vpop.permute.xlu0 %2102  ;;  %5888 = vmatmul.mubr.msk.f32.gmra.mrb[42].mxu1 %vm491_vm0, %v1508_v40  ;;  %5899 = vmatmul.mubr.msk.f32.gmra.mrb[40].mxu0 %vm491_vm0, %v1514_v56  ;;  %v1557_v40 = vmul.f32 %v7277_v16, %v7252_v28  ;;  %v1559_v28 = vmul.f32 %v7277_v16, %v7305_v39  ;;  %v1561_v39 = vmul.f32 %v7277_v16, %v7323_v6 }
 0x37f   : > { %5901 = vmatprep.mubr.msk.f32.mxu0 %vm491_vm0, %v1515_v61  ;;  %5906 = vmatprep.mubr.msk.f32.mxu1 %vm491_vm0, %v1517_v47  ;;  %v1558_v61 = vmul.f32 %v7277_v16, %v7299_v22  ;;  %v1553_v47 = vmul.f32 %v7272_v1, %v7323_v6  ;;  %v1554_v22 = vmul.f32 %v7272_v1, %v7340_v52 }
 0x380   : > { %v2237_v0 = vpop.permute.xlu1 %2236  ;;  %5932 = vmatprep.subr.msk.mxu1 %vm491_vm0, %v2103_v37  ;;  %v1564_v6 = vmul.f32 %v7277_v16, %v7363_v17 }
 0x381   : > { %5946 = vmatprep.subr.msk.mxu0 %vm491_vm0, %v2237_v0 }
 0x382   : > { %5902 = vmatmul.mubr.msk.f32.gmra.mrb[42].mxu0 %vm491_vm0, %v1516_v19  ;;  %5907 = vmatmul.mubr.msk.f32.vlgmr.msra.gmra.mrb[44].mxu1 %vm491_vm0, %v1518_v31  ;;  %v2371_v62 = vpop.permute.xlu0 %2370  ;;  %v1555_v19 = vmul.f32 %v7272_v1, %v7347_v46  ;;  %v1556_v31 = vmul.f32 %v7272_v1, %v7363_v17 }
 0x383   : > { %5909 = vmatprep.mubr.msk.f32.mxu1 %vm491_vm0, %v1519_v60  ;;  %5920 = vmatprep.mubr.msk.f32.mxu0 %vm491_vm0, %v1525_v8  ;;  %v1563_v60 = vmul.f32 %v7277_v16, %v7347_v46 }
 0x384   : > { %5933 = vmatpush3.xpose.msk.msra.mxu1 %vm491_vm0, %v2103_v37  ;;  %v2505_v25 = vpop.permute.xlu1 %2504 }
 0x385   : > { %5960 = vmatprep.subr.msk.mxu1 %vm491_vm0, %v2371_v62 }
 0x386   : > { %5910 = vmatmul.mubr.msk.f32.gmra.mrb[46].mxu1 %vm491_vm0, %v1520_v2  ;;  %5921 = vmatmul.mubr.msk.f32.vlgmr.msra.gmra.mrb[44].mxu0 %vm491_vm0, %v1526_v45  ;;  %v3547_v30 = vpop.permute.xlu0 %3546 }
 0x387   : > { %5912 = vmatprep.mubr.msk.f32.mxu1 %vm491_vm0, %v1521_v20  ;;  %5923 = vmatprep.mubr.msk.f32.mxu0 %vm491_vm0, %v1527_v53 }
 0x388   : > { %5947 = vmatpush3.xpose.msk.msra.mxu0 %vm491_vm0, %v2237_v0  ;;  %v3415_v11 = vpop.permute.xlu1 %3414  ;;  %v1560_v0 = vmul.f32 %v7277_v16, %v7316_v12  ;;  %v1562_v12 = vmul.f32 %v7277_v16, %v7340_v52 }
 0x389   : > { %5974 = vmatprep.subr.msk.mxu0 %vm491_vm0, %v2505_v25 }
 0x38a   : > { %5913 = vmatmul.mubr.msk.f32.gmra.mrb[48].mxu1 %vm491_vm0, %v1522_v35  ;;  %5924 = vmatmul.mubr.msk.f32.gmra.mrb[46].mxu0 %vm491_vm0, %v1528_v7  ;;  %v7510_v37 = vpop.permute.xlu0 %3810 }
 0x38b   : > { %5915 = vmatprep.mubr.msk.f32.mxu1 %vm491_vm0, %v1523_v10  ;;  %5926 = vmatprep.mubr.msk.f32.mxu0 %vm491_vm0, %v1529_v41  ;;  %8930 = vst [vmem:[#allocation19_spill] sm:$0xff] %v7510_v37 }
 0x38c   : > { %v7495_v56 = vpop.permute.xlu1 %3678 }
 0x38d   : > { %8929 = vst [vmem:[#allocation18_spill] sm:$0xff] %v7495_v56 }
 0x38e   : > { %5916 = vmatmul.mubr.msk.f32.gmra.mrb[50].mxu1 %vm491_vm0, %v1524_v43  ;;  %5927 = vmatmul.mubr.msk.f32.gmra.mrb[48].mxu0 %vm491_vm0, %v1530_v59 }
 0x38f   : > { %5929 = vmatprep.mubr.msk.f32.mxu0 %vm491_vm0, %v1531_v18  ;;  %5934 = vmatprep.mubr.msk.f32.mxu1 %vm491_vm0, %v1533_v26 }
 0x392   : > { %5930 = vmatmul.mubr.msk.f32.gmra.mrb[50].mxu0 %vm491_vm0, %v1532_v55  ;;  %5935 = vmatmul.mubr.msk.f32.vlgmr.msra.gmra.mrb[52].mxu1 %vm491_vm0, %v1534_v21 }
 0x393   : > { %5961 = vmatpush3.xpose.msk.msra.mxu1 %vm491_vm0, %v2371_v62  ;;  %5937 = vmatprep.mubr.msk.f32.mxu1 %vm491_vm0, %v1535_v51 }
 0x394   : > { %5948 = vmatprep.mubr.msk.f32.mxu0 %vm491_vm0, %v1541_v24  ;;  %5988 = vmatprep.subr.mxu1 %v3415_v11 }
 0x396   : > { %5938 = vmatmul.mubr.msk.f32.gmra.mrb[54].mxu1 %vm491_vm0, %v1536_v4  ;;  %5949 = vmatmul.mubr.msk.f32.vlgmr.msra.gmra.mrb[52].mxu0 %vm491_vm0, %v1542_v23 }
 0x397   : > { %5975 = vmatpush3.xpose.msk.msra.mxu0 %vm491_vm0, %v2505_v25  ;;  %5940 = vmatprep.mubr.msk.f32.mxu1 %vm491_vm0, %v1537_v42 }
 0x398   : > { %5951 = vmatprep.mubr.msk.f32.mxu0 %vm491_vm0, %v1543_v14  ;;  %6002 = vmatprep.subr.mxu0 %v3547_v30 }
 0x39a   : > { %5941 = vmatmul.mubr.msk.f32.gmra.mrb[56].mxu1 %vm491_vm0, %v1538_v27  ;;  %5952 = vmatmul.mubr.msk.f32.gmra.mrb[54].mxu0 %vm491_vm0, %v1544_v38 }
 0x39b   : > { %5943 = vmatprep.mubr.msk.f32.mxu1 %vm491_vm0, %v1539_v49  ;;  %5954 = vmatprep.mubr.msk.f32.mxu0 %vm491_vm0, %v1545_v34 }
 0x39e   : > { %5944 = vmatmul.mubr.msk.f32.gmra.mrb[58].mxu1 %vm491_vm0, %v1540_v48  ;;  %5955 = vmatmul.mubr.msk.f32.gmra.mrb[56].mxu0 %vm491_vm0, %v1546_v50 }
 0x39f   : > { %5957 = vmatprep.mubr.msk.f32.mxu0 %vm491_vm0, %v1547_v44  ;;  %5962 = vmatprep.mubr.msk.f32.mxu1 %vm491_vm0, %v1549_v54 }
 0x3a2   : > { %5958 = vmatmul.mubr.msk.f32.gmra.mrb[58].mxu0 %vm491_vm0, %v1548_v9  ;;  %5963 = vmatmul.mubr.msk.f32.vlgmr.msra.gmra.mrb[60].mxu1 %vm491_vm0, %v1550_v3 }
 0x3a3   : > { %5989 = vmatpush3.msra.mxu1 %v3415_v11  ;;  %5965 = vmatprep.mubr.msk.f32.mxu1 %vm491_vm0, %v1551_v63 }
 0x3a4   : > { %5976 = vmatprep.mubr.msk.f32.mxu0 %vm491_vm0, %v1557_v40  ;;  %6016 = vmatprep.subr.mxu1 %v7495_v56 }
 0x3a6   : > { %5966 = vmatmul.mubr.msk.f32.gmra.mrb[62].mxu1 %vm491_vm0, %v1552_v29  ;;  %5977 = vmatmul.mubr.msk.f32.vlgmr.msra.gmra.mrb[60].mxu0 %vm491_vm0, %v1558_v61 }
 0x3a7   : > { %6003 = vmatpush3.msra.mxu0 %v3547_v30  ;;  %5968 = vmatprep.mubr.msk.f32.mxu1 %vm491_vm0, %v1553_v47 }
 0x3a8   : > { %5979 = vmatprep.mubr.msk.f32.mxu0 %vm491_vm0, %v1559_v28  ;;  %6030 = vmatprep.subr.mxu0 %v7510_v37 }
 0x3aa   : > { %5969 = vmatmul.mubr.msk.f32.gmra.mrb[64].mxu1 %vm491_vm0, %v1554_v22  ;;  %5980 = vmatmul.mubr.msk.f32.gmra.mrb[62].mxu0 %vm491_vm0, %v1560_v0 }
 0x3ab   : > { %5971 = vmatprep.mubr.msk.f32.mxu1 %vm491_vm0, %v1555_v19  ;;  %5982 = vmatprep.mubr.msk.f32.mxu0 %vm491_vm0, %v1561_v39 }
 0x3ae   : > { %5972 = vmatmul.mubr.msk.f32.gmra.mrb[66].mxu1 %vm491_vm0, %v1556_v31  ;;  %5983 = vmatmul.mubr.msk.f32.gmra.mrb[64].mxu0 %vm491_vm0, %v1562_v12 }
 0x3af   : > { %5985 = vmatprep.mubr.msk.f32.mxu0 %vm491_vm0, %v1563_v60 }
 0x3b2   : > { %5986 = vmatmul.mubr.msk.f32.gmra.mrb[66].mxu0 %vm491_vm0, %v1564_v6 }
 0x445   : > { %v7539_v8 = vpop.f32.mrb[36].mxu1 }
 0x446   : > { %v7541_v62 = vpop.f32.mrb[37].mxu1  ;;  %v2641_v52 = vsel %vm2637_vm1, %v7539_v8, -inf }
 0x447   : > { %2642 = vmax.xlane.f32.xlu0 %v2641_v52  ;;  %v2638_v17 = vsel %vm2637_vm1, %v7541_v62, -inf }
 0x449   : > { %v7545_v46 = vpop.f32.mrb[38].mxu1  ;;  %v7547_v2 = vpop.f32.mrb[36].mxu0 }
 0x44a   : > { %v7549_v45 = vpop.f32.mrb[39].mxu1  ;;  %v7551_v20 = vpop.f32.mrb[37].mxu0  ;;  %v2665_v41 = vsel %vm2637_vm1, %v7547_v2, -inf  ;;  %v2647_v43 = vsel %vm2637_vm1, %v7545_v46, -inf }
 0x44b   : > { %2639 = vmax.xlane.f32.xlu0 %v2638_v17  ;;  %v2662_v53 = vsel %vm2637_vm1, %v7551_v20, -inf  ;;  %v2644_v51 = vsel %vm2637_vm1, %v7549_v45, -inf }
 0x44c   : > { %2663 = vmax.xlane.f32.xlu1 %v2662_v53 }
 0x44d   : > { %v7557_v25 = vpop.f32.mrb[40].mxu1  ;;  %v7559_v35 = vpop.f32.mrb[38].mxu0 }
 0x44e   : > { %v7561_v7 = vpop.f32.mrb[41].mxu1  ;;  %v7563_v10 = vpop.f32.mrb[39].mxu0  ;;  %v2671_v21 = vsel %vm2637_vm1, %v7559_v35, -inf  ;;  %v2653_v14 = vsel %vm2637_vm1, %v7557_v25, -inf }
 0x44f   : > { %2666 = vmax.xlane.f32.xlu0 %v2665_v41  ;;  %v2668_v42 = vsel %vm2637_vm1, %v7563_v10, -inf  ;;  %v2650_v48 = vsel %vm2637_vm1, %v7561_v7, -inf }
 0x450   : > { %2648 = vmax.xlane.f32.xlu1 %v2647_v43 }
 0x451   : > { %v7569_v59 = vpop.f32.mrb[42].mxu1  ;;  %v7571_v18 = vpop.f32.mrb[40].mxu0 }
 0x452   : > { %v7573_v26 = vpop.f32.mrb[43].mxu1  ;;  %v7575_v55 = vpop.f32.mrb[41].mxu0  ;;  %v2677_v34 = vsel %vm2637_vm1, %v7571_v18, -inf  ;;  %v2659_v63 = vsel %vm2637_vm1, %v7569_v59, -inf }
 0x453   : > { %2672 = vmax.xlane.f32.xlu0 %v2671_v21  ;;  %v2674_v3 = vsel %vm2637_vm1, %v7575_v55, -inf  ;;  %v2656_v22 = vsel %vm2637_vm1, %v7573_v26, -inf }
 0x454   : > { %2645 = vmax.xlane.f32.xlu1 %v2644_v51 }
 0x455   : > { %v7581_v24 = vpop.f32.mrb[42].mxu0  ;;  %v7583_v11 = vpop.f32.mrb[44].mxu1 }
 0x456   : > { %v7585_v4 = vpop.f32.mrb[43].mxu0  ;;  %v7587_v23 = vpop.f32.mrb[45].mxu1  ;;  %v2683_v28 = vsel %vm2637_vm1, %v7581_v24, -inf  ;;  %v2689_v60 = vsel %vm2637_vm1, %v7583_v11, -inf }
 0x457   : > { %2669 = vmax.xlane.f32.xlu0 %v2668_v42  ;;  %v2680_v12 = vsel %vm2637_vm1, %v7585_v4, -inf  ;;  %v2686_v43 = vsel %vm2637_vm1, %v7587_v23, -inf }
 0x458   : > { %2654 = vmax.xlane.f32.xlu1 %v2653_v14 }
 0x459   : > { %v7593_v30 = vpop.f32.mrb[46].mxu1  ;;  %v7595_v27 = vpop.f32.mrb[44].mxu0 }
 0x45a   : > { %v7597_v38 = vpop.f32.mrb[47].mxu1  ;;  %v7599_v49 = vpop.f32.mrb[45].mxu0  ;;  %v2713_v41 = vsel %vm2637_vm1, %v7595_v27, -inf }
 0x45b   : > { %2678 = vmax.xlane.f32.xlu0 %v2677_v34  ;;  %v2710_v34 = vsel %vm2637_vm1, %v7599_v49, -inf }
 0x45c   : > { %2651 = vmax.xlane.f32.xlu1 %v2650_v48  ;;  %v2695_v48 = vsel %vm2637_vm1, %v7593_v30, -inf }
 0x45d   : > { %v7605_v50 = vpop.f32.mrb[48].mxu1  ;;  %v7607_v44 = vpop.f32.mrb[46].mxu0 }
 0x45e   : > { %v7609_v54 = vpop.f32.mrb[49].mxu1  ;;  %v7611_v9 = vpop.f32.mrb[47].mxu0  ;;  %v2701_v32 = vsel %vm2637_vm1, %v7605_v50, -inf }
 0x45f   : > { %8931 = vst [vmem:[#allocation20_spill] sm:$0xff] %v7609_v54  ;;  %2675 = vmax.xlane.f32.xlu0 %v2674_v3  ;;  %v2716_v57 = vsel %vm2637_vm1, %v7611_v9, -inf  ;;  %v2698_v15 = vsel %vm2637_vm1, %v7609_v54, -inf }
 0x460   : > { %2660 = vmax.xlane.f32.xlu1 %v2659_v63 }
 0x461   : > { %v7617_v40 = vpop.f32.mrb[50].mxu1  ;;  %v7619_v29 = vpop.f32.mrb[48].mxu0 }
 0x462   : > { %8932 = vst [vmem:[#allocation21_spill] sm:$0xff] %v7617_v40  ;;  %8933 = vst [vmem:[#allocation22_spill] sm:$0xff] %v7619_v29  ;;  %v7621_v61 = vpop.f32.mrb[51].mxu1  ;;  %v7623_v47 = vpop.f32.mrb[49].mxu0  ;;  %v2725_v58 = vsel %vm2637_vm1, %v7619_v29, -inf  ;;  %v2707_v56 = vsel %vm2637_vm1, %v7617_v40, -inf }
 0x463   : > { %8934 = vst [vmem:[#allocation23_spill] sm:$0xff] %v7623_v47  ;;  %2684 = vmax.xlane.f32.xlu0 %v2683_v28  ;;  %v2722_v37 = vsel %vm2637_vm1, %v7623_v47, -inf  ;;  %v2704_v47 = vsel %vm2637_vm1, %v7621_v61, -inf }
 0x464   : > { %2657 = vmax.xlane.f32.xlu1 %v2656_v22 }
 0x465   : > { %v7629_v0 = vpop.f32.mrb[50].mxu0  ;;  %v7631_v19 = vpop.f32.mrb[52].mxu1 }
 0x466   : > { %8935 = vst [vmem:[#allocation24_spill] sm:$0xff] %v7629_v0  ;;  %v7633_v39 = vpop.f32.mrb[51].mxu0  ;;  %v7635_v31 = vpop.f32.mrb[53].mxu1  ;;  %v2731_v54 = vsel %vm2637_vm1, %v7629_v0, -inf  ;;  %v2737_v29 = vsel %vm2637_vm1, %v7631_v19, -inf }
 0x467   : > { %8936 = vst [vmem:[#allocation25_spill] sm:$0xff] %v7633_v39  ;;  %2681 = vmax.xlane.f32.xlu0 %v2680_v12  ;;  %v2719_v12 = vsel %vm2637_vm1, %v7607_v44, -inf }
 0x468   : > { %2690 = vmax.xlane.f32.xlu1 %v2689_v60  ;;  %v2692_v60 = vsel %vm2637_vm1, %v7597_v38, -inf }
 0x469   : > { %v7641_v6 = vpop.f32.mrb[54].mxu1  ;;  %v7643_v52 = vpop.f32.mrb[52].mxu0 }
 0x46a   : > { %v7645_v17 = vpop.f32.mrb[55].mxu1  ;;  %v7647_v53 = vpop.f32.mrb[53].mxu0  ;;  %v2761_v0 = vsel %vm2637_vm1, %v7643_v52, -inf }
 0x46b   : > { %2714 = vmax.xlane.f32.xlu0 %v2713_v41 }
 0x46c   : > { %2687 = vmax.xlane.f32.xlu1 %v2686_v43 }
 0x46d   : > { %v7653_v21 = vpop.f32.mrb[56].mxu1  ;;  %v7655_v51 = vpop.f32.mrb[54].mxu0 }
 0x46e   : > { %v7657_v42 = vpop.f32.mrb[57].mxu1  ;;  %v7659_v14 = vpop.f32.mrb[55].mxu0 }
 0x46f   : > { %2711 = vmax.xlane.f32.xlu0 %v2710_v34 }
 0x470   : > { %2696 = vmax.xlane.f32.xlu1 %v2695_v48 }
 0x471   : > { %v7665_v3 = vpop.f32.mrb[58].mxu1  ;;  %v7667_v63 = vpop.f32.mrb[56].mxu0 }
 0x472   : > { %v7669_v28 = vpop.f32.mrb[59].mxu1  ;;  %v7671_v22 = vpop.f32.mrb[57].mxu0 }
 0x473   : > { %2720 = vmax.xlane.f32.xlu0 %v2719_v12 }
 0x474   : > { %2693 = vmax.xlane.f32.xlu1 %v2692_v60 }
 0x475   : > { %v7677_v41 = vpop.f32.mrb[58].mxu0  ;;  %v7679_v43 = vpop.f32.mrb[60].mxu1 }
 0x476   : > { %v7681_v34 = vpop.f32.mrb[59].mxu0  ;;  %v7683_v48 = vpop.f32.mrb[61].mxu1 }
 0x477   : > { %2717 = vmax.xlane.f32.xlu0 %v2716_v57 }
 0x478   : > { %2702 = vmax.xlane.f32.xlu1 %v2701_v32 }
 0x479   : > { %v7689_v12 = vpop.f32.mrb[62].mxu1  ;;  %v7691_v5 = vpop.f32.mrb[60].mxu0 }
 0x47a   : > { %v7693_v60 = vpop.f32.mrb[63].mxu1  ;;  %v7695_v13 = vpop.f32.mrb[61].mxu0 }
 0x47b   : > { %2726 = vmax.xlane.f32.xlu0 %v2725_v58 }
 0x47c   : > { %2699 = vmax.xlane.f32.xlu1 %v2698_v15 }
 0x47d   : > { %v7701_v57 = vpop.f32.mrb[64].mxu1  ;;  %v7703_v36 = vpop.f32.mrb[62].mxu0 }
 0x47e   : > { %8937 = vst [vmem:[#allocation26_spill] sm:$0xff] %v7701_v57  ;;  %v7705_v32 = vpop.f32.mrb[65].mxu1  ;;  %v7707_v33 = vpop.f32.mrb[63].mxu0 }
 0x47f   : > { %8938 = vst [vmem:[#allocation27_spill] sm:$0xff] %v7705_v32  ;;  %8939 = vst [vmem:[#allocation28_spill] sm:$0xff] %v7707_v33  ;;  %2723 = vmax.xlane.f32.xlu0 %v2722_v37 }
 0x480   : > { %2708 = vmax.xlane.f32.xlu1 %v2707_v56  ;;  %v2728_v56 = vsel %vm2637_vm1, %v7633_v39, -inf  ;;  %v2743_v39 = vsel %vm2637_vm1, %v7641_v6, -inf }
 0x481   : > { %v7713_v58 = vpop.f32.mrb[66].mxu1  ;;  %v7715_v16 = vpop.f32.mrb[64].mxu0 }
 0x482   : > { %8940 = vst [vmem:[#allocation29_spill] sm:$0xff] %v7713_v58  ;;  %8941 = vst [vmem:[#allocation30_spill] sm:$0xff] %v7715_v16  ;;  %v7717_v15 = vpop.f32.mrb[67].mxu1  ;;  %v7719_v1 = vpop.f32.mrb[65].mxu0 }
 0x483   : > { %8942 = vst [vmem:[#allocation31_spill] sm:$0xff] %v7717_v15  ;;  %8943 = vst [vmem:[#allocation32_spill] sm:$0xff] %v7719_v1  ;;  %2732 = vmax.xlane.f32.xlu0 %v2731_v54  ;;  %v2734_v54 = vsel %vm2637_vm1, %v7635_v31, -inf }
 0x484   : > { %2705 = vmax.xlane.f32.xlu1 %v2704_v47  ;;  %v2758_v47 = vsel %vm2637_vm1, %v7647_v53, -inf }
 0x485   : > { %v7725_v37 = vpop.f32.mrb[66].mxu0 }
 0x486   : > { %8944 = vst [vmem:[#allocation33_spill] sm:$0xff] %v7725_v37  ;;  %v7727_v40 = vpop.f32.mrb[67].mxu0 }
 0x487   : > { %8945 = vst [vmem:[#allocation34_spill] sm:$0xff] %v7727_v40  ;;  %2729 = vmax.xlane.f32.xlu0 %v2728_v56  ;;  %v2767_v56 = vsel %vm2637_vm1, %v7655_v51, -inf }
 0x488   : > { %2738 = vmax.xlane.f32.xlu1 %v2737_v29  ;;  %v2740_v29 = vsel %vm2637_vm1, %v7645_v17, -inf }
 0x48b   : > { %2762 = vmax.xlane.f32.xlu0 %v2761_v0  ;;  %v2764_v0 = vsel %vm2637_vm1, %v7659_v14, -inf }
 0x48c   : > { %2735 = vmax.xlane.f32.xlu1 %v2734_v54  ;;  %v2749_v54 = vsel %vm2637_vm1, %v7653_v21, -inf }
 0x48f   : > { %2759 = vmax.xlane.f32.xlu0 %v2758_v47  ;;  %v2773_v47 = vsel %vm2637_vm1, %v7667_v63, -inf }
 0x490   : > { %2744 = vmax.xlane.f32.xlu1 %v2743_v39  ;;  %v2746_v39 = vsel %vm2637_vm1, %v7657_v42, -inf }
 0x493   : > { %2768 = vmax.xlane.f32.xlu0 %v2767_v56  ;;  %v2770_v56 = vsel %vm2637_vm1, %v7671_v22, -inf }
 0x494   : > { %2741 = vmax.xlane.f32.xlu1 %v2740_v29  ;;  %v2755_v29 = vsel %vm2637_vm1, %v7665_v3, -inf }
 0x497   : > { %2765 = vmax.xlane.f32.xlu0 %v2764_v0  ;;  %v2779_v0 = vsel %vm2637_vm1, %v7677_v41, -inf }
 0x498   : > { %2750 = vmax.xlane.f32.xlu1 %v2749_v54  ;;  %v2752_v54 = vsel %vm2637_vm1, %v7669_v28, -inf }
 0x49b   : > { %2774 = vmax.xlane.f32.xlu0 %v2773_v47  ;;  %v2776_v47 = vsel %vm2637_vm1, %v7681_v34, -inf }
 0x49c   : > { %2747 = vmax.xlane.f32.xlu1 %v2746_v39  ;;  %v2785_v39 = vsel %vm2637_vm1, %v7679_v43, -inf }
 0x49f   : > { %2771 = vmax.xlane.f32.xlu0 %v2770_v56  ;;  %v2809_v56 = vsel %vm2637_vm1, %v7691_v5, -inf }
 0x4a0   : > { %2756 = vmax.xlane.f32.xlu1 %v2755_v29  ;;  %v2782_v29 = vsel %vm2637_vm1, %v7683_v48, -inf }
 0x4a3   : > { %2780 = vmax.xlane.f32.xlu0 %v2779_v0  ;;  %v2806_v0 = vsel %vm2637_vm1, %v7695_v13, -inf }
 0x4a4   : > { %2753 = vmax.xlane.f32.xlu1 %v2752_v54  ;;  %v2791_v54 = vsel %vm2637_vm1, %v7689_v12, -inf }
 0x4a7   : > { %2777 = vmax.xlane.f32.xlu0 %v2776_v47  ;;  %v2815_v47 = vsel %vm2637_vm1, %v7703_v36, -inf }
 0x4a8   : > { %2786 = vmax.xlane.f32.xlu1 %v2785_v39  ;;  %v2788_v39 = vsel %vm2637_vm1, %v7693_v60, -inf }
 0x4ab   : > { %2810 = vmax.xlane.f32.xlu0 %v2809_v56  ;;  %v2812_v56 = vsel %vm2637_vm1, %v7707_v33, -inf }
 0x4ac   : > { %2783 = vmax.xlane.f32.xlu1 %v2782_v29  ;;  %v2797_v29 = vsel %vm2637_vm1, %v7701_v57, -inf }
 0x4af   : > { %2807 = vmax.xlane.f32.xlu0 %v2806_v0  ;;  %v2821_v0 = vsel %vm2637_vm1, %v7715_v16, -inf }
 0x4b0   : > { %2792 = vmax.xlane.f32.xlu1 %v2791_v54  ;;  %v2794_v54 = vsel %vm2637_vm1, %v7705_v32, -inf }
 0x4b3   : > { %2816 = vmax.xlane.f32.xlu0 %v2815_v47  ;;  %v2818_v47 = vsel %vm2637_vm1, %v7719_v1, -inf }
 0x4b4   : > { %2789 = vmax.xlane.f32.xlu1 %v2788_v39  ;;  %v2803_v39 = vsel %vm2637_vm1, %v7713_v58, -inf }
 0x4b7   : > { %2813 = vmax.xlane.f32.xlu0 %v2812_v56  ;;  %v2827_v56 = vsel %vm2637_vm1, %v7725_v37, -inf }
 0x4b8   : > { %2798 = vmax.xlane.f32.xlu1 %v2797_v29  ;;  %v2800_v29 = vsel %vm2637_vm1, %v7717_v15, -inf }
 0x4bb   : > { %2822 = vmax.xlane.f32.xlu0 %v2821_v0  ;;  %v2824_v0 = vsel %vm2637_vm1, %v7727_v40, -inf }
 0x4bc   : > { %2795 = vmax.xlane.f32.xlu1 %v2794_v54  ;;  %v7795_v54 = vpop.permute.xlu0 %4074 }
 0x4bd   : > { %8946 = vst [vmem:[#allocation35_spill] sm:$0xff] %v7795_v54 }
 0x4bf   : > { %2819 = vmax.xlane.f32.xlu0 %v2818_v47  ;;  %v7797_v47 = vpop.permute.xlu1 %3942 }
 0x4c0   : > { %2804 = vmax.xlane.f32.xlu1 %v2803_v39  ;;  %8947 = vst [vmem:[#allocation36_spill] sm:$0xff] %v7797_v47 }
 0x4c3   : > { %2828 = vmax.xlane.f32.xlu0 %v2827_v56 }
 0x4c4   : > { %2801 = vmax.xlane.f32.xlu1 %v2800_v29 }
 0x4c7   : > { %2825 = vmax.xlane.f32.xlu0 %v2824_v0 }
 0x4d4   : > { %v2643_v1 = vpop.xlane.xlu0 %2642 }
 0x4d5   : > { %v2831_v58 = vsub.f32 %v7539_v8, %v2643_v1 }
 0x4d7   : > { %v2896_v39 = vmul.f32 1.442695, %v2831_v58 }
 0x4d8   : > { %v2640_v32 = vpop.xlane.xlu0 %2639 }
 0x4d9   : > { %6310 = vpow2.f32 %v2896_v39  ;;  %v2830_v56 = vsub.f32 %v7541_v62, %v2640_v32  ;;  %v2664_v37 = vpop.xlane.xlu1 %2663 }
 0x4da   : > { %v2838_v29 = vsub.f32 %v7551_v20, %v2664_v37 }
 0x4db   : > { %v2894_v16 = vmul.f32 1.442695, %v2830_v56 }
 0x4dc   : > { %v2667_v15 = vpop.xlane.xlu0 %2666  ;;  %v2910_v57 = vmul.f32 1.442695, %v2838_v29 }
 0x4dd   : > { %6312 = vpow2.f32 %v2894_v16  ;;  %v2839_v0 = vsub.f32 %v7547_v2, %v2667_v15  ;;  %v2649_v40 = vpop.xlane.xlu1 %2648 }
 0x4de   : > { %v2833_v54 = vsub.f32 %v7545_v46, %v2649_v40 }
 0x4df   : > { %v2912_v47 = vmul.f32 1.442695, %v2839_v0 }
 0x4e0   : > { %v2900_v33 = vmul.f32 1.442695, %v2833_v54  ;;  %v2673_v1 = vpop.xlane.xlu0 %2672 }
 0x4e1   : > { %6314 = vpow2.f32 %v2912_v47  ;;  %v2841_v8 = vsub.f32 %v7559_v35, %v2673_v1  ;;  %v2646_v58 = vpop.xlane.xlu1 %2645 }
 0x4e2   : > { %6316 = vpow2.f32 %v2900_v33  ;;  %v2832_v62 = vsub.f32 %v7549_v45, %v2646_v58 }
 0x4e3   : > { %v7806_v32 = vpop.eup %6310  ;;  %6318 = vpow2.f32 %v2910_v57  ;;  %v2916_v16 = vmul.f32 1.442695, %v2841_v8 }
 0x4e4   : > { %v2898_v20 = vmul.f32 1.442695, %v2832_v62  ;;  %v2670_v2 = vpop.xlane.xlu0 %2669  ;;  %v3025_v46 = vsel %vm2637_vm1, %v7806_v32, 0.0 }
 0x4e5   : > { %v2840_v40 = vsub.f32 %v7563_v10, %v2670_v2  ;;  %v2655_v15 = vpop.xlane.xlu1 %2654  ;;  %3026 = vadd.xlane.f32.xlu1 %v3025_v46 }
 0x4e6   : > { %6320 = vpow2.f32 %v2898_v20  ;;  %v2835_v35 = vsub.f32 %v7557_v25, %v2655_v15 }
 0x4e7   : > { %v7812_v37 = vpop.eup %6312  ;;  %6322 = vpow2.f32 %v2916_v16  ;;  %v2914_v33 = vmul.f32 1.442695, %v2840_v40 }
 0x4e8   : > { %v2904_v45 = vmul.f32 1.442695, %v2835_v35  ;;  %v2679_v54 = vpop.xlane.xlu0 %2678  ;;  %v3022_v57 = vsel %vm2637_vm1, %v7812_v37, 0.0 }
 0x4e9   : > { %v2843_v47 = vsub.f32 %v7571_v18, %v2679_v54  ;;  %v2652_v39 = vpop.xlane.xlu1 %2651  ;;  %3023 = vadd.xlane.f32.xlu1 %v3022_v57 }
 0x4ea   : > { %6324 = vpow2.f32 %v2904_v45  ;;  %v2834_v10 = vsub.f32 %v7561_v7, %v2652_v39 }
 0x4eb   : > { %v7818_v56 = vpop.eup %6314  ;;  %6326 = vpow2.f32 %v2914_v33  ;;  %v2920_v25 = vmul.f32 1.442695, %v2843_v47 }
 0x4ec   : > { %v7820_v29 = vpop.eup %6316  ;;  %v2902_v0 = vmul.f32 1.442695, %v2834_v10  ;;  %v2676_v1 = vpop.xlane.xlu0 %2675  ;;  %v3049_v8 = vsel %vm2637_vm1, %v7818_v56, 0.0 }
 0x4ed   : > { %v7824_v58 = vpop.eup %6318  ;;  %v2842_v18 = vsub.f32 %v7575_v55, %v2676_v1  ;;  %v2661_v62 = vpop.xlane.xlu1 %2660  ;;  %3050 = vadd.xlane.f32.xlu0 %v3049_v8  ;;  %v3031_v7 = vsel %vm2637_vm1, %v7820_v29, 0.0 }
 0x4ee   : > { %6328 = vpow2.f32 %v2902_v0  ;;  %v2837_v16 = vsub.f32 %v7569_v59, %v2661_v62  ;;  %3032 = vadd.xlane.f32.xlu1 %v3031_v7  ;;  %v3046_v15 = vsel %vm2637_vm1, %v7824_v58, 0.0 }
 0x4ef   : > { %6330 = vpow2.f32 %v2920_v25  ;;  %v2918_v20 = vmul.f32 1.442695, %v2842_v18 }
 0x4f0   : > { %v7830_v2 = vpop.eup %6320  ;;  %v2908_v46 = vmul.f32 1.442695, %v2837_v16  ;;  %v2685_v40 = vpop.xlane.xlu0 %2684 }
 0x4f1   : > { %v7834_v35 = vpop.eup %6322  ;;  %v2845_v55 = vsub.f32 %v7581_v24, %v2685_v40  ;;  %v2658_v33 = vpop.xlane.xlu1 %2657  ;;  %3047 = vadd.xlane.f32.xlu0 %v3046_v15  ;;  %v3028_v45 = vsel %vm2637_vm1, %v7830_v2, 0.0 }
 0x4f2   : > { %6332 = vpow2.f32 %v2908_v46  ;;  %v2836_v59 = vsub.f32 %v7573_v26, %v2658_v33  ;;  %3029 = vadd.xlane.f32.xlu1 %v3028_v45  ;;  %v3055_v10 = vsel %vm2637_vm1, %v7834_v35, 0.0 }
 0x4f3   : > { %6334 = vpow2.f32 %v2918_v20  ;;  %v2924_v54 = vmul.f32 1.442695, %v2845_v55 }
 0x4f4   : > { %v7840_v57 = vpop.eup %6324  ;;  %v2906_v47 = vmul.f32 1.442695, %v2836_v59  ;;  %v2682_v39 = vpop.xlane.xlu0 %2681 }
 0x4f5   : > { %v7844_v25 = vpop.eup %6326  ;;  %v2844_v24 = vsub.f32 %v7585_v4, %v2682_v39  ;;  %v2691_v0 = vpop.xlane.xlu1 %2690  ;;  %3056 = vadd.xlane.f32.xlu0 %v3055_v10  ;;  %v3037_v1 = vsel %vm2637_vm1, %v7840_v57, 0.0 }
 0x4f6   : > { %6336 = vpow2.f32 %v2906_v47  ;;  %v2847_v26 = vsub.f32 %v7583_v11, %v2691_v0  ;;  %3038 = vadd.xlane.f32.xlu1 %v3037_v1  ;;  %v3052_v16 = vsel %vm2637_vm1, %v7844_v25, 0.0 }
 0x4f7   : > { %6338 = vpow2.f32 %v2924_v54  ;;  %v2922_v8 = vmul.f32 1.442695, %v2844_v24 }
 0x4f8   : > { %v7850_v18 = vpop.eup %6328  ;;  %v2928_v62 = vmul.f32 1.442695, %v2847_v26  ;;  %v2715_v7 = vpop.xlane.xlu0 %2714 }
 0x4f9   : > { %v7854_v20 = vpop.eup %6330  ;;  %v2855_v4 = vsub.f32 %v7595_v27, %v2715_v7  ;;  %v2688_v46 = vpop.xlane.xlu1 %2687  ;;  %3053 = vadd.xlane.f32.xlu0 %v3052_v16  ;;  %v3034_v40 = vsel %vm2637_vm1, %v7850_v18, 0.0 }
 0x4fa   : > { %6340 = vpow2.f32 %v2928_v62  ;;  %v2846_v11 = vsub.f32 %v7587_v23, %v2688_v46  ;;  %3035 = vadd.xlane.f32.xlu1 %v3034_v40  ;;  %v3061_v59 = vsel %vm2637_vm1, %v7854_v20, 0.0 }
 0x4fb   : > { %6342 = vpow2.f32 %v2922_v8  ;;  %v2944_v15 = vmul.f32 1.442695, %v2855_v4 }
 0x4fc   : > { %v7860_v55 = vpop.eup %6332  ;;  %v2926_v33 = vmul.f32 1.442695, %v2846_v11  ;;  %v2712_v45 = vpop.xlane.xlu0 %2711 }
 0x4fd   : > { %v7864_v54 = vpop.eup %6334  ;;  %v2854_v27 = vsub.f32 %v7599_v49, %v2712_v45  ;;  %v2697_v47 = vpop.xlane.xlu1 %2696  ;;  %3062 = vadd.xlane.f32.xlu0 %v3061_v59  ;;  %v3043_v39 = vsel %vm2637_vm1, %v7860_v55, 0.0 }
 0x4fe   : > { %6344 = vpow2.f32 %v2926_v33  ;;  %v2849_v23 = vsub.f32 %v7593_v30, %v2697_v47  ;;  %3044 = vadd.xlane.f32.xlu1 %v3043_v39  ;;  %v3058_v26 = vsel %vm2637_vm1, %v7864_v54, 0.0 }
 0x4ff   : > { %6346 = vpow2.f32 %v2944_v15  ;;  %v2942_v10 = vmul.f32 1.442695, %v2854_v27 }
 0x500   : > { %v7870_v24 = vpop.eup %6336  ;;  %v2932_v0 = vmul.f32 1.442695, %v2849_v23  ;;  %v2721_v1 = vpop.xlane.xlu0 %2720 }
 0x501   : > { %v7874_v8 = vpop.eup %6338  ;;  %v2857_v49 = vsub.f32 %v7607_v44, %v2721_v1  ;;  %v2694_v62 = vpop.xlane.xlu1 %2693  ;;  %3059 = vadd.xlane.f32.xlu0 %v3058_v26  ;;  %v3040_v7 = vsel %vm2637_vm1, %v7870_v24, 0.0 }
 0x502   : > { %6348 = vpow2.f32 %v2932_v0  ;;  %v2848_v30 = vsub.f32 %v7597_v38, %v2694_v62  ;;  %3041 = vadd.xlane.f32.xlu1 %v3040_v7  ;;  %v3067_v11 = vsel %vm2637_vm1, %v7874_v8, 0.0 }
 0x503   : > { %6350 = vpow2.f32 %v2942_v10  ;;  %v2948_v16 = vmul.f32 1.442695, %v2857_v49 }
 0x504   : > { %v7880_v4 = vpop.eup %6340  ;;  %v2930_v46 = vmul.f32 1.442695, %v2848_v30  ;;  %v2718_v40 = vpop.xlane.xlu0 %2717 }
 0x505   : > { %v7884_v15 = vpop.eup %6342  ;;  %v2856_v44 = vsub.f32 %v7611_v9, %v2718_v40  ;;  %v2703_v33 = vpop.xlane.xlu1 %2702  ;;  %3068 = vadd.xlane.f32.xlu0 %v3067_v11  ;;  %v3073_v45 = vsel %vm2637_vm1, %v7880_v4, 0.0  ;;  %v8948_v9 = vld [vmem:[#allocation22_spill] sm:$0xff]  ;;  %v8950_v11 = vld [vmem:[#allocation23_spill] sm:$0xff] }
 0x506   : > { %6352 = vpow2.f32 %v2930_v46  ;;  %v2851_v38 = vsub.f32 %v7605_v50, %v2703_v33  ;;  %3074 = vadd.xlane.f32.xlu1 %v3073_v45  ;;  %v3064_v23 = vsel %vm2637_vm1, %v7884_v15, 0.0  ;;  %v8949_v50 = vld [vmem:[#allocation20_spill] sm:$0xff] }
 0x507   : > { %6354 = vpow2.f32 %v2948_v16  ;;  %v2946_v59 = vmul.f32 1.442695, %v2856_v44 }
 0x508   : > { %v7890_v27 = vpop.eup %6344  ;;  %v2936_v47 = vmul.f32 1.442695, %v2851_v38  ;;  %v2727_v39 = vpop.xlane.xlu0 %2726  ;;  %v8951_v38 = vld [vmem:[#allocation21_spill] sm:$0xff] }
 0x509   : > { %v7894_v10 = vpop.eup %6346  ;;  %v2859_v0 = vsub.f32 %v8948_v9, %v2727_v39  ;;  %v2700_v1 = vpop.xlane.xlu1 %2699  ;;  %3065 = vadd.xlane.f32.xlu0 %v3064_v23  ;;  %v3070_v26 = vsel %vm2637_vm1, %v7890_v27, 0.0 }
 0x50a   : > { %6356 = vpow2.f32 %v2936_v47  ;;  %v2850_v49 = vsub.f32 %v8949_v50, %v2700_v1  ;;  %3071 = vadd.xlane.f32.xlu1 %v3070_v26  ;;  %v3097_v46 = vsel %vm2637_vm1, %v7894_v10, 0.0  ;;  %v8952_v26 = vld [vmem:[#allocation24_spill] sm:$0xff] }
 0x50b   : > { %6358 = vpow2.f32 %v2946_v59  ;;  %v2952_v62 = vmul.f32 1.442695, %v2859_v0 }
 0x50c   : > { %v7900_v7 = vpop.eup %6348  ;;  %v2934_v30 = vmul.f32 1.442695, %v2850_v49  ;;  %v2724_v16 = vpop.xlane.xlu0 %2723 }
 0x50d   : > { %v7904_v40 = vpop.eup %6350  ;;  %v2858_v44 = vsub.f32 %v8950_v11, %v2724_v16  ;;  %v2709_v33 = vpop.xlane.xlu1 %2708  ;;  %3098 = vadd.xlane.f32.xlu0 %v3097_v46  ;;  %v3079_v45 = vsel %vm2637_vm1, %v7900_v7, 0.0 }
 0x50e   : > { %6360 = vpow2.f32 %v2934_v30  ;;  %v2853_v59 = vsub.f32 %v8951_v38, %v2709_v33  ;;  %3080 = vadd.xlane.f32.xlu1 %v3079_v45  ;;  %v3094_v0 = vsel %vm2637_vm1, %v7904_v40, 0.0  ;;  %v8953_v38 = vld [vmem:[#allocation25_spill] sm:$0xff] }
 0x50f   : > { %6362 = vpow2.f32 %v2952_v62  ;;  %v2950_v47 = vmul.f32 1.442695, %v2858_v44 }
 0x510   : > { %v7910_v39 = vpop.eup %6352  ;;  %v2940_v23 = vmul.f32 1.442695, %v2853_v59  ;;  %v2733_v9 = vpop.xlane.xlu0 %2732 }
 0x511   : > { %v7914_v1 = vpop.eup %6354  ;;  %v2861_v50 = vsub.f32 %v8952_v26, %v2733_v9  ;;  %v2706_v49 = vpop.xlane.xlu1 %2705  ;;  %3095 = vadd.xlane.f32.xlu0 %v3094_v0  ;;  %v3076_v30 = vsel %vm2637_vm1, %v7910_v39, 0.0 }
 0x512   : > { %6364 = vpow2.f32 %v2940_v23  ;;  %v2852_v62 = vsub.f32 %v7621_v61, %v2706_v49  ;;  %3077 = vadd.xlane.f32.xlu1 %v3076_v30  ;;  %v3103_v33 = vsel %vm2637_vm1, %v7914_v1, 0.0 }
 0x513   : > { %6366 = vpow2.f32 %v2950_v47  ;;  %v2956_v16 = vmul.f32 1.442695, %v2861_v50 }
 0x514   : > { %v7920_v46 = vpop.eup %6356  ;;  %v2938_v11 = vmul.f32 1.442695, %v2852_v62  ;;  %v2730_v44 = vpop.xlane.xlu0 %2729 }
 0x515   : > { %v7924_v45 = vpop.eup %6358  ;;  %v2860_v59 = vsub.f32 %v8953_v38, %v2730_v44  ;;  %v2739_v9 = vpop.xlane.xlu1 %2738  ;;  %3104 = vadd.xlane.f32.xlu0 %v3103_v33  ;;  %v3085_v23 = vsel %vm2637_vm1, %v7920_v46, 0.0 }
 0x516   : > { %6368 = vpow2.f32 %v2938_v11  ;;  %v2863_v61 = vsub.f32 %v7631_v19, %v2739_v9  ;;  %3086 = vadd.xlane.f32.xlu1 %v3085_v23  ;;  %v3100_v49 = vsel %vm2637_vm1, %v7924_v45, 0.0 }
 0x517   : > { %6370 = vpow2.f32 %v2956_v16  ;;  %v2954_v47 = vmul.f32 1.442695, %v2860_v59 }
 0x518   : > { %v7930_v0 = vpop.eup %6360  ;;  %v2960_v26 = vmul.f32 1.442695, %v2863_v61  ;;  %v2763_v50 = vpop.xlane.xlu0 %2762 }
 0x519   : > { %v7934_v30 = vpop.eup %6362  ;;  %v2871_v62 = vsub.f32 %v7643_v52, %v2763_v50  ;;  %v2736_v44 = vpop.xlane.xlu1 %2735  ;;  %3101 = vadd.xlane.f32.xlu0 %v3100_v49  ;;  %v3082_v11 = vsel %vm2637_vm1, %v7930_v0, 0.0 }
 0x51a   : > { %6372 = vpow2.f32 %v2960_v26  ;;  %v2862_v19 = vsub.f32 %v7635_v31, %v2736_v44  ;;  %3083 = vadd.xlane.f32.xlu1 %v3082_v11  ;;  %v3109_v9 = vsel %vm2637_vm1, %v7934_v30, 0.0 }
 0x51b   : > { %6374 = vpow2.f32 %v2954_v47  ;;  %v2976_v16 = vmul.f32 1.442695, %v2871_v62 }
 0x51c   : > { %v7940_v33 = vpop.eup %6364  ;;  %v2958_v38 = vmul.f32 1.442695, %v2862_v19  ;;  %v2760_v59 = vpop.xlane.xlu0 %2759 }
 0x51d   : > { %v7944_v23 = vpop.eup %6366  ;;  %v2870_v52 = vsub.f32 %v7647_v53, %v2760_v59  ;;  %v2745_v61 = vpop.xlane.xlu1 %2744  ;;  %3110 = vadd.xlane.f32.xlu0 %v3109_v9  ;;  %v3091_v26 = vsel %vm2637_vm1, %v7940_v33, 0.0 }
 0x51e   : > { %6376 = vpow2.f32 %v2958_v38  ;;  %v2865_v31 = vsub.f32 %v7641_v6, %v2745_v61  ;;  %3092 = vadd.xlane.f32.xlu1 %v3091_v26  ;;  %v3106_v44 = vsel %vm2637_vm1, %v7944_v23, 0.0 }
 0x51f   : > { %6378 = vpow2.f32 %v2976_v16  ;;  %v2974_v47 = vmul.f32 1.442695, %v2870_v52 }
 0x520   : > { %v7950_v50 = vpop.eup %6368  ;;  %v2964_v49 = vmul.f32 1.442695, %v2865_v31  ;;  %v2769_v62 = vpop.xlane.xlu0 %2768 }
 0x521   : > { %v7954_v11 = vpop.eup %6370  ;;  %v2873_v53 = vsub.f32 %v7655_v51, %v2769_v62  ;;  %v2742_v19 = vpop.xlane.xlu1 %2741  ;;  %3107 = vadd.xlane.f32.xlu0 %v3106_v44  ;;  %v3088_v38 = vsel %vm2637_vm1, %v7950_v50, 0.0 }
 0x522   : > { %6380 = vpow2.f32 %v2964_v49  ;;  %v2864_v6 = vsub.f32 %v7645_v17, %v2742_v19  ;;  %3089 = vadd.xlane.f32.xlu1 %v3088_v38  ;;  %v3115_v61 = vsel %vm2637_vm1, %v7954_v11, 0.0 }
 0x523   : > { %6382 = vpow2.f32 %v2974_v47  ;;  %v2980_v16 = vmul.f32 1.442695, %v2873_v53 }
 0x524   : > { %v7960_v59 = vpop.eup %6372  ;;  %v2962_v9 = vmul.f32 1.442695, %v2864_v6  ;;  %v2766_v52 = vpop.xlane.xlu0 %2765 }
 0x525   : > { %v7964_v26 = vpop.eup %6374  ;;  %v2872_v51 = vsub.f32 %v7659_v14, %v2766_v52  ;;  %v2751_v31 = vpop.xlane.xlu1 %2750  ;;  %3116 = vadd.xlane.f32.xlu0 %v3115_v61  ;;  %v3121_v49 = vsel %vm2637_vm1, %v7960_v59, 0.0 }
 0x526   : > { %6384 = vpow2.f32 %v2962_v9  ;;  %v2867_v17 = vsub.f32 %v7653_v21, %v2751_v31  ;;  %3122 = vadd.xlane.f32.xlu1 %v3121_v49  ;;  %v3112_v19 = vsel %vm2637_vm1, %v7964_v26, 0.0 }
 0x527   : > { %6386 = vpow2.f32 %v2980_v16  ;;  %v2978_v47 = vmul.f32 1.442695, %v2872_v51 }
 0x528   : > { %v7970_v62 = vpop.eup %6376  ;;  %v2968_v44 = vmul.f32 1.442695, %v2867_v17  ;;  %v2775_v53 = vpop.xlane.xlu0 %2774 }
 0x529   : > { %v7974_v38 = vpop.eup %6378  ;;  %v2875_v14 = vsub.f32 %v7667_v63, %v2775_v53  ;;  %v2748_v6 = vpop.xlane.xlu1 %2747  ;;  %3113 = vadd.xlane.f32.xlu0 %v3112_v19  ;;  %v3118_v9 = vsel %vm2637_vm1, %v7970_v62, 0.0 }
 0x52a   : > { %6388 = vpow2.f32 %v2968_v44  ;;  %v2866_v21 = vsub.f32 %v7657_v42, %v2748_v6  ;;  %3119 = vadd.xlane.f32.xlu1 %v3118_v9  ;;  %v3145_v31 = vsel %vm2637_vm1, %v7974_v38, 0.0 }
 0x52b   : > { %6390 = vpow2.f32 %v2978_v47  ;;  %v2984_v16 = vmul.f32 1.442695, %v2875_v14 }
 0x52c   : > { %v7980_v52 = vpop.eup %6380  ;;  %v2966_v61 = vmul.f32 1.442695, %v2866_v21  ;;  %v2772_v51 = vpop.xlane.xlu0 %2771 }
 0x52d   : > { %v7984_v49 = vpop.eup %6382  ;;  %v2874_v63 = vsub.f32 %v7671_v22, %v2772_v51  ;;  %v2757_v17 = vpop.xlane.xlu1 %2756  ;;  %3146 = vadd.xlane.f32.xlu0 %v3145_v31  ;;  %v3127_v44 = vsel %vm2637_vm1, %v7980_v52, 0.0 }
 0x52e   : > { %6392 = vpow2.f32 %v2966_v61  ;;  %v2869_v42 = vsub.f32 %v7665_v3, %v2757_v17  ;;  %3128 = vadd.xlane.f32.xlu1 %v3127_v44  ;;  %v3142_v6 = vsel %vm2637_vm1, %v7984_v49, 0.0 }
 0x52f   : > { %6394 = vpow2.f32 %v2984_v16  ;;  %v2982_v47 = vmul.f32 1.442695, %v2874_v63 }
 0x530   : > { %v7990_v53 = vpop.eup %6384  ;;  %v2972_v19 = vmul.f32 1.442695, %v2869_v42  ;;  %v2781_v14 = vpop.xlane.xlu0 %2780 }
 0x531   : > { %v7994_v9 = vpop.eup %6386  ;;  %v2877_v22 = vsub.f32 %v7677_v41, %v2781_v14  ;;  %v2754_v21 = vpop.xlane.xlu1 %2753  ;;  %3143 = vadd.xlane.f32.xlu0 %v3142_v6  ;;  %v3124_v61 = vsel %vm2637_vm1, %v7990_v53, 0.0 }
 0x532   : > { %6396 = vpow2.f32 %v2972_v19  ;;  %v2868_v3 = vsub.f32 %v7669_v28, %v2754_v21  ;;  %3125 = vadd.xlane.f32.xlu1 %v3124_v61  ;;  %v3151_v17 = vsel %vm2637_vm1, %v7994_v9, 0.0 }
 0x533   : > { %6398 = vpow2.f32 %v2982_v47  ;;  %v2988_v16 = vmul.f32 1.442695, %v2877_v22 }
 0x534   : > { %v8000_v51 = vpop.eup %6388  ;;  %v2970_v31 = vmul.f32 1.442695, %v2868_v3  ;;  %v2778_v63 = vpop.xlane.xlu0 %2777 }
 0x535   : > { %v8004_v44 = vpop.eup %6390  ;;  %v2876_v41 = vsub.f32 %v7681_v34, %v2778_v63  ;;  %v2787_v42 = vpop.xlane.xlu1 %2786  ;;  %3152 = vadd.xlane.f32.xlu0 %v3151_v17  ;;  %v3133_v19 = vsel %vm2637_vm1, %v8000_v51, 0.0 }
 0x536   : > { %6400 = vpow2.f32 %v2970_v31  ;;  %v2879_v28 = vsub.f32 %v7679_v43, %v2787_v42  ;;  %3134 = vadd.xlane.f32.xlu1 %v3133_v19  ;;  %v3148_v21 = vsel %vm2637_vm1, %v8004_v44, 0.0 }
 0x537   : > { %6402 = vpow2.f32 %v2988_v16  ;;  %v2986_v47 = vmul.f32 1.442695, %v2876_v41 }
 0x538   : > { %v8010_v14 = vpop.eup %6392  ;;  %v2992_v6 = vmul.f32 1.442695, %v2879_v28  ;;  %v2811_v22 = vpop.xlane.xlu0 %2810 }
 0x539   : > { %v8014_v61 = vpop.eup %6394  ;;  %v2887_v34 = vsub.f32 %v7691_v5, %v2811_v22  ;;  %v2784_v3 = vpop.xlane.xlu1 %2783  ;;  %3149 = vadd.xlane.f32.xlu0 %v3148_v21  ;;  %v3130_v31 = vsel %vm2637_vm1, %v8010_v14, 0.0 }
 0x53a   : > { %6404 = vpow2.f32 %v2992_v6  ;;  %v2878_v43 = vsub.f32 %v7683_v48, %v2784_v3  ;;  %3131 = vadd.xlane.f32.xlu1 %v3130_v31  ;;  %v3157_v42 = vsel %vm2637_vm1, %v8014_v61, 0.0 }
 0x53b   : > { %6406 = vpow2.f32 %v2986_v47  ;;  %v3008_v16 = vmul.f32 1.442695, %v2887_v34 }
 0x53c   : > { %v8020_v63 = vpop.eup %6396  ;;  %v2990_v17 = vmul.f32 1.442695, %v2878_v43  ;;  %v2808_v41 = vpop.xlane.xlu0 %2807 }
 0x53d   : > { %v8024_v19 = vpop.eup %6398  ;;  %v2886_v5 = vsub.f32 %v7695_v13, %v2808_v41  ;;  %v2793_v28 = vpop.xlane.xlu1 %2792  ;;  %3158 = vadd.xlane.f32.xlu0 %v3157_v42  ;;  %v3139_v6 = vsel %vm2637_vm1, %v8020_v63, 0.0 }
 0x53e   : > { %6408 = vpow2.f32 %v2990_v17  ;;  %v2881_v48 = vsub.f32 %v7689_v12, %v2793_v28  ;;  %3140 = vadd.xlane.f32.xlu1 %v3139_v6  ;;  %v3154_v3 = vsel %vm2637_vm1, %v8024_v19, 0.0 }
 0x53f   : > { %6410 = vpow2.f32 %v3008_v16  ;;  %v3006_v47 = vmul.f32 1.442695, %v2886_v5 }
 0x540   : > { %v8030_v22 = vpop.eup %6400  ;;  %v2996_v21 = vmul.f32 1.442695, %v2881_v48  ;;  %v2817_v34 = vpop.xlane.xlu0 %2816 }
 0x541   : > { %v8034_v31 = vpop.eup %6402  ;;  %v2889_v13 = vsub.f32 %v7703_v36, %v2817_v34  ;;  %v2790_v43 = vpop.xlane.xlu1 %2789  ;;  %3155 = vadd.xlane.f32.xlu0 %v3154_v3  ;;  %v3136_v17 = vsel %vm2637_vm1, %v8030_v22, 0.0  ;;  %v8957_v36 = vld [vmem:[#allocation28_spill] sm:$0xff] }
 0x542   : > { %8954 = vst [vmem:[#allocation22_spill] sm:$0xff] %v8034_v31  ;;  %6412 = vpow2.f32 %v2996_v21  ;;  %v2880_v12 = vsub.f32 %v7693_v60, %v2790_v43  ;;  %3137 = vadd.xlane.f32.xlu1 %v3136_v17  ;;  %v3163_v28 = vsel %vm2637_vm1, %v8034_v31, 0.0  ;;  %v8958_v60 = vld [vmem:[#allocation26_spill] sm:$0xff] }
 0x543   : > { %6414 = vpow2.f32 %v3006_v47  ;;  %v3012_v16 = vmul.f32 1.442695, %v2889_v13 }
 0x544   : > { %v8040_v41 = vpop.eup %6404  ;;  %v2994_v42 = vmul.f32 1.442695, %v2880_v12  ;;  %v2814_v5 = vpop.xlane.xlu0 %2813 }
 0x545   : > { %8955 = vst [vmem:[#allocation20_spill] sm:$0xff] %v8040_v41  ;;  %v8044_v6 = vpop.eup %6406  ;;  %v2888_v48 = vsub.f32 %v8957_v36, %v2814_v5  ;;  %v2799_v34 = vpop.xlane.xlu1 %2798  ;;  %3164 = vadd.xlane.f32.xlu0 %v3163_v28  ;;  %v3169_v21 = vsel %vm2637_vm1, %v8040_v41, 0.0  ;;  %v8961_v5 = vld [vmem:[#allocation30_spill] sm:$0xff] }
 0x546   : > { %8956 = vst [vmem:[#allocation23_spill] sm:$0xff] %v8044_v6  ;;  %6416 = vpow2.f32 %v2994_v42  ;;  %v2883_v47 = vsub.f32 %v8958_v60, %v2799_v34  ;;  %3170 = vadd.xlane.f32.xlu1 %v3169_v21  ;;  %v3160_v12 = vsel %vm2637_vm1, %v8044_v6, 0.0  ;;  %v8962_v34 = vld [vmem:[#allocation27_spill] sm:$0xff] }
 0x547   : > { %6418 = vpow2.f32 %v3012_v16  ;;  %v3010_v3 = vmul.f32 1.442695, %v2888_v48 }
 0x548   : > { %v8050_v13 = vpop.eup %6408  ;;  %v3000_v43 = vmul.f32 1.442695, %v2883_v47  ;;  %v2823_v17 = vpop.xlane.xlu0 %2822 }
 0x549   : > { %8959 = vst [vmem:[#allocation21_spill] sm:$0xff] %v8050_v13  ;;  %v8054_v31 = vpop.eup %6410  ;;  %v2891_v28 = vsub.f32 %v8961_v5, %v2823_v17  ;;  %v2796_v36 = vpop.xlane.xlu1 %2795  ;;  %3161 = vadd.xlane.f32.xlu0 %v3160_v12  ;;  %v3166_v42 = vsel %vm2637_vm1, %v8050_v13, 0.0  ;;  %v8965_v17 = vld [vmem:[#allocation32_spill] sm:$0xff] }
 0x54a   : > { %8960 = vst [vmem:[#allocation24_spill] sm:$0xff] %v8054_v31  ;;  %6420 = vpow2.f32 %v3000_v43  ;;  %v2882_v16 = vsub.f32 %v8962_v34, %v2796_v36  ;;  %3167 = vadd.xlane.f32.xlu1 %v3166_v42  ;;  %v3193_v41 = vsel %vm2637_vm1, %v8054_v31, 0.0  ;;  %v8966_v36 = vld [vmem:[#allocation29_spill] sm:$0xff] }
 0x54b   : > { %6422 = vpow2.f32 %v3010_v3  ;;  %v3016_v48 = vmul.f32 1.442695, %v2891_v28 }
 0x54c   : > { %v8060_v21 = vpop.eup %6412  ;;  %v2998_v60 = vmul.f32 1.442695, %v2882_v16  ;;  %v2820_v47 = vpop.xlane.xlu0 %2819 }
 0x54d   : > { %8963 = vst [vmem:[#allocation25_spill] sm:$0xff] %v8060_v21  ;;  %v8064_v6 = vpop.eup %6414  ;;  %v2890_v12 = vsub.f32 %v8965_v17, %v2820_v47  ;;  %v2805_v5 = vpop.xlane.xlu1 %2804  ;;  %3194 = vadd.xlane.f32.xlu0 %v3193_v41  ;;  %v3175_v43 = vsel %vm2637_vm1, %v8060_v21, 0.0  ;;  %v8968_v47 = vld [vmem:[#allocation33_spill] sm:$0xff] }
 0x54e   : > { %8964 = vst [vmem:[#allocation28_spill] sm:$0xff] %v8064_v6  ;;  %6424 = vpow2.f32 %v2998_v60  ;;  %v2885_v3 = vsub.f32 %v8966_v36, %v2805_v5  ;;  %3176 = vadd.xlane.f32.xlu1 %v3175_v43  ;;  %v3190_v31 = vsel %vm2637_vm1, %v8064_v6, 0.0  ;;  %v8969_v5 = vld [vmem:[#allocation31_spill] sm:$0xff] }
 0x54f   : > { %6426 = vpow2.f32 %v3016_v48  ;;  %v3014_v28 = vmul.f32 1.442695, %v2890_v12 }
 0x550   : > { %v8070_v42 = vpop.eup %6416  ;;  %v3004_v34 = vmul.f32 1.442695, %v2885_v3  ;;  %v2829_v16 = vpop.xlane.xlu0 %2828 }
 0x551   : > { %v8074_v13 = vpop.eup %6418  ;;  %v2893_v41 = vsub.f32 %v8968_v47, %v2829_v16  ;;  %v2802_v17 = vpop.xlane.xlu1 %2801  ;;  %3191 = vadd.xlane.f32.xlu0 %v3190_v31  ;;  %v3172_v60 = vsel %vm2637_vm1, %v8070_v42, 0.0  ;;  %v8970_v16 = vld [vmem:[#allocation34_spill] sm:$0xff] }
 0x552   : > { %8967 = vst [vmem:[#allocation26_spill] sm:$0xff] %v8074_v13  ;;  %6428 = vpow2.f32 %v3004_v34  ;;  %v2884_v48 = vsub.f32 %v8969_v5, %v2802_v17  ;;  %3173 = vadd.xlane.f32.xlu1 %v3172_v60  ;;  %v3199_v21 = vsel %vm2637_vm1, %v8074_v13, 0.0  ;;  %v8978_v13 = vld [vmem:[#allocation18_spill] sm:$0xff] }
 0x553   : > { %6430 = vpow2.f32 %v3014_v28  ;;  %v3020_v12 = vmul.f32 1.442695, %v2893_v41 }
 0x554   : > { %v8080_v43 = vpop.eup %6420  ;;  %v3002_v36 = vmul.f32 1.442695, %v2884_v48  ;;  %v2826_v3 = vpop.xlane.xlu0 %2825 }
 0x555   : > { %v8084_v6 = vpop.eup %6422  ;;  %v2892_v31 = vsub.f32 %v8970_v16, %v2826_v3  ;;  %3200 = vadd.xlane.f32.xlu0 %v3199_v21  ;;  %v3181_v34 = vsel %vm2637_vm1, %v8080_v43, 0.0 }
 0x556   : > { %6432 = vpow2.f32 %v3002_v36  ;;  %3182 = vadd.xlane.f32.xlu1 %v3181_v34  ;;  %v3196_v41 = vsel %vm2637_vm1, %v8084_v6, 0.0 }
 0x557   : > { %6434 = vpow2.f32 %v3020_v12  ;;  %v3018_v28 = vmul.f32 1.442695, %v2892_v31 }
 0x558   : > { %v8089_v47 = vpop.eup %6424 }
 0x559   : > { %v8093_v17 = vpop.eup %6426  ;;  %3197 = vadd.xlane.f32.xlu0 %v3196_v41  ;;  %v3178_v60 = vsel %vm2637_vm1, %v8089_v47, 0.0  ;;  %6436 = vpow2.f32 %v3018_v28 }
 0x55a   : > { %8971 = vst [vmem:[#allocation30_spill] sm:$0xff] %v8093_v17  ;;  %3179 = vadd.xlane.f32.xlu1 %v3178_v60  ;;  %v3205_v5 = vsel %vm2637_vm1, %v8093_v17, 0.0 }
 0x55c   : > { %v8097_v21 = vpop.eup %6428 }
 0x55d   : > { %8972 = vst [vmem:[#allocation27_spill] sm:$0xff] %v8097_v21  ;;  %v8101_v48 = vpop.eup %6430  ;;  %3206 = vadd.xlane.f32.xlu0 %v3205_v5  ;;  %v3187_v12 = vsel %vm2637_vm1, %v8097_v21, 0.0  ;;  %v8976_v5 = vld [vmem:[#allocation16_spill] sm:$0xff] }
 0x55e   : > { %8973 = vst [vmem:[#allocation32_spill] sm:$0xff] %v8101_v48  ;;  %3188 = vadd.xlane.f32.xlu1 %v3187_v12  ;;  %v3202_v3 = vsel %vm2637_vm1, %v8101_v48, 0.0 }
 0x560   : > { %v8105_v36 = vpop.eup %6432 }
 0x561   : > { %v8109_v16 = vpop.eup %6434  ;;  %3203 = vadd.xlane.f32.xlu0 %v3202_v3  ;;  %v3184_v31 = vsel %vm2637_vm1, %v8105_v36, 0.0 }
 0x562   : > { %8974 = vst [vmem:[#allocation29_spill] sm:$0xff] %v8109_v16  ;;  %3185 = vadd.xlane.f32.xlu1 %v3184_v31  ;;  %v3211_v34 = vsel %vm2637_vm1, %v8109_v16, 0.0 }
 0x563   : > { %v8115_v28 = vpop.eup %6436 }
 0x564   : > { %8975 = vst [vmem:[#allocation33_spill] sm:$0xff] %v8115_v28  ;;  %v3208_v41 = vsel %vm2637_vm1, %v8115_v28, 0.0 }
 0x565   : > { %3212 = vadd.xlane.f32.xlu0 %v3211_v34  ;;  %v8977_v34 = vld [vmem:[#allocation17_spill] sm:$0xff] }
 0x569   : > { %3209 = vadd.xlane.f32.xlu0 %v3208_v41 }
 0x572   : > { %v3027_v60 = vpop.xlane.xlu1 %3026 }
 0x573   : > { %4206 = vrot.lane.b32.xlu1 %v8976_v5, %s6688_s28  ;;  %6438 = vrcp.f32 %v3027_v60  ;;  %v8127_v60 = vld [vmem:[%s8854_s8] sm:$0xff] }
 0x576   : > { %v3024_v12 = vpop.xlane.xlu1 %3023 }
 0x577   : > { %6440 = vrcp.f32 %v3024_v12 }
 0x57a   : > { %v3051_v3 = vpop.xlane.xlu0 %3050 }
 0x57b   : > { %v3033_v17 = vpop.xlane.xlu1 %3032  ;;  %6442 = vrcp.f32 %v3051_v3 }
 0x57c   : > { %6444 = vrcp.f32 %v3033_v17  ;;  %v8132_v17 = vld [vmem:[%s8854_s8 + $0x8] sm:$0xff] }
 0x57d   : > { %v6439_v31 = vpop.eup %6438 }
 0x57e   : > { %v3048_v16 = vpop.xlane.xlu0 %3047  ;;  %v3217_v28 = vmul.f32 %v6439_v31, %v7806_v32 }
 0x57f   : > { %6446 = vrcp.f32 %v3048_v16  ;;  %v3030_v48 = vpop.xlane.xlu1 %3029  ;;  %4338 = vrot.lane.b32.xlu0 %v8977_v34, %s6688_s28  ;;  %s5331_s28 = sshll.u32 %s407_s17, 4  ;;  %s8803_s28 = int_to_ptr.vmem [resolvable:$true] %s5331_s28 }
 0x580   : > { %6448 = vrcp.f32 %v3030_v48  ;;  %v3351_v3 = vadd.f32 %v8132_v17, %v3217_v28  ;;  %s6622_s26 = scalar_lea.vmem %s8803_s28, 128  ;;  %p6629_p0 = scmp.lt.s32.totalorder %s8803_s28, %s6627_s15 }
 0x581   : > { %v6441_v41 = vpop.eup %6440  ;;  %p6623_p11 = scmp.ne.s32.totalorder %s8803_s28, %s6622_s26  ;;  %p6630_p1 = scmp.lt.s32.totalorder %s6628_s16, %s6622_s26 }
 0x582   : > { %v3057_v5 = vpop.xlane.xlu0 %3056  ;;  %v3215_v16 = vmul.f32 %v6441_v41, %v7812_v37 }
 0x583   : > { %v3039_v12 = vpop.xlane.xlu1 %3038  ;;  %6450 = vrcp.f32 %v3057_v5  ;;  %v8979_v5 = vld [vmem:[#allocation36_spill] sm:$0xff]  ;;  %p6624_p12 = pnand %p6623_p11, %p6793_p5  ;;  %p6631_p2 = por %p6630_p1, %p6629_p0 }
 0x584   : > { %v3350_v48 = vadd.f32 %v8127_v60, %v3215_v16  ;;  %6452 = vrcp.f32 %v3039_v12 }
 0x585   : > { %v6443_v32 = vpop.eup %6442  ;;  %p6625_p13 = pneg %p6624_p12 }
 0x586   : > { %5990 = vmatprep.mubr.msk.f32.mxu1 %vm2637_vm1, %v3350_v48  ;;  %v3054_v31 = vpop.xlane.xlu0 %3053  ;;  %v6445_v34 = vpop.eup %6444  ;;  %v3233_v41 = vmul.f32 %v6443_v32, %v7818_v56  ;;  %v8146_v48 = vld [vmem:[%s8854_s8 + $0x10] sm:$0xff]  ;;  %v8153_v56 = vld [vmem:[%s8854_s8 + $0x18] sm:$0xff] }
 0x587   : > { %6454 = vrcp.f32 %v3054_v31  ;;  %5991 = vmatmul.mubr.msk.f32.vlgmr.msra.gmra.mrb[68].mxu1 %vm2637_vm1, %v3351_v3  ;;  %v3036_v21 = vpop.xlane.xlu1 %3035  ;;  %v3221_v3 = vmul.f32 %v6445_v34, %v7820_v29  ;;  %p6632_p3 = pnand %p6631_p2, %p6625_p13 }
 0x588   : > { %6017 = vmatpush3.msra.mxu1 %v8978_v13  ;;  %6456 = vrcp.f32 %v3036_v21 }
 0x589   : > { %v6447_v37 = vpop.eup %6446  ;;  %6044 = vmatprep.subr.mxu1 %v8979_v5  ;;  %v3353_v34 = vadd.f32 %v8153_v56, %v3221_v3 }
 0x58a   : > { %v6449_v16 = vpop.eup %6448  ;;  %v3063_v28 = vpop.xlane.xlu0 %3062  ;;  %v3231_v12 = vmul.f32 %v6447_v37, %v7824_v58  ;;  %v3359_v58 = vadd.f32 %v8132_v17, %v3233_v41 }
 0x58b   : > { %v3045_v31 = vpop.xlane.xlu1 %3044  ;;  %v3219_v13 = vmul.f32 %v6449_v16, %v7830_v2  ;;  %6458 = vrcp.f32 %v3063_v28  ;;  %v8980_v28 = vld [vmem:[#allocation19_spill] sm:$0xff] }
 0x58c   : > { %v3358_v21 = vadd.f32 %v8127_v60, %v3231_v12  ;;  %6460 = vrcp.f32 %v3045_v31  ;;  %v8981_v12 = vld [vmem:[#allocation35_spill] sm:$0xff] }
 0x58d   : > { %v3352_v32 = vadd.f32 %v8146_v48, %v3219_v13  ;;  %v6451_v37 = vpop.eup %6450 }
 0x58e   : > { %6004 = vmatprep.mubr.msk.f32.mxu0 %vm2637_vm1, %v3358_v21  ;;  %v3060_v29 = vpop.xlane.xlu0 %3059  ;;  %v6453_v2 = vpop.eup %6452  ;;  %v3237_v31 = vmul.f32 %v6451_v37, %v7834_v35 }
 0x58f   : > { %6462 = vrcp.f32 %v3060_v29  ;;  %5993 = vmatprep.mubr.msk.f32.mxu1 %vm2637_vm1, %v3352_v32  ;;  %v3042_v16 = vpop.xlane.xlu1 %3041  ;;  %6005 = vmatmul.mubr.msk.f32.vlgmr.msra.gmra.mrb[68].mxu0 %vm2637_vm1, %v3359_v58  ;;  %v8170_v32 = vld [vmem:[%s8854_s8 + $0x20] sm:$0xff]  ;;  %v3225_v58 = vmul.f32 %v6453_v2, %v7840_v57 }
 0x590   : > { %6464 = vrcp.f32 %v3042_v16  ;;  %6031 = vmatpush3.msra.mxu0 %v8980_v28  ;;  %5994 = vmatmul.mubr.msk.f32.gmra.mrb[70].mxu1 %vm2637_vm1, %v3353_v34  ;;  %v8177_v34 = vld [vmem:[%s8854_s8 + $0x28] sm:$0xff]  ;;  %v3361_v37 = vadd.f32 %v8153_v56, %v3237_v31 }
 0x591   : > { %v6455_v41 = vpop.eup %6454  ;;  %6058 = vmatprep.subr.mxu0 %v8981_v12  ;;  %v3355_v2 = vadd.f32 %v8177_v34, %v3225_v58  ;;  %v8192_v58 = vld [vmem:[%s8854_s8 + $0x30] sm:$0xff] }
 0x592   : > { %v6457_v13 = vpop.eup %6456  ;;  %v3069_v21 = vpop.xlane.xlu0 %3068  ;;  %v3235_v3 = vmul.f32 %v6455_v41, %v7844_v25 }
 0x593   : > { %v3075_v29 = vpop.xlane.xlu1 %3074  ;;  %v3223_v16 = vmul.f32 %v6457_v13, %v7850_v18  ;;  %6466 = vrcp.f32 %v3069_v21 }
 0x594   : > { %v3360_v35 = vadd.f32 %v8146_v48, %v3235_v3  ;;  %6468 = vrcp.f32 %v3075_v29 }
 0x595   : > { %v3354_v25 = vadd.f32 %v8170_v32, %v3223_v16  ;;  %v6459_v28 = vpop.eup %6458 }
 0x596   : > { %6007 = vmatprep.mubr.msk.f32.mxu0 %vm2637_vm1, %v3360_v35  ;;  %v3066_v57 = vpop.xlane.xlu0 %3065  ;;  %v6461_v18 = vpop.eup %6460  ;;  %v3241_v21 = vmul.f32 %v6459_v28, %v7854_v20 }
 0x597   : > { %6470 = vrcp.f32 %v3066_v57  ;;  %5996 = vmatprep.mubr.msk.f32.mxu1 %vm2637_vm1, %v3354_v25  ;;  %v3072_v41 = vpop.xlane.xlu1 %3071  ;;  %6008 = vmatmul.mubr.msk.f32.gmra.mrb[70].mxu0 %vm2637_vm1, %v3361_v37  ;;  %v3229_v16 = vmul.f32 %v6461_v18, %v7860_v55  ;;  %v8199_v37 = vld [vmem:[%s8854_s8 + $0x38] sm:$0xff] }
 0x598   : > { %6472 = vrcp.f32 %v3072_v41  ;;  %5997 = vmatmul.mubr.msk.f32.gmra.mrb[72].mxu1 %vm2637_vm1, %v3355_v2  ;;  %v3363_v28 = vadd.f32 %v8177_v34, %v3241_v21 }
 0x599   : > { %v6463_v13 = vpop.eup %6462  ;;  %v3357_v2 = vadd.f32 %v8199_v37, %v3229_v16 }
 0x59a   : > { %v6465_v31 = vpop.eup %6464  ;;  %v3099_v3 = vpop.xlane.xlu0 %3098  ;;  %v3239_v29 = vmul.f32 %v6463_v13, %v7864_v54 }
 0x59b   : > { %v3081_v35 = vpop.xlane.xlu1 %3080  ;;  %v3227_v25 = vmul.f32 %v6465_v31, %v7870_v24  ;;  %6474 = vrcp.f32 %v3099_v3 }
 0x59c   : > { %v3362_v20 = vadd.f32 %v8170_v32, %v3239_v29  ;;  %6476 = vrcp.f32 %v3081_v35 }
 0x59d   : > { %v3356_v54 = vadd.f32 %v8192_v58, %v3227_v25  ;;  %v6467_v57 = vpop.eup %6466 }
 0x59e   : > { %6010 = vmatprep.mubr.msk.f32.mxu0 %vm2637_vm1, %v3362_v20  ;;  %v3096_v55 = vpop.xlane.xlu0 %3095  ;;  %v6469_v24 = vpop.eup %6468  ;;  %v3245_v13 = vmul.f32 %v6467_v57, %v7874_v8 }
 0x59f   : > { %6478 = vrcp.f32 %v3096_v55  ;;  %5999 = vmatprep.mubr.msk.f32.mxu1 %vm2637_vm1, %v3356_v54  ;;  %v3078_v18 = vpop.xlane.xlu1 %3077  ;;  %6011 = vmatmul.mubr.msk.f32.gmra.mrb[72].mxu0 %vm2637_vm1, %v3363_v28  ;;  %v3249_v31 = vmul.f32 %v6469_v24, %v7880_v4 }
 0x5a0   : > { %6480 = vrcp.f32 %v3078_v18  ;;  %6000 = vmatmul.mubr.msk.f32.gmra.mrb[74].mxu1 %vm2637_vm1, %v3357_v2  ;;  %v3365_v54 = vadd.f32 %v8199_v37, %v3245_v13 }
 0x5a1   : > { %v6471_v41 = vpop.eup %6470  ;;  %v3367_v8 = vadd.f32 %v8132_v17, %v3249_v31 }
 0x5a2   : > { %v6473_v21 = vpop.eup %6472  ;;  %v3105_v3 = vpop.xlane.xlu0 %3104  ;;  %v3243_v29 = vmul.f32 %v6471_v41, %v7884_v15 }
 0x5a3   : > { %v3087_v16 = vpop.xlane.xlu1 %3086  ;;  %v3247_v35 = vmul.f32 %v6473_v21, %v7890_v27  ;;  %6482 = vrcp.f32 %v3105_v3 }
 0x5a4   : > { %v3364_v25 = vadd.f32 %v8192_v58, %v3243_v29  ;;  %6484 = vrcp.f32 %v3087_v16 }
 0x5a5   : > { %v3366_v20 = vadd.f32 %v8127_v60, %v3247_v35  ;;  %v6475_v28 = vpop.eup %6474 }
 0x5a6   : > { %6013 = vmatprep.mubr.msk.f32.mxu0 %vm2637_vm1, %v3364_v25  ;;  %v3102_v4 = vpop.xlane.xlu0 %3101  ;;  %v6477_v57 = vpop.eup %6476  ;;  %v3265_v55 = vmul.f32 %v6475_v28, %v7894_v10 }
 0x5a7   : > { %6486 = vrcp.f32 %v3102_v4  ;;  %6018 = vmatprep.mubr.msk.f32.mxu1 %vm2637_vm1, %v3366_v20  ;;  %v3084_v15 = vpop.xlane.xlu1 %3083  ;;  %6014 = vmatmul.mubr.msk.f32.gmra.mrb[74].mxu0 %vm2637_vm1, %v3365_v54  ;;  %v3253_v41 = vmul.f32 %v6477_v57, %v7900_v7 }
 0x5a8   : > { %6488 = vrcp.f32 %v3084_v15  ;;  %6019 = vmatmul.mubr.msk.f32.vlgmr.msra.gmra.mrb[76].mxu1 %vm2637_vm1, %v3367_v8  ;;  %v3375_v3 = vadd.f32 %v8132_v17, %v3265_v55 }
 0x5a9   : > { %v6479_v27 = vpop.eup %6478  ;;  %6045 = vmatpush3.msra.mxu1 %v8979_v5  ;;  %v3369_v16 = vadd.f32 %v8153_v56, %v3253_v41 }
 0x5aa   : > { %v6481_v2 = vpop.eup %6480  ;;  %v3111_v24 = vpop.xlane.xlu0 %3110  ;;  %v3263_v18 = vmul.f32 %v6479_v27, %v7904_v40 }
 0x5ab   : > { %v3093_v13 = vpop.xlane.xlu1 %3092  ;;  %v3251_v21 = vmul.f32 %v6481_v2, %v7910_v39  ;;  %6490 = vrcp.f32 %v3111_v24 }
 0x5ac   : > { %v3374_v31 = vadd.f32 %v8127_v60, %v3263_v18  ;;  %6492 = vrcp.f32 %v3093_v13 }
 0x5ad   : > { %v3368_v29 = vadd.f32 %v8146_v48, %v3251_v21  ;;  %v6483_v10 = vpop.eup %6482 }
 0x5ae   : > { %6032 = vmatprep.mubr.msk.f32.mxu0 %vm2637_vm1, %v3374_v31  ;;  %v3108_v5 = vpop.xlane.xlu0 %3107  ;;  %v6485_v40 = vpop.eup %6484  ;;  %v3269_v35 = vmul.f32 %v6483_v10, %v7914_v1 }
 0x5af   : > { %6494 = vrcp.f32 %v3108_v5  ;;  %6021 = vmatprep.mubr.msk.f32.mxu1 %vm2637_vm1, %v3368_v29  ;;  %v3090_v7 = vpop.xlane.xlu1 %3089  ;;  %6033 = vmatmul.mubr.msk.f32.vlgmr.msra.gmra.mrb[76].mxu0 %vm2637_vm1, %v3375_v3  ;;  %v3257_v28 = vmul.f32 %v6485_v40, %v7920_v46 }
 0x5b0   : > { %6496 = vrcp.f32 %v3090_v7  ;;  %6059 = vmatpush3.msra.mxu0 %v8981_v12  ;;  %6022 = vmatmul.mubr.msk.f32.gmra.mrb[78].mxu1 %vm2637_vm1, %v3369_v16  ;;  %v3377_v15 = vadd.f32 %v8153_v56, %v3269_v35 }
 0x5b1   : > { %v6487_v39 = vpop.eup %6486  ;;  %v3371_v55 = vadd.f32 %v8177_v34, %v3257_v28 }
 0x5b2   : > { %v6489_v25 = vpop.eup %6488  ;;  %v3117_v20 = vpop.xlane.xlu0 %3116  ;;  %v3267_v54 = vmul.f32 %v6487_v39, %v7924_v45 }
 0x5b3   : > { %v3123_v8 = vpop.xlane.xlu1 %3122  ;;  %v3255_v4 = vmul.f32 %v6489_v25, %v7930_v0  ;;  %6498 = vrcp.f32 %v3117_v20 }
 0x5b4   : > { %v3376_v57 = vadd.f32 %v8146_v48, %v3267_v54  ;;  %6500 = vrcp.f32 %v3123_v8 }
 0x5b5   : > { %v3370_v12 = vadd.f32 %v8170_v32, %v3255_v4  ;;  %v6491_v27 = vpop.eup %6490 }
 0x5b6   : > { %6035 = vmatprep.mubr.msk.f32.mxu0 %vm2637_vm1, %v3376_v57  ;;  %v3114_v1 = vpop.xlane.xlu0 %3113  ;;  %v6493_v45 = vpop.eup %6492  ;;  %v3273_v2 = vmul.f32 %v6491_v27, %v7934_v30 }
 0x5b7   : > { %6502 = vrcp.f32 %v3114_v1  ;;  %6024 = vmatprep.mubr.msk.f32.mxu1 %vm2637_vm1, %v3370_v12  ;;  %v3120_v46 = vpop.xlane.xlu1 %3119  ;;  %6036 = vmatmul.mubr.msk.f32.gmra.mrb[78].mxu0 %vm2637_vm1, %v3377_v15  ;;  %v3261_v13 = vmul.f32 %v6493_v45, %v7940_v33 }
 0x5b8   : > { %6504 = vrcp.f32 %v3120_v46  ;;  %6025 = vmatmul.mubr.msk.f32.gmra.mrb[80].mxu1 %vm2637_vm1, %v3371_v55  ;;  %v3379_v10 = vadd.f32 %v8177_v34, %v3273_v2 }
 0x5b9   : > { %v6495_v0 = vpop.eup %6494  ;;  %v3373_v16 = vadd.f32 %v8199_v37, %v3261_v13 }
 0x5ba   : > { %v6497_v24 = vpop.eup %6496  ;;  %v3147_v18 = vpop.xlane.xlu0 %3146  ;;  %v3271_v41 = vmul.f32 %v6495_v0, %v7944_v23 }
 0x5bb   : > { %v3129_v21 = vpop.xlane.xlu1 %3128  ;;  %v3259_v31 = vmul.f32 %v6497_v24, %v7950_v50  ;;  %6506 = vrcp.f32 %v3147_v18 }
 0x5bc   : > { %v3378_v3 = vadd.f32 %v8170_v32, %v3271_v41  ;;  %6508 = vrcp.f32 %v3129_v21 }
 0x5bd   : > { %v3372_v29 = vadd.f32 %v8192_v58, %v3259_v31  ;;  %v6499_v5 = vpop.eup %6498 }
 0x5be   : > { %6038 = vmatprep.mubr.msk.f32.mxu0 %vm2637_vm1, %v3378_v3  ;;  %v3144_v30 = vpop.xlane.xlu0 %3143  ;;  %v6501_v23 = vpop.eup %6500  ;;  %v3277_v40 = vmul.f32 %v6499_v5, %v7954_v11 }
 0x5bf   : > { %6510 = vrcp.f32 %v3144_v30  ;;  %6027 = vmatprep.mubr.msk.f32.mxu1 %vm2637_vm1, %v3372_v29  ;;  %v3126_v33 = vpop.xlane.xlu1 %3125  ;;  %6039 = vmatmul.mubr.msk.f32.gmra.mrb[80].mxu0 %vm2637_vm1, %v3379_v10  ;;  %v3281_v39 = vmul.f32 %v6501_v23, %v7960_v59 }
 0x5c0   : > { %6512 = vrcp.f32 %v3126_v33  ;;  %6028 = vmatmul.mubr.msk.f32.gmra.mrb[82].mxu1 %vm2637_vm1, %v3373_v16  ;;  %v3381_v4 = vadd.f32 %v8199_v37, %v3277_v40 }
 0x5c1   : > { %v6503_v50 = vpop.eup %6502  ;;  %v3383_v11 = vadd.f32 %v8132_v17, %v3281_v39 }
 0x5c2   : > { %v6505_v7 = vpop.eup %6504  ;;  %v3153_v35 = vpop.xlane.xlu0 %3152  ;;  %v3275_v25 = vmul.f32 %v6503_v50, %v7964_v26 }
 0x5c3   : > { %v3135_v20 = vpop.xlane.xlu1 %3134  ;;  %v3279_v54 = vmul.f32 %v6505_v7, %v7970_v62  ;;  %6514 = vrcp.f32 %v3153_v35 }
 0x5c4   : > { %v3380_v28 = vadd.f32 %v8192_v58, %v3275_v25  ;;  %6516 = vrcp.f32 %v3135_v20 }
 0x5c5   : > { %v3382_v8 = vadd.f32 %v8127_v60, %v3279_v54  ;;  %v6507_v57 = vpop.eup %6506 }
 0x5c6   : > { %6041 = vmatprep.mubr.msk.f32.mxu0 %vm2637_vm1, %v3380_v28  ;;  %v3150_v59 = vpop.xlane.xlu0 %3149  ;;  %v6509_v12 = vpop.eup %6508  ;;  %v3297_v15 = vmul.f32 %v6507_v57, %v7974_v38 }
 0x5c7   : > { %6518 = vrcp.f32 %v3150_v59  ;;  %6046 = vmatprep.mubr.msk.f32.mxu1 %vm2637_vm1, %v3382_v8  ;;  %v3132_v26 = vpop.xlane.xlu1 %3131  ;;  %6042 = vmatmul.mubr.msk.f32.gmra.mrb[82].mxu0 %vm2637_vm1, %v3381_v4  ;;  %v3285_v45 = vmul.f32 %v6509_v12, %v7980_v52 }
 0x5c8   : > { %6520 = vrcp.f32 %v3132_v26  ;;  %6047 = vmatmul.mubr.msk.f32.vlgmr.msra.gmra.mrb[84].mxu1 %vm2637_vm1, %v3383_v11  ;;  %v3391_v24 = vadd.f32 %v8132_v17, %v3297_v15  ;;  %v8983_v15 = vld [vmem:[#allocation23_spill] sm:$0xff] }
 0x5c9   : > { %v6511_v62 = vpop.eup %6510  ;;  %v3385_v13 = vadd.f32 %v8153_v56, %v3285_v45 }
 0x5ca   : > { %v6513_v27 = vpop.eup %6512  ;;  %v3159_v1 = vpop.xlane.xlu0 %3158  ;;  %v3295_v55 = vmul.f32 %v6511_v62, %v7984_v49 }
 0x5cb   : > { %v3141_v46 = vpop.xlane.xlu1 %3140  ;;  %v3283_v0 = vmul.f32 %v6513_v27, %v7990_v53  ;;  %6522 = vrcp.f32 %v3159_v1 }
 0x5cc   : > { %v3390_v2 = vadd.f32 %v8127_v60, %v3295_v55  ;;  %6524 = vrcp.f32 %v3141_v46  ;;  %v8984_v55 = vld [vmem:[#allocation21_spill] sm:$0xff] }
 0x5cd   : > { %v3384_v18 = vadd.f32 %v8146_v48, %v3283_v0  ;;  %v6515_v41 = vpop.eup %6514 }
 0x5ce   : > { %6060 = vmatprep.mubr.msk.f32.mxu0 %vm2637_vm1, %v3390_v2  ;;  %v3156_v38 = vpop.xlane.xlu0 %3155  ;;  %v6517_v49 = vpop.eup %6516  ;;  %v3301_v21 = vmul.f32 %v6515_v41, %v7994_v9 }
 0x5cf   : > { %6526 = vrcp.f32 %v3156_v38  ;;  %6049 = vmatprep.mubr.msk.f32.mxu1 %vm2637_vm1, %v3384_v18  ;;  %v3138_v52 = vpop.xlane.xlu1 %3137  ;;  %6061 = vmatmul.mubr.msk.f32.vlgmr.msra.gmra.mrb[84].mxu0 %vm2637_vm1, %v3391_v24  ;;  %v3289_v10 = vmul.f32 %v6517_v49, %v8000_v51 }
 0x5d0   : > { %6528 = vrcp.f32 %v3138_v52  ;;  %6050 = vmatmul.mubr.msk.f32.gmra.mrb[86].mxu1 %vm2637_vm1, %v3385_v13  ;;  %v3393_v33 = vadd.f32 %v8153_v56, %v3301_v21  ;;  %v8985_v13 = vld [vmem:[#allocation28_spill] sm:$0xff] }
 0x5d1   : > { %v6519_v53 = vpop.eup %6518  ;;  %v3387_v40 = vadd.f32 %v8177_v34, %v3289_v10  ;;  %v8986_v10 = vld [vmem:[#allocation20_spill] sm:$0xff] }
 0x5d2   : > { %v6521_v31 = vpop.eup %6520  ;;  %v3165_v3 = vpop.xlane.xlu0 %3164  ;;  %v3299_v29 = vmul.f32 %v6519_v53, %v8004_v44 }
 0x5d3   : > { %v3171_v5 = vpop.xlane.xlu1 %3170  ;;  %v3287_v30 = vmul.f32 %v6521_v31, %v8010_v14  ;;  %6530 = vrcp.f32 %v3165_v3 }
 0x5d4   : > { %v3392_v16 = vadd.f32 %v8146_v48, %v3299_v29 }
 0x5d5   : > { %v3386_v23 = vadd.f32 %v8170_v32, %v3287_v30  ;;  %v6523_v50 = vpop.eup %6522 }
 0x5d6   : > { %6063 = vmatprep.mubr.msk.f32.mxu0 %vm2637_vm1, %v3392_v16  ;;  %v3162_v9 = vpop.xlane.xlu0 %3161  ;;  %v6525_v7 = vpop.eup %6524  ;;  %v3305_v14 = vmul.f32 %v6523_v50, %v8014_v61 }
 0x5d7   : > { %6532 = vrcp.f32 %v3162_v9  ;;  %6052 = vmatprep.mubr.msk.f32.mxu1 %vm2637_vm1, %v3386_v23  ;;  %v3168_v51 = vpop.xlane.xlu1 %3167  ;;  %6064 = vmatmul.mubr.msk.f32.gmra.mrb[86].mxu0 %vm2637_vm1, %v3393_v33  ;;  %v3293_v20 = vmul.f32 %v6525_v7, %v8020_v63  ;;  %v8987_v7 = vld [vmem:[#allocation25_spill] sm:$0xff] }
 0x5d8   : > { %6534 = vrcp.f32 %v3168_v51  ;;  %6053 = vmatmul.mubr.msk.f32.gmra.mrb[88].mxu1 %vm2637_vm1, %v3387_v40  ;;  %v3395_v57 = vadd.f32 %v8177_v34, %v3305_v14 }
 0x5d9   : > { %v6527_v44 = vpop.eup %6526  ;;  %v3389_v61 = vadd.f32 %v8199_v37, %v3293_v20 }
 0x5da   : > { %v6529_v39 = vpop.eup %6528  ;;  %v3195_v35 = vpop.xlane.xlu0 %3194  ;;  %v3303_v25 = vmul.f32 %v6527_v44, %v8024_v19 }
 0x5db   : > { %v3177_v54 = vpop.xlane.xlu1 %3176  ;;  %v3291_v28 = vmul.f32 %v6529_v39, %v8030_v22  ;;  %v8982_v22 = vld [vmem:[#allocation22_spill] sm:$0xff] }
 0x5dc   : > { %v3394_v8 = vadd.f32 %v8170_v32, %v3303_v25  ;;  %v8988_v25 = vld [vmem:[#allocation24_spill] sm:$0xff] }
 0x5dd   : > { %v3388_v4 = vadd.f32 %v8192_v58, %v3291_v28  ;;  %v6531_v11 = vpop.eup %6530 }
 0x5de   : > { %6066 = vmatprep.mubr.msk.f32.mxu0 %vm2637_vm1, %v3394_v8  ;;  %v3192_v59 = vpop.xlane.xlu0 %3191  ;;  %v3309_v12 = vmul.f32 %v6531_v11, %v8982_v22 }
 0x5df   : > { %6536 = vrcp.f32 %v3192_v59  ;;  %6055 = vmatprep.mubr.msk.f32.mxu1 %vm2637_vm1, %v3388_v4  ;;  %v3174_v19 = vpop.xlane.xlu1 %3173  ;;  %6067 = vmatmul.mubr.msk.f32.gmra.mrb[88].mxu0 %vm2637_vm1, %v3395_v57 }
 0x5e0   : > { %6056 = vmatmul.mubr.msk.f32.gmra.mrb[90].mxu1 %vm2637_vm1, %v3389_v61  ;;  %6538 = vrcp.f32 %v3171_v5  ;;  %v3397_v2 = vadd.f32 %v8199_v37, %v3309_v12 }
 0x5e1   : > { %v6533_v63 = vpop.eup %6532  ;;  %6540 = vrcp.f32 %v3174_v19 }
 0x5e2   : > { %v6535_v26 = vpop.eup %6534  ;;  %v3201_v62 = vpop.xlane.xlu0 %3200  ;;  %v3307_v27 = vmul.f32 %v6533_v63, %v8983_v15  ;;  %6542 = vrcp.f32 %v3177_v54  ;;  %v8989_v63 = vld [vmem:[#allocation26_spill] sm:$0xff]  ;;  %v8991_v15 = vld [vmem:[#allocation32_spill] sm:$0xff] }
 0x5e3   : > { %v3183_v1 = vpop.xlane.xlu1 %3182  ;;  %v3311_v45 = vmul.f32 %v6535_v26, %v8984_v55  ;;  %v8990_v26 = vld [vmem:[#allocation27_spill] sm:$0xff] }
 0x5e4   : > { %v3396_v46 = vadd.f32 %v8192_v58, %v3307_v27 }
 0x5e5   : > { %v3398_v0 = vadd.f32 %v8127_v60, %v3311_v45 }
 0x5e6   : > { %6069 = vmatprep.mubr.msk.f32.mxu0 %vm2637_vm1, %v3396_v46  ;;  %v3198_v24 = vpop.xlane.xlu0 %3197 }
 0x5e7   : > { %6074 = vmatprep.mubr.msk.f32.mxu1 %vm2637_vm1, %v3398_v0  ;;  %v3180_v18 = vpop.xlane.xlu1 %3179  ;;  %6070 = vmatmul.mubr.msk.f32.gmra.mrb[90].mxu0 %vm2637_vm1, %v3397_v2  ;;  %v8993_v2 = vld [vmem:[#allocation33_spill] sm:$0xff] }
 0x5e8   : > { %6544 = vrcp.f32 %v3180_v18 }
 0x5e9   : > { %v6537_v41 = vpop.eup %6536  ;;  %6546 = vrcp.f32 %v3195_v35 }
 0x5ea   : > { %6548 = vrcp.f32 %v3183_v1  ;;  %v3207_v38 = vpop.xlane.xlu0 %3206  ;;  %v3327_v49 = vmul.f32 %v6537_v41, %v8985_v13  ;;  %v6539_v21 = vpop.eup %6538  ;;  %v8992_v1 = vld [vmem:[#allocation30_spill] sm:$0xff]  ;;  %v8994_v41 = vld [vmem:[#allocation29_spill] sm:$0xff] }
 0x5eb   : > { %6550 = vrcp.f32 %v3198_v24  ;;  %v3189_v52 = vpop.xlane.xlu1 %3188  ;;  %v6541_v31 = vpop.eup %6540  ;;  %v3313_v5 = vmul.f32 %v6539_v21, %v8986_v10 }
 0x5ec   : > { %v3406_v53 = vadd.f32 %v8127_v60, %v3327_v49  ;;  %6552 = vrcp.f32 %v3201_v62  ;;  %v6543_v30 = vpop.eup %6542  ;;  %v3315_v16 = vmul.f32 %v6541_v31, %v8070_v42  ;;  %v8364_v49 = vld [vmem:[%s8853_s7 + $0x8] sm:$0xff] }
 0x5ed   : > { %6554 = vrcp.f32 %v3189_v52  ;;  %v3399_v40 = vadd.f32 %v8132_v17, %v3313_v5  ;;  %v3317_v51 = vmul.f32 %v6543_v30, %v8987_v7  ;;  %v8378_v30 = vld [vmem:[%s8853_s7 + $0x10] sm:$0xff] }
 0x5ee   : > { %6088 = vmatprep.mubr.msk.f32.mxu0 %vm2637_vm1, %v3406_v53  ;;  %v3204_v3 = vpop.xlane.xlu0 %3203  ;;  %v3400_v14 = vadd.f32 %v8146_v48, %v3315_v16 }
 0x5ef   : > { %6556 = vrcp.f32 %v3204_v3  ;;  %v3186_v29 = vpop.xlane.xlu1 %3185  ;;  %v3401_v28 = vadd.f32 %v8153_v56, %v3317_v51 }
 0x5f0   : > { %6558 = vrcp.f32 %v3186_v29 }
 0x5f1   : > { %6560 = vrcp.f32 %v3207_v38 }
 0x5f2   : > { %v6545_v23 = vpop.eup %6544  ;;  %v3213_v33 = vpop.xlane.xlu0 %3212 }
 0x5f3   : > { %v6547_v50 = vpop.eup %6546  ;;  %v4207_v60 = vpop.permute.xlu1 %4206  ;;  %v3319_v39 = vmul.f32 %v6545_v23, %v8089_v47  ;;  %6562 = vrcp.f32 %v3213_v33  ;;  %v8384_v33 = vld [vmem:[%s8853_s7 + $0x18] sm:$0xff] }
 0x5f4   : > { %v6549_v9 = vpop.eup %6548  ;;  %6072 = vmatprep.subr.mxu1 %v4207_v60  ;;  %v3329_v20 = vmul.f32 %v6547_v50, %v8988_v25 }
 0x5f5   : > { %v6551_v44 = vpop.eup %6550  ;;  %6073 = vmatpush3.msra.mxu1 %v4207_v60  ;;  %v3321_v8 = vmul.f32 %v6549_v9, %v8080_v43  ;;  %v3402_v47 = vadd.f32 %v8170_v32, %v3319_v39  ;;  %v8391_v39 = vld [vmem:[%s8853_s7 + $0x20] sm:$0xff] }
 0x5f6   : > { %6075 = vmatmul.mubr.msk.f32.vlgmr.msra.gmra.mrb[92].mxu1 %vm2637_vm1, %v3399_v40  ;;  %v3210_v42 = vpop.xlane.xlu0 %3209  ;;  %v6553_v35 = vpop.eup %6552  ;;  %v3331_v4 = vmul.f32 %v6551_v44, %v8084_v6  ;;  %v3407_v61 = vadd.f32 %v8132_v17, %v3329_v20  ;;  %v8398_v20 = vld [vmem:[%s8853_s7 + $0x28] sm:$0xff] }
 0x5f7   : > { %6564 = vrcp.f32 %v3210_v42  ;;  %6077 = vmatprep.mubr.msk.f32.mxu1 %vm2637_vm1, %v3400_v14  ;;  %v6555_v54 = vpop.eup %6554  ;;  %v3333_v22 = vmul.f32 %v6553_v35, %v8989_v63  ;;  %v3403_v6 = vadd.f32 %v8177_v34, %v3321_v8 }
 0x5f8   : > { %v3408_v43 = vadd.f32 %v8146_v48, %v3331_v4  ;;  %v3325_v62 = vmul.f32 %v6555_v54, %v8990_v26 }
 0x5f9   : > { %v6557_v57 = vpop.eup %6556 }
 0x5fa   : > { %v6559_v11 = vpop.eup %6558  ;;  %6078 = vmatmul.mubr.msk.f32.gmra.mrb[94].mxu1 %vm2637_vm1, %v3401_v28  ;;  %v4339_v59 = vpop.permute.xlu0 %4338  ;;  %v3335_v27 = vmul.f32 %v6557_v57, %v8991_v15  ;;  %v3405_v48 = vadd.f32 %v8199_v37, %v3325_v62 }
 0x5fb   : > { %6080 = vmatprep.mubr.msk.f32.mxu1 %vm2637_vm1, %v3402_v47  ;;  %6086 = vmatprep.subr.mxu0 %v4339_v59  ;;  %v3323_v19 = vmul.f32 %v6559_v11, %v8105_v36  ;;  %v6561_v12 = vpop.eup %6560  ;;  %v3409_v36 = vadd.f32 %v8153_v56, %v3333_v22 }
 0x5fc   : > { %6087 = vmatpush3.msra.mxu0 %v4339_v59  ;;  %v3337_v55 = vmul.f32 %v6561_v12, %v8992_v1  ;;  %v3410_v46 = vadd.f32 %v8170_v32, %v3335_v27 }
 0x5fd   : > { %6089 = vmatmul.mubr.msk.f32.vlgmr.msra.gmra.mrb[92].mxu0 %vm2637_vm1, %v3407_v61  ;;  %v3404_v17 = vadd.f32 %v8192_v58, %v3323_v19  ;;  %v6563_v45 = vpop.eup %6562  ;;  %v8405_v19 = vld [vmem:[%s8853_s7 + $0x30] sm:$0xff] }
 0x5fe   : > { %6081 = vmatmul.mubr.msk.f32.gmra.mrb[96].mxu1 %vm2637_vm1, %v3403_v6  ;;  %6091 = vmatprep.mubr.msk.f32.mxu0 %vm2637_vm1, %v3408_v43  ;;  %v3411_v18 = vadd.f32 %v8177_v34, %v3337_v55  ;;  %v3341_v56 = vmul.f32 %v6563_v45, %v8994_v41  ;;  %v8412_v6 = vld [vmem:[%s8853_s7 + $0x38] sm:$0xff] }
 0x5ff   : > { %6083 = vmatprep.mubr.msk.f32.mxu1 %vm2637_vm1, %v3404_v17 }
 0x600   : > { %v3413_v32 = vadd.f32 %v8199_v37, %v3341_v56 }
 0x601   : > { %v6565_v0 = vpop.eup %6564  ;;  %6092 = vmatmul.mubr.msk.f32.gmra.mrb[94].mxu0 %vm2637_vm1, %v3409_v36 }
 0x602   : > { %6084 = vmatmul.mubr.msk.f32.gmra.mrb[98].mxu1 %vm2637_vm1, %v3405_v48  ;;  %6094 = vmatprep.mubr.msk.f32.mxu0 %vm2637_vm1, %v3410_v46  ;;  %v3339_v24 = vmul.f32 %v6565_v0, %v8993_v2 }
 0x604   : > { %v3412_v38 = vadd.f32 %v8192_v58, %v3339_v24  ;;  %v8370_v58 = vld [vmem:[%s8853_s7] sm:$0xff] }
 0x605   : > { %6095 = vmatmul.mubr.msk.f32.gmra.mrb[96].mxu0 %vm2637_vm1, %v3411_v18 }
 0x606   : > { %6097 = vmatprep.mubr.msk.f32.mxu0 %vm2637_vm1, %v3412_v38 }
 0x609   : > { %6098 = vmatmul.mubr.msk.f32.gmra.mrb[98].mxu0 %vm2637_vm1, %v3413_v32 }
 0x65a   : > { %v5992_v13 = vpop.f32.mrb[68].mxu1 }
 0x65b   : > { %v4471_v34 = vmul.f32 %v8364_v49, %v5992_v13  ;;  %v3507_v52 = vpop.f32.mrb[69].mxu1 }
 0x65c   : > { %v4470_v53 = vmul.f32 %v8370_v58, %v3507_v52 }
 0x65e   : > { %v4534_v21 = vadd.f32 %v4471_v34, %v4470_v53 }
 0x662   : > { %v6006_v37 = vpop.f32.mrb[68].mxu0 }
 0x663   : > { %v4479_v31 = vmul.f32 %v8364_v49, %v6006_v37  ;;  %v5995_v3 = vpop.f32.mrb[70].mxu1  ;;  %v3639_v29 = vpop.f32.mrb[69].mxu0 }
 0x664   : > { %v4478_v10 = vmul.f32 %v8370_v58, %v3639_v29  ;;  %v3517_v5 = vpop.f32.mrb[71].mxu1  ;;  %v4473_v50 = vmul.f32 %v8384_v33, %v5995_v3 }
 0x665   : > { %v4472_v16 = vmul.f32 %v8378_v30, %v3517_v5 }
 0x666   : > { %v4535_v23 = vadd.f32 %v4479_v31, %v4478_v10 }
 0x667   : > { %v4542_v60 = vadd.f32 %v4534_v21, %v4472_v16 }
 0x669   : > { %v4550_v9 = vadd.f32 %v4542_v60, %v4473_v50 }
 0x66a   : > { %v6009_v40 = vpop.f32.mrb[70].mxu0 }
 0x66b   : > { %v5998_v7 = vpop.f32.mrb[72].mxu1  ;;  %v3649_v51 = vpop.f32.mrb[71].mxu0  ;;  %v4481_v35 = vmul.f32 %v8384_v33, %v6009_v40 }
 0x66c   : > { %v4480_v44 = vmul.f32 %v8378_v30, %v3649_v51  ;;  %v3527_v14 = vpop.f32.mrb[73].mxu1  ;;  %v4475_v54 = vmul.f32 %v8398_v20, %v5998_v7 }
 0x66d   : > { %v4474_v42 = vmul.f32 %v8391_v39, %v3527_v14 }
 0x66e   : > { %v4543_v25 = vadd.f32 %v4535_v23, %v4480_v44 }
 0x66f   : > { %v4558_v28 = vadd.f32 %v4550_v9, %v4474_v42 }
 0x670   : > { %v4551_v8 = vadd.f32 %v4543_v25, %v4481_v35 }
 0x671   : > { %v4566_v4 = vadd.f32 %v4558_v28, %v4475_v54 }
 0x672   : > { %v6012_v57 = vpop.f32.mrb[72].mxu0 }
 0x673   : > { %v6001_v47 = vpop.f32.mrb[74].mxu1  ;;  %v3659_v11 = vpop.f32.mrb[73].mxu0  ;;  %v4483_v22 = vmul.f32 %v8398_v20, %v6012_v57 }
 0x674   : > { %v4482_v59 = vmul.f32 %v8391_v39, %v3659_v11  ;;  %v3537_v61 = vpop.f32.mrb[75].mxu1  ;;  %v4477_v43 = vmul.f32 %v8412_v6, %v6001_v47 }
 0x675   : > { %v4476_v63 = vmul.f32 %v8405_v19, %v3537_v61 }
 0x676   : > { %v4559_v12 = vadd.f32 %v4551_v8, %v4482_v59 }
 0x677   : > { %v4574_v26 = vadd.f32 %v4566_v4, %v4476_v63 }
 0x678   : > { %v4567_v62 = vadd.f32 %v4559_v12, %v4483_v22 }
 0x679   : > { %v8415_v15 = vadd.f32 %v4574_v26, %v4477_v43 }
 0x67a   : > { %v6015_v27 = vpop.f32.mrb[74].mxu0 }
 0x67b   : > { %v3669_v17 = vpop.f32.mrb[75].mxu0  ;;  %v6020_v36 = vpop.f32.mrb[76].mxu1  ;;  %v4592_v1 = vsel %vm491_vm0, %v8415_v15, 0.0  ;;  %v4485_v0 = vmul.f32 %v8412_v6, %v6015_v27 }
 0x67c   : > { %v4484_v55 = vmul.f32 %v8405_v19, %v3669_v17  ;;  %v4487_v45 = vmul.f32 %v8364_v49, %v6020_v36  ;;  %4593 = vadd.xlane.f32.xlu1 %v4592_v1  ;;  %v3771_v48 = vpop.f32.mrb[77].mxu1 }
 0x67d   : > { %v4486_v46 = vmul.f32 %v8370_v58, %v3771_v48 }
 0x67e   : > { %v4575_v2 = vadd.f32 %v4567_v62, %v4484_v55 }
 0x67f   : > { %v4536_v24 = vadd.f32 %v4487_v45, %v4486_v46 }
 0x680   : > { %v8423_v18 = vadd.f32 %v4575_v2, %v4485_v0 }
 0x682   : > { %v6034_v41 = vpop.f32.mrb[76].mxu0  ;;  %v4595_v56 = vsel %vm491_vm0, %v8423_v18, 0.0 }
 0x683   : > { %v4495_v38 = vmul.f32 %v8364_v49, %v6034_v41  ;;  %v6023_v32 = vpop.f32.mrb[78].mxu1  ;;  %4596 = vadd.xlane.f32.xlu0 %v4595_v56  ;;  %v3903_v13 = vpop.f32.mrb[77].mxu0 }
 0x684   : > { %v4494_v34 = vmul.f32 %v8370_v58, %v3903_v13  ;;  %v3781_v52 = vpop.f32.mrb[79].mxu1  ;;  %v4489_v37 = vmul.f32 %v8384_v33, %v6023_v32 }
 0x685   : > { %v4488_v53 = vmul.f32 %v8378_v30, %v3781_v52 }
 0x686   : > { %v4537_v21 = vadd.f32 %v4495_v38, %v4494_v34 }
 0x687   : > { %v4544_v31 = vadd.f32 %v4536_v24, %v4488_v53 }
 0x689   : > { %v4552_v3 = vadd.f32 %v4544_v31, %v4489_v37 }
 0x68a   : > { %v6037_v29 = vpop.f32.mrb[78].mxu0 }
 0x68b   : > { %v6026_v10 = vpop.f32.mrb[80].mxu1  ;;  %v3913_v5 = vpop.f32.mrb[79].mxu0  ;;  %v4497_v60 = vmul.f32 %v8384_v33, %v6037_v29 }
 0x68c   : > { %v4496_v16 = vmul.f32 %v8378_v30, %v3913_v5  ;;  %v3791_v23 = vpop.f32.mrb[81].mxu1  ;;  %v4491_v40 = vmul.f32 %v8398_v20, %v6026_v10 }
 0x68d   : > { %v4490_v50 = vmul.f32 %v8391_v39, %v3791_v23 }
 0x68e   : > { %v4545_v9 = vadd.f32 %v4537_v21, %v4496_v16 }
 0x68f   : > { %v4560_v7 = vadd.f32 %v4552_v3, %v4490_v50 }
 0x690   : > { %v4553_v51 = vadd.f32 %v4545_v9, %v4497_v60 }
 0x691   : > { %v4568_v44 = vadd.f32 %v4560_v7, %v4491_v40 }
 0x692   : > { %v6040_v14 = vpop.f32.mrb[80].mxu0 }
 0x693   : > { %v6029_v42 = vpop.f32.mrb[82].mxu1  ;;  %v3923_v35 = vpop.f32.mrb[81].mxu0  ;;  %v4499_v8 = vmul.f32 %v8398_v20, %v6040_v14 }
 0x694   : > { %v4498_v25 = vmul.f32 %v8391_v39, %v3923_v35  ;;  %v3801_v54 = vpop.f32.mrb[83].mxu1  ;;  %v4493_v57 = vmul.f32 %v8412_v6, %v6029_v42 }
 0x695   : > { %v4492_v28 = vmul.f32 %v8405_v19, %v3801_v54 }
 0x696   : > { %v4561_v4 = vadd.f32 %v4553_v51, %v4498_v25 }
 0x697   : > { %v4576_v47 = vadd.f32 %v4568_v44, %v4492_v28 }
 0x698   : > { %v4569_v11 = vadd.f32 %v4561_v4, %v4499_v8 }
 0x699   : > { %v8439_v59 = vadd.f32 %v4576_v47, %v4493_v57 }
 0x69a   : > { %v6043_v61 = vpop.f32.mrb[82].mxu0 }
 0x69b   : > { %v3933_v63 = vpop.f32.mrb[83].mxu0  ;;  %v6048_v22 = vpop.f32.mrb[84].mxu1  ;;  %v4598_v12 = vsel %vm491_vm0, %v8439_v59, 0.0  ;;  %v4501_v17 = vmul.f32 %v8412_v6, %v6043_v61 }
 0x69c   : > { %v4500_v43 = vmul.f32 %v8405_v19, %v3933_v63  ;;  %v4503_v26 = vmul.f32 %v8364_v49, %v6048_v22  ;;  %4599 = vadd.xlane.f32.xlu1 %v4598_v12  ;;  %v4035_v62 = vpop.f32.mrb[85].mxu1 }
 0x69d   : > { %v4502_v27 = vmul.f32 %v8370_v58, %v4035_v62 }
 0x69e   : > { %v4577_v36 = vadd.f32 %v4569_v11, %v4500_v43 }
 0x69f   : > { %v4538_v1 = vadd.f32 %v4503_v26, %v4502_v27 }
 0x6a0   : > { %v8447_v55 = vadd.f32 %v4577_v36, %v4501_v17 }
 0x6a2   : > { %v6062_v45 = vpop.f32.mrb[84].mxu0  ;;  %v4601_v48 = vsel %vm491_vm0, %v8447_v55, 0.0 }
 0x6a3   : > { %v4511_v46 = vmul.f32 %v8364_v49, %v6062_v45  ;;  %v6051_v0 = vpop.f32.mrb[86].mxu1  ;;  %4602 = vadd.xlane.f32.xlu0 %v4601_v48  ;;  %v4167_v2 = vpop.f32.mrb[85].mxu0 }
 0x6a4   : > { %v4510_v24 = vmul.f32 %v8370_v58, %v4167_v2  ;;  %v4045_v41 = vpop.f32.mrb[87].mxu1  ;;  %v4505_v32 = vmul.f32 %v8384_v33, %v6051_v0 }
 0x6a5   : > { %v4504_v56 = vmul.f32 %v8378_v30, %v4045_v41 }
 0x6a6   : > { %v4539_v38 = vadd.f32 %v4511_v46, %v4510_v24 }
 0x6a7   : > { %v4546_v13 = vadd.f32 %v4538_v1, %v4504_v56 }
 0x6a9   : > { %v4554_v34 = vadd.f32 %v4546_v13, %v4505_v32 }
 0x6aa   : > { %v6065_v52 = vpop.f32.mrb[86].mxu0 }
 0x6ab   : > { %v6054_v53 = vpop.f32.mrb[88].mxu1  ;;  %v4177_v21 = vpop.f32.mrb[87].mxu0  ;;  %v4513_v29 = vmul.f32 %v8384_v33, %v6065_v52 }
 0x6ac   : > { %v4512_v37 = vmul.f32 %v8378_v30, %v4177_v21  ;;  %v4055_v31 = vpop.f32.mrb[89].mxu1  ;;  %v4507_v5 = vmul.f32 %v8398_v20, %v6054_v53 }
 0x6ad   : > { %v4506_v3 = vmul.f32 %v8391_v39, %v4055_v31 }
 0x6ae   : > { %v4547_v10 = vadd.f32 %v4539_v38, %v4512_v37 }
 0x6af   : > { %v4562_v16 = vadd.f32 %v4554_v34, %v4506_v3 }
 0x6b0   : > { %v4555_v23 = vadd.f32 %v4547_v10, %v4513_v29 }
 0x6b1   : > { %v4570_v50 = vadd.f32 %v4562_v16, %v4507_v5 }
 0x6b2   : > { %v6068_v60 = vpop.f32.mrb[88].mxu0 }
 0x6b3   : > { %v6057_v9 = vpop.f32.mrb[90].mxu1  ;;  %v4187_v40 = vpop.f32.mrb[89].mxu0  ;;  %v4515_v14 = vmul.f32 %v8398_v20, %v6068_v60 }
 0x6b4   : > { %v4514_v7 = vmul.f32 %v8391_v39, %v4187_v40  ;;  %v4065_v51 = vpop.f32.mrb[91].mxu1  ;;  %v4509_v35 = vmul.f32 %v8412_v6, %v6057_v9 }
 0x6b5   : > { %v4508_v44 = vmul.f32 %v8405_v19, %v4065_v51 }
 0x6b6   : > { %v4563_v42 = vadd.f32 %v4555_v23, %v4514_v7 }
 0x6b7   : > { %v4578_v25 = vadd.f32 %v4570_v50, %v4508_v44 }
 0x6b8   : > { %v4571_v54 = vadd.f32 %v4563_v42, %v4515_v14 }
 0x6b9   : > { %v8463_v28 = vadd.f32 %v4578_v25, %v4509_v35 }
 0x6ba   : > { %v6071_v8 = vpop.f32.mrb[90].mxu0 }
 0x6bb   : > { %v4197_v4 = vpop.f32.mrb[91].mxu0  ;;  %v4604_v57 = vsel %vm491_vm0, %v8463_v28, 0.0  ;;  %v4517_v11 = vmul.f32 %v8412_v6, %v6071_v8 }
 0x6bc   : > { %v4516_v47 = vmul.f32 %v8405_v19, %v4197_v4  ;;  %4605 = vadd.xlane.f32.xlu1 %v4604_v57 }
 0x6be   : > { %v4579_v61 = vadd.f32 %v4571_v54, %v4516_v47 }
 0x6c0   : > { %v8469_v63 = vadd.f32 %v4579_v61, %v4517_v11 }
 0x6c2   : > { %v4607_v22 = vsel %vm491_vm0, %v8469_v63, 0.0 }
 0x6c3   : > { %4608 = vadd.xlane.f32.xlu0 %v4607_v22 }
 0x6c9   : > { %v6076_v12 = vpop.f32.mrb[92].mxu1 }
 0x6ca   : > { %v4519_v43 = vmul.f32 %v8364_v49, %v6076_v12  ;;  %v4299_v26 = vpop.f32.mrb[93].mxu1 }
 0x6cb   : > { %v4518_v62 = vmul.f32 %v8370_v58, %v4299_v26 }
 0x6cd   : > { %v4540_v27 = vadd.f32 %v4519_v43, %v4518_v62  ;;  %v6079_v17 = vpop.f32.mrb[94].mxu1 }
 0x6ce   : > { %v4309_v36 = vpop.f32.mrb[95].mxu1  ;;  %v4521_v48 = vmul.f32 %v8384_v33, %v6079_v17 }
 0x6cf   : > { %v4520_v1 = vmul.f32 %v8378_v30, %v4309_v36 }
 0x6d0   : > { %v6090_v45 = vpop.f32.mrb[92].mxu0 }
 0x6d1   : > { %v4548_v46 = vadd.f32 %v4540_v27, %v4520_v1  ;;  %v4527_v0 = vmul.f32 %v8364_v49, %v6090_v45  ;;  %v6082_v2 = vpop.f32.mrb[96].mxu1  ;;  %v4431_v24 = vpop.f32.mrb[93].mxu0 }
 0x6d2   : > { %v4526_v41 = vmul.f32 %v8370_v58, %v4431_v24  ;;  %v4319_v56 = vpop.f32.mrb[97].mxu1  ;;  %v4523_v52 = vmul.f32 %v8398_v20, %v6082_v2 }
 0x6d3   : > { %v4522_v38 = vmul.f32 %v8391_v39, %v4319_v56  ;;  %v4556_v32 = vadd.f32 %v4548_v46, %v4521_v48 }
 0x6d4   : > { %v4541_v13 = vadd.f32 %v4527_v0, %v4526_v41  ;;  %v6093_v34 = vpop.f32.mrb[94].mxu0 }
 0x6d5   : > { %v4564_v53 = vadd.f32 %v4556_v32, %v4522_v38  ;;  %v6085_v21 = vpop.f32.mrb[98].mxu1  ;;  %v4441_v37 = vpop.f32.mrb[95].mxu0  ;;  %v4529_v10 = vmul.f32 %v8384_v33, %v6093_v34 }
 0x6d6   : > { %v4528_v31 = vmul.f32 %v8378_v30, %v4441_v37  ;;  %v4329_v3 = vpop.f32.mrb[99].mxu1  ;;  %v4525_v16 = vmul.f32 %v8412_v6, %v6085_v21 }
 0x6d7   : > { %v4524_v49 = vmul.f32 %v8405_v19, %v4329_v3  ;;  %v4572_v29 = vadd.f32 %v4564_v53, %v4523_v52 }
 0x6d8   : > { %v4549_v58 = vadd.f32 %v4541_v13, %v4528_v31  ;;  %v6096_v5 = vpop.f32.mrb[96].mxu0 }
 0x6d9   : > { %v4580_v23 = vadd.f32 %v4572_v29, %v4524_v49  ;;  %v4451_v50 = vpop.f32.mrb[97].mxu0  ;;  %v4531_v7 = vmul.f32 %v8398_v20, %v6096_v5 }
 0x6da   : > { %v4530_v60 = vmul.f32 %v8391_v39, %v4451_v50  ;;  %v4557_v9 = vadd.f32 %v4549_v58, %v4529_v10  ;;  %v8537_v50 = vld [vmem:[%s8850_s4 + $0x3] ss:$0 sm:$0xff] }
 0x6db   : > { %v4588_v40 = vadd.f32 %v4580_v23, %v4525_v16  ;;  %v8532_v16 = vld [vmem:[%s8850_s4 + $0x2] ss:$0 sm:$0xff] }
 0x6dc   : > { %v4565_v51 = vadd.f32 %v4557_v9, %v4530_v60  ;;  %v6099_v30 = vpop.f32.mrb[98].mxu0 }
 0x6dd   : > { %v4461_v44 = vpop.f32.mrb[99].mxu0  ;;  %v4610_v14 = vsel %vm491_vm0, %v4588_v40, 0.0  ;;  %v4533_v35 = vmul.f32 %v8412_v6, %v6099_v30 }
 0x6de   : > { %v4532_v42 = vmul.f32 %v8405_v19, %v4461_v44  ;;  %v4573_v33 = vadd.f32 %v4565_v51, %v4531_v7  ;;  %4611 = vadd.xlane.f32.xlu1 %v4610_v14  ;;  %v8995_v7 = vld [vmem:[#allocation10_spill] sm:$0xff] }
 0x6e0   : > { %v4581_v25 = vadd.f32 %v4573_v33, %v4532_v42  ;;  %v8996_v33 = vld [vmem:[#allocation8_spill] sm:$0xff] }
 0x6e2   : > { %v4589_v54 = vadd.f32 %v4581_v25, %v4533_v35 }
 0x6e4   : > { %v4613_v8 = vsel %vm491_vm0, %v4589_v54, 0.0 }
 0x6e5   : > { %4614 = vadd.xlane.f32.xlu0 %v4613_v8 }
 0x709   : > { %v4594_v39 = vpop.xlane.xlu1 %4593 }
 0x70a   : > { %v4617_v4 = vmul.f32 0.03125, %v4594_v39 }
 0x70c   : > { %v4625_v20 = vsub.f32 %v8415_v15, %v4617_v4 }
 0x70e   : > { %v4633_v57 = vmul.f32 %v4625_v20, %v4625_v20 }
 0x710   : > { %v4597_v47 = vpop.xlane.xlu0 %4596  ;;  %v4641_v11 = vsel %vm491_vm0, %v4633_v57, 0.0 }
 0x711   : > { %v4618_v61 = vmul.f32 0.03125, %v4597_v47  ;;  %4642 = vadd.xlane.f32.xlu1 %v4641_v11 }
 0x713   : > { %v4626_v19 = vsub.f32 %v8423_v18, %v4618_v61 }
 0x715   : > { %v4634_v22 = vmul.f32 %v4626_v19, %v4626_v19 }
 0x717   : > { %v4644_v6 = vsel %vm491_vm0, %v4634_v22, 0.0 }
 0x718   : > { %4645 = vadd.xlane.f32.xlu0 %v4644_v6  ;;  %v8997_v6 = vld [vmem:[#allocation11_spill] sm:$0xff] }
 0x729   : > { %v4600_v12 = vpop.xlane.xlu1 %4599 }
 0x72a   : > { %v4619_v43 = vmul.f32 0.03125, %v4600_v12 }
 0x72c   : > { %v8496_v26 = vsub.f32 %v8439_v59, %v4619_v43 }
 0x72e   : > { %v4635_v15 = vmul.f32 %v8496_v26, %v8496_v26 }
 0x730   : > { %v4603_v62 = vpop.xlane.xlu0 %4602  ;;  %v4647_v27 = vsel %vm491_vm0, %v4635_v15, 0.0 }
 0x731   : > { %v4620_v17 = vmul.f32 0.03125, %v4603_v62  ;;  %4648 = vadd.xlane.f32.xlu1 %v4647_v27 }
 0x733   : > { %v8502_v36 = vsub.f32 %v8447_v55, %v4620_v17  ;;  %v8998_v17 = vld [vmem:[#allocation9_spill] sm:$0xff] }
 0x735   : > { %v4636_v18 = vmul.f32 %v8502_v36, %v8502_v36 }
 0x737   : > { %v4650_v1 = vsel %vm491_vm0, %v4636_v18, 0.0 }
 0x738   : > { %4651 = vadd.xlane.f32.xlu0 %v4650_v1 }
 0x749   : > { %v4606_v45 = vpop.xlane.xlu1 %4605 }
 0x74a   : > { %v4621_v59 = vmul.f32 0.03125, %v4606_v45 }
 0x74c   : > { %v8508_v48 = vsub.f32 %v8463_v28, %v4621_v59 }
 0x74e   : > { %v4637_v46 = vmul.f32 %v8508_v48, %v8508_v48 }
 0x750   : > { %v4609_v0 = vpop.xlane.xlu0 %4608  ;;  %v4653_v2 = vsel %vm491_vm0, %v4637_v46, 0.0 }
 0x751   : > { %v4622_v24 = vmul.f32 0.03125, %v4609_v0  ;;  %4654 = vadd.xlane.f32.xlu1 %v4653_v2 }
 0x753   : > { %v8514_v55 = vsub.f32 %v8469_v63, %v4622_v24 }
 0x755   : > { %v4638_v41 = vmul.f32 %v8514_v55, %v8514_v55 }
 0x757   : > { %v4656_v56 = vsel %vm491_vm0, %v4638_v41, 0.0 }
 0x758   : > { %4657 = vadd.xlane.f32.xlu0 %v4656_v56 }
 0x76b   : > { %v4612_v38 = vpop.xlane.xlu1 %4611 }
 0x76c   : > { %v4623_v28 = vmul.f32 0.03125, %v4612_v38 }
 0x76e   : > { %v8519_v32 = vsub.f32 %v4588_v40, %v4623_v28  ;;  %v8999_v28 = vld [vmem:[#allocation12_spill] sm:$0xff] }
 0x770   : > { %v4639_v13 = vmul.f32 %v8519_v32, %v8519_v32 }
 0x772   : > { %v4615_v34 = vpop.xlane.xlu0 %4614  ;;  %v4659_v52 = vsel %vm491_vm0, %v4639_v13, 0.0 }
 0x773   : > { %v4624_v53 = vmul.f32 0.03125, %v4615_v34  ;;  %4660 = vadd.xlane.f32.xlu1 %v4659_v52 }
 0x775   : > { %v8524_v63 = vsub.f32 %v4589_v54, %v4624_v53 }
 0x777   : > { %v4640_v21 = vmul.f32 %v8524_v63, %v8524_v63 }
 0x779   : > { %v4662_v37 = vsel %vm491_vm0, %v4640_v21, 0.0 }
 0x77a   : > { %4663 = vadd.xlane.f32.xlu0 %v4662_v37  ;;  %v9000_v37 = vld [vmem:[#allocation13_spill] sm:$0xff] }
 0x79e   : > { %v4643_v31 = vpop.xlane.xlu1 %4642 }
 0x79f   : > { %v4665_v3 = vmul.f32 0.03125, %v4643_v31 }
 0x7a1   : > { %v4673_v49 = vadd.f32 1e-05, %v4665_v3 }
 0x7a3   : > { %6566 = vrsqrt.f32 %v4673_v49 }
 0x7a5   : > { %v4646_v29 = vpop.xlane.xlu0 %4645 }
 0x7a6   : > { %v4666_v10 = vmul.f32 0.03125, %v4646_v29 }
 0x7a8   : > { %v4674_v58 = vadd.f32 1e-05, %v4666_v10 }
 0x7aa   : > { %6568 = vrsqrt.f32 %v4674_v58 }
 0x7ad   : > { %v6567_v5 = vpop.eup %6566 }
 0x7ae   : > { %v4689_v23 = vmul.f32 %v6567_v5, %v4625_v20 }
 0x7b0   : > { %v4701_v60 = vmul.f32 %v8532_v16, %v4689_v23 }
 0x7b2   : > { %v4713_v9 = vadd.f32 %v8537_v50, %v4701_v60 }
 0x7b4   : > { %v6569_v40 = vpop.eup %6568  ;;  %v8542_v51 = vadd.f32 %v4713_v9, %v8995_v7  ;;  %v9001_v7 = vld [vmem:[#allocation14_spill] sm:$0xff] }
 0x7b5   : > { %v4690_v30 = vmul.f32 %v6569_v40, %v4626_v19 }
 0x7b6   : > { %v4731_v44 = vsel %vm491_vm0, %v8542_v51, 0.0 }
 0x7b7   : > { %4732 = vadd.xlane.f32.xlu1 %v4731_v44  ;;  %v4702_v14 = vmul.f32 %v8532_v16, %v4690_v30 }
 0x7b9   : > { %v4714_v42 = vadd.f32 %v8537_v50, %v4702_v14 }
 0x7bb   : > { %v8549_v35 = vadd.f32 %v4714_v42, %v8996_v33 }
 0x7bd   : > { %v4734_v25 = vsel %vm491_vm0, %v8549_v35, 0.0 }
 0x7be   : > { %v4649_v54 = vpop.xlane.xlu1 %4648  ;;  %4735 = vadd.xlane.f32.xlu0 %v4734_v25  ;;  %v9002_v25 = vld [vmem:[#allocation15_spill] sm:$0xff] }
 0x7bf   : > { %v4667_v8 = vmul.f32 0.03125, %v4649_v54 }
 0x7c1   : > { %v4675_v39 = vadd.f32 1e-05, %v4667_v8 }
 0x7c3   : > { %6570 = vrsqrt.f32 %v4675_v39 }
 0x7c5   : > { %v4652_v4 = vpop.xlane.xlu0 %4651 }
 0x7c6   : > { %v4668_v20 = vmul.f32 0.03125, %v4652_v4 }
 0x7c8   : > { %v4676_v57 = vadd.f32 1e-05, %v4668_v20 }
 0x7ca   : > { %6572 = vrsqrt.f32 %v4676_v57 }
 0x7cd   : > { %v6571_v47 = vpop.eup %6570 }
 0x7ce   : > { %v4691_v11 = vmul.f32 %v6571_v47, %v8496_v26 }
 0x7d0   : > { %v4703_v61 = vmul.f32 %v8532_v16, %v4691_v11 }
 0x7d2   : > { %v4715_v19 = vadd.f32 %v8537_v50, %v4703_v61 }
 0x7d4   : > { %v6573_v22 = vpop.eup %6572  ;;  %v8557_v12 = vadd.f32 %v4715_v19, %v8997_v6 }
 0x7d5   : > { %v4692_v43 = vmul.f32 %v6573_v22, %v8502_v36 }
 0x7d6   : > { %v4737_v15 = vsel %vm491_vm0, %v8557_v12, 0.0 }
 0x7d7   : > { %4738 = vadd.xlane.f32.xlu1 %v4737_v15  ;;  %v4704_v62 = vmul.f32 %v8532_v16, %v4692_v43 }
 0x7d9   : > { %v4716_v27 = vadd.f32 %v8537_v50, %v4704_v62 }
 0x7db   : > { %v8565_v26 = vadd.f32 %v4716_v27, %v8998_v17 }
 0x7dd   : > { %v4740_v18 = vsel %vm491_vm0, %v8565_v26, 0.0 }
 0x7de   : > { %v4655_v1 = vpop.xlane.xlu1 %4654  ;;  %4741 = vadd.xlane.f32.xlu0 %v4740_v18 }
 0x7df   : > { %v4669_v45 = vmul.f32 0.03125, %v4655_v1 }
 0x7e1   : > { %v4677_v59 = vadd.f32 1e-05, %v4669_v45 }
 0x7e3   : > { %6574 = vrsqrt.f32 %v4677_v59 }
 0x7e5   : > { %v4658_v36 = vpop.xlane.xlu0 %4657 }
 0x7e6   : > { %v4670_v46 = vmul.f32 0.03125, %v4658_v36 }
 0x7e8   : > { %v4678_v0 = vadd.f32 1e-05, %v4670_v46 }
 0x7ea   : > { %6576 = vrsqrt.f32 %v4678_v0 }
 0x7ed   : > { %v6575_v2 = vpop.eup %6574 }
 0x7ee   : > { %v4693_v24 = vmul.f32 %v6575_v2, %v8508_v48  ;;  %v6224_v2 = vld [vmem:[%s8855_s9] sm:$0xff]  }
 0x7ef   : > { %6100 = vmatprep.subr.bf16.mxu1 %v6224_v2 }
 0x7f0   : > { %v4705_v41 = vmul.f32 %v8532_v16, %v4693_v24  ;;  %v6225_v24 = vld [vmem:[%s8855_s9 + $0x8] sm:$0xff]   ;;  %6101 = vmatpush3.bf16.msra.mxu1 %v6224_v2 }
 0x7f1   : > { %6102 = vmatprep.subr.bf16.mxu1 %v6225_v24 }
 0x7f2   : > { %v4717_v56 = vadd.f32 %v8537_v50, %v4705_v41 }
 0x7f4   : > { %v6577_v38 = vpop.eup %6576  ;;  %v4725_v13 = vadd.f32 %v4717_v56, %v8999_v28  ;;  %6103 = vmatpush3.bf16.msra.mxu1 %v6225_v24 }
 0x7f5   : > { %v4694_v34 = vmul.f32 %v6577_v38, %v8514_v55 }
 0x7f6   : > { %v4743_v52 = vsel %vm491_vm0, %v4725_v13, 0.0 }
 0x7f7   : > { %4744 = vadd.xlane.f32.xlu1 %v4743_v52  ;;  %v4706_v53 = vmul.f32 %v8532_v16, %v4694_v34 }
 0x7f9   : > { %v4718_v21 = vadd.f32 %v8537_v50, %v4706_v53 }
 0x7fb   : > { %v4726_v31 = vadd.f32 %v4718_v21, %v9000_v37 }
 0x7fd   : > { %v4746_v48 = vsel %vm491_vm0, %v4726_v31, 0.0 }
 0x7fe   : > { %4747 = vadd.xlane.f32.xlu0 %v4746_v48 }
 0x800   : > { %v4661_v3 = vpop.xlane.xlu1 %4660 }
 0x801   : > { %v4671_v49 = vmul.f32 0.03125, %v4661_v3  ;;  %v6226_v3 = vld [vmem:[%s8857_s11] sm:$0xff]  }
 0x802   : > { %6112 = vmatprep.subr.bf16.mxu0 %v6226_v3 }
 0x803   : > { %v4679_v29 = vadd.f32 1e-05, %v4671_v49  ;;  %v6227_v49 = vld [vmem:[%s8857_s11 + $0x8] sm:$0xff]   ;;  %6113 = vmatpush3.bf16.msra.mxu0 %v6226_v3  ;;  %v6228_v3 = vld [vmem:[%s8857_s11 + $0x10] sm:$0xff]  }
 0x804   : > { %6114 = vmatprep.subr.bf16.mxu0 %v6227_v49 }
 0x805   : > { %6578 = vrsqrt.f32 %v4679_v29 }
 0x807   : > { %v4664_v10 = vpop.xlane.xlu0 %4663  ;;  %6115 = vmatpush3.bf16.msra.mxu0 %v6227_v49 }
 0x808   : > { %v4672_v58 = vmul.f32 0.03125, %v4664_v10  ;;  %6116 = vmatprep.subr.bf16.mxu0 %v6228_v3 }
 0x80a   : > { %v4680_v5 = vadd.f32 1e-05, %v4672_v58 }
 0x80b   : > { %6117 = vmatpush3.bf16.msra.mxu0 %v6228_v3 }
 0x80c   : > { %6580 = vrsqrt.f32 %v4680_v5 }
 0x80f   : > { %v6579_v55 = vpop.eup %6578 }
 0x810   : > { %v4695_v23 = vmul.f32 %v6579_v55, %v8519_v32 }
 0x812   : > { %v4707_v60 = vmul.f32 %v8532_v16, %v4695_v23 }
 0x814   : > { %v4719_v9 = vadd.f32 %v8537_v50, %v4707_v60  ;;  %v5596_v60 = vld [vmem:[%s8850_s4 + $0x4] ss:$0 sm:$0xff] }
 0x816   : > { %v6581_v40 = vpop.eup %6580  ;;  %v4727_v30 = vadd.f32 %v4719_v9, %v9001_v7 }
 0x817   : > { %v4696_v44 = vmul.f32 %v6581_v40, %v8524_v63 }
 0x818   : > { %v4749_v14 = vsel %vm491_vm0, %v4727_v30, 0.0 }
 0x819   : > { %4750 = vadd.xlane.f32.xlu1 %v4749_v14  ;;  %v4708_v42 = vmul.f32 %v8532_v16, %v4696_v44 }
 0x81b   : > { %v4720_v33 = vadd.f32 %v8537_v50, %v4708_v42 }
 0x81d   : > { %v4728_v54 = vadd.f32 %v4720_v33, %v9002_v25 }
 0x81f   : > { %v4752_v32 = vsel %vm491_vm0, %v4728_v54, 0.0 }
 0x820   : > { %4753 = vadd.xlane.f32.xlu0 %v4752_v32 }
 0x844   : > { %v4733_v8 = vpop.xlane.xlu1 %4732 }
 0x845   : > { %v4755_v39 = vmul.f32 0.03125, %v4733_v8 }
 0x847   : > { %v8590_v4 = vsub.f32 %v8542_v51, %v4755_v39 }
 0x849   : > { %v4771_v63 = vmul.f32 %v8590_v4, %v8590_v4 }
 0x84b   : > { %v4736_v20 = vpop.xlane.xlu0 %4735  ;;  %v4779_v57 = vsel %vm491_vm0, %v4771_v63, 0.0 }
 0x84c   : > { %v4756_v47 = vmul.f32 0.03125, %v4736_v20  ;;  %4780 = vadd.xlane.f32.xlu1 %v4779_v57 }
 0x84e   : > { %v8596_v16 = vsub.f32 %v8549_v35, %v4756_v47 }
 0x850   : > { %v4772_v50 = vmul.f32 %v8596_v16, %v8596_v16 }
 0x852   : > { %v4782_v11 = vsel %vm491_vm0, %v4772_v50, 0.0 }
 0x853   : > { %4783 = vadd.xlane.f32.xlu0 %v4782_v11 }
 0x864   : > { %v4739_v61 = vpop.xlane.xlu1 %4738 }
 0x865   : > { %v4757_v51 = vmul.f32 0.03125, %v4739_v61 }
 0x867   : > { %v8602_v19 = vsub.f32 %v8557_v12, %v4757_v51 }
 0x869   : > { %v4773_v22 = vmul.f32 %v8602_v19, %v8602_v19 }
 0x86b   : > { %v4742_v6 = vpop.xlane.xlu0 %4741  ;;  %v4785_v43 = vsel %vm491_vm0, %v4773_v22, 0.0 }
 0x86c   : > { %v4758_v15 = vmul.f32 0.03125, %v4742_v6  ;;  %4786 = vadd.xlane.f32.xlu1 %v4785_v43 }
 0x86e   : > { %v8608_v35 = vsub.f32 %v8565_v26, %v4758_v15 }
 0x870   : > { %v4774_v62 = vmul.f32 %v8608_v35, %v8608_v35 }
 0x872   : > { %v4788_v27 = vsel %vm491_vm0, %v4774_v62, 0.0 }
 0x873   : > { %4789 = vadd.xlane.f32.xlu0 %v4788_v27 }
 0x884   : > { %v4745_v17 = vpop.xlane.xlu1 %4744 }
 0x885   : > { %v4759_v12 = vmul.f32 0.03125, %v4745_v17 }
 0x887   : > { %v8613_v18 = vsub.f32 %v4725_v13, %v4759_v12 }
 0x889   : > { %v4775_v1 = vmul.f32 %v8613_v18, %v8613_v18 }
 0x88b   : > { %v4748_v45 = vpop.xlane.xlu0 %4747  ;;  %v4791_v59 = vsel %vm491_vm0, %v4775_v1, 0.0 }
 0x88c   : > { %v4760_v36 = vmul.f32 0.03125, %v4748_v45  ;;  %4792 = vadd.xlane.f32.xlu1 %v4791_v59 }
 0x88e   : > { %v8618_v26 = vsub.f32 %v4726_v31, %v4760_v36 }
 0x890   : > { %v4776_v46 = vmul.f32 %v8618_v26, %v8618_v26 }
 0x892   : > { %v4794_v0 = vsel %vm491_vm0, %v4776_v46, 0.0 }
 0x893   : > { %4795 = vadd.xlane.f32.xlu0 %v4794_v0 }
 0x8a6   : > { %v4751_v41 = vpop.xlane.xlu1 %4750 }
 0x8a7   : > { %v4761_v56 = vmul.f32 0.03125, %v4751_v41 }
 0x8a9   : > { %v8629_v38 = vsub.f32 %v4727_v30, %v4761_v56  ;;  %v5597_v30 = vld [vmem:[%s8850_s4 + $0x5] ss:$0 sm:$0xff] }
 0x8ab   : > { %v4777_v28 = vmul.f32 %v8629_v38, %v8629_v38 }
 0x8ad   : > { %v4754_v13 = vpop.xlane.xlu0 %4753  ;;  %v4797_v34 = vsel %vm491_vm0, %v4777_v28, 0.0 }
 0x8ae   : > { %v4762_v52 = vmul.f32 0.03125, %v4754_v13  ;;  %4798 = vadd.xlane.f32.xlu1 %v4797_v34 }
 0x8b0   : > { %v8634_v53 = vsub.f32 %v4728_v54, %v4762_v52 }
 0x8b2   : > { %v4778_v21 = vmul.f32 %v8634_v53, %v8634_v53 }
 0x8b4   : > { %v4800_v37 = vsel %vm491_vm0, %v4778_v21, 0.0 }
 0x8b5   : > { %4801 = vadd.xlane.f32.xlu0 %v4800_v37 }
 0x8d9   : > { %v4781_v31 = vpop.xlane.xlu1 %4780 }
 0x8da   : > { %v4803_v48 = vmul.f32 0.03125, %v4781_v31 }
 0x8dc   : > { %v4811_v29 = vadd.f32 1e-05, %v4803_v48 }
 0x8de   : > { %6582 = vrsqrt.f32 %v4811_v29 }
 0x8e0   : > { %v4784_v10 = vpop.xlane.xlu0 %4783 }
 0x8e1   : > { %v4804_v58 = vmul.f32 0.03125, %v4784_v10 }
 0x8e3   : > { %v4812_v5 = vadd.f32 1e-05, %v4804_v58 }
 0x8e5   : > { %6584 = vrsqrt.f32 %v4812_v5 }
 0x8e8   : > { %v6583_v55 = vpop.eup %6582 }
 0x8e9   : > { %v4827_v23 = vmul.f32 %v6583_v55, %v8590_v4 }
 0x8eb   : > { %v4839_v7 = vmul.f32 %v5596_v60, %v4827_v23 }
 0x8ed   : > { %v8653_v14 = vadd.f32 %v5597_v30, %v4839_v7 }
 0x8ef   : > { %v6585_v9 = vpop.eup %6584 }
 0x8f0   : > { %v4828_v40 = vmul.f32 %v6585_v9, %v8596_v16 }
 0x8f2   : > { %v4840_v44 = vmul.f32 %v5596_v60, %v4828_v40 }
 0x8f4   : > { %v8655_v42 = vadd.f32 %v5597_v30, %v4840_v44 }
 0x8f6   : > { %v4859_v33 = vpack.c.bf16 %v8655_v42, %v8653_v14 }
 0x8f8   : > { %6104 = vmatprep.mubr.msk.bf16.mxu1 %vm491_vm0, %v4859_v33 }
 0x8f9   : > { %v4787_v25 = vpop.xlane.xlu1 %4786 }
 0x8fa   : > { %v4805_v54 = vmul.f32 0.03125, %v4787_v25 }
 0x8fc   : > { %v4813_v32 = vadd.f32 1e-05, %v4805_v54 }
 0x8fe   : > { %6586 = vrsqrt.f32 %v4813_v32 }
 0x900   : > { %v4790_v8 = vpop.xlane.xlu0 %4789 }
 0x901   : > { %v4806_v39 = vmul.f32 0.03125, %v4790_v8 }
 0x903   : > { %v4814_v4 = vadd.f32 1e-05, %v4806_v39 }
 0x905   : > { %6588 = vrsqrt.f32 %v4814_v4 }
 0x908   : > { %v6587_v63 = vpop.eup %6586 }
 0x909   : > { %v4829_v20 = vmul.f32 %v6587_v63, %v8602_v19 }
 0x90b   : > { %v4841_v47 = vmul.f32 %v5596_v60, %v4829_v20 }
 0x90d   : > { %v8662_v11 = vadd.f32 %v5597_v30, %v4841_v47 }
 0x90f   : > { %v6589_v57 = vpop.eup %6588 }
 0x910   : > { %v4830_v16 = vmul.f32 %v6589_v57, %v8608_v35 }
 0x912   : > { %v4842_v50 = vmul.f32 %v5596_v60, %v4830_v16 }
 0x914   : > { %v8664_v61 = vadd.f32 %v5597_v30, %v4842_v50 }
 0x916   : > { %v4860_v51 = vpack.c.bf16 %v8664_v61, %v8662_v11 }
 0x918   : > { %6105 = vmatmul.mubr.msk.bf16.vlgmr.msra.gmra.mrb[100].mxu1 %vm491_vm0, %v4860_v51 }
 0x919   : > { %v4793_v22 = vpop.xlane.xlu1 %4792 }
 0x91a   : > { %v4807_v6 = vmul.f32 0.03125, %v4793_v22 }
 0x91c   : > { %v4815_v43 = vadd.f32 1e-05, %v4807_v6  ;;  %v5605_v6 = vld [vmem:[%s8850_s4 + $0x6] ss:$0 sm:$0xff] }
 0x91e   : > { %6590 = vrsqrt.f32 %v4815_v43 }
 0x920   : > { %v4796_v15 = vpop.xlane.xlu0 %4795 }
 0x921   : > { %v4808_v19 = vmul.f32 0.03125, %v4796_v15 }
 0x923   : > { %v4816_v62 = vadd.f32 1e-05, %v4808_v19 }
 0x925   : > { %6592 = vrsqrt.f32 %v4816_v62 }
 0x928   : > { %v6591_v27 = vpop.eup %6590 }
 0x929   : > { %v4831_v35 = vmul.f32 %v6591_v27, %v8613_v18 }
 0x92b   : > { %v4843_v1 = vmul.f32 %v5596_v60, %v4831_v35 }
 0x92d   : > { %v8671_v59 = vadd.f32 %v5597_v30, %v4843_v1 }
 0x92f   : > { %v6593_v17 = vpop.eup %6592 }
 0x930   : > { %v4832_v12 = vmul.f32 %v6593_v17, %v8618_v26 }
 0x932   : > { %v4844_v45 = vmul.f32 %v5596_v60, %v4832_v12 }
 0x934   : > { %v8673_v36 = vadd.f32 %v5597_v30, %v4844_v45 }
 0x936   : > { %v4861_v46 = vpack.c.bf16 %v8673_v36, %v8671_v59 }
 0x938   : > { %6108 = vmatprep.mubr.msk.bf16.mxu1 %vm491_vm0, %v4861_v46 }
 0x93b   : > { %v4799_v0 = vpop.xlane.xlu1 %4798 }
 0x93c   : > { %v4809_v2 = vmul.f32 0.03125, %v4799_v0 }
 0x93e   : > { %v4817_v24 = vadd.f32 1e-05, %v4809_v2 }
 0x940   : > { %6594 = vrsqrt.f32 %v4817_v24 }
 0x942   : > { %v4802_v41 = vpop.xlane.xlu0 %4801 }
 0x943   : > { %v4810_v18 = vmul.f32 0.03125, %v4802_v41 }
 0x945   : > { %v4818_v56 = vadd.f32 1e-05, %v4810_v18 }
 0x947   : > { %6596 = vrsqrt.f32 %v4818_v56 }
 0x94a   : > { %v6595_v26 = vpop.eup %6594 }
 0x94b   : > { %v4833_v28 = vmul.f32 %v6595_v26, %v8629_v38  ;;  %v6229_v38 = vld [vmem:[%s8857_s11 + $0x18] sm:$0xff]  }
 0x94c   : > { %6118 = vmatprep.subr.bf16.mxu0 %v6229_v38 }
 0x94d   : > { %v4845_v52 = vmul.f32 %v5596_v60, %v4833_v28  ;;  %6119 = vmatpush3.bf16.msra.mxu0 %v6229_v38 }
 0x94f   : > { %v8680_v37 = vadd.f32 %v5597_v30, %v4845_v52 }
 0x951   : > { %v6597_v13 = vpop.eup %6596 }
 0x952   : > { %v4834_v34 = vmul.f32 %v6597_v13, %v8634_v53  ;;  %v5598_v53 = vld [vmem:[%s8856_s10] ss:$0 sm:$0xff] }
 0x954   : > { %v4846_v21 = vmul.f32 %v5596_v60, %v4834_v34 }
 0x956   : > { %v8682_v31 = vadd.f32 %v5597_v30, %v4846_v21 }
 0x958   : > { %v4862_v48 = vpack.c.bf16 %v8682_v31, %v8680_v37 }
 0x95a   : > { %6109 = vmatmul.mubr.msk.bf16.gmra.mrb[104].mxu1 %vm491_vm0, %v4862_v48 }
 0x9eb   : > { %v6106_v49 = vpop.f32.mrb[100].mxu1 }
 0x9ec   : > { %v4941_v29 = vadd.f32 %v6106_v49, %v5598_v53  ;;  %v4932_v10 = vpop.f32.mrb[101].mxu1 }
 0x9ed   : > { %v4933_v58 = vadd.f32 %v5598_v53, %v4932_v10  ;;  %v6107_v5 = vpop.f32.mrb[102].mxu1 }
 0x9ee   : > { %v4944_v55 = vadd.f32 %v6107_v5, %v5598_v53  ;;  %v4935_v23 = vpop.f32.mrb[103].mxu1  ;;  %v4965_v9 = vmax.f32 %v4941_v29, 0.0 }
 0x9ef   : > { %v4936_v60 = vadd.f32 %v5598_v53, %v4935_v23  ;;  %v4963_v7 = vmax.f32 %v4933_v58, 0.0 }
 0x9f0   : > { %v4966_v40 = vmax.f32 %v4944_v55, 0.0 }
 0x9f1   : > { %v4964_v30 = vmax.f32 %v4936_v60, 0.0 }
 0x9f2   : > { %v4972_v44 = vpack.c.bf16 %v4966_v40, %v4965_v9 }
 0x9f3   : > { %v4971_v33 = vpack.c.bf16 %v4964_v30, %v4963_v7 }
 0x9f5   : > { %6120 = vmatprep.mubr.msk.bf16.mxu0 %vm5012_vm2, %v4971_v33 }
 0x9f6   : > { %6121 = vmatmul.mubr.msk.bf16.vlgmr.msra.gmra.mrb[100].mxu0 %vm5012_vm2, %v4972_v44 }
 0xa2d   : > { %v6110_v25 = vpop.f32.mrb[104].mxu1 }
 0xa2e   : > { %v4957_v54 = vadd.f32 %v6110_v25, %v5598_v53  ;;  %v4948_v32 = vpop.f32.mrb[105].mxu1 }
 0xa2f   : > { %v4949_v8 = vadd.f32 %v5598_v53, %v4948_v32  ;;  %v6111_v39 = vpop.f32.mrb[106].mxu1 }
 0xa30   : > { %v4960_v4 = vadd.f32 %v6111_v39, %v5598_v53  ;;  %v4951_v63 = vpop.f32.mrb[107].mxu1  ;;  %v4969_v57 = vmax.f32 %v4957_v54, 0.0 }
 0xa31   : > { %v4952_v20 = vadd.f32 %v5598_v53, %v4951_v63  ;;  %v4967_v16 = vmax.f32 %v4949_v8, 0.0 }
 0xa32   : > { %v4970_v47 = vmax.f32 %v4960_v4, 0.0 }
 0xa33   : > { %v4968_v50 = vmax.f32 %v4952_v20, 0.0 }
 0xa34   : > { %v4974_v51 = vpack.c.bf16 %v4970_v47, %v4969_v57 }
 0xa35   : > { %v4973_v22 = vpack.c.bf16 %v4968_v50, %v4967_v16 }
 0xa37   : > { %6124 = vmatprep.mubr.msk.bf16.mxu0 %vm5012_vm2, %v4973_v22 }
 0xa38   : > { %6125 = vmatmul.mubr.msk.bf16.gmra.mrb[104].mxu0 %vm5012_vm2, %v4974_v51 }
 0xac9   : > { %v6122_v43 = vpop.f32.mrb[100].mxu0 }
 0xaca   : > { %v5068_v15 = vadd.f32 %v6122_v43, %v5605_v6  ;;  %v5059_v19 = vpop.f32.mrb[101].mxu0 }
 0xacb   : > { %v5060_v62 = vadd.f32 %v5605_v6, %v5059_v19  ;;  %v6123_v27 = vpop.f32.mrb[102].mxu0 }
 0xacc   : > { %v5092_v35 = vadd.f32 %v5068_v15, %v8662_v11  ;;  %v5071_v17 = vadd.f32 %v6123_v27, %v5605_v6  ;;  %v5062_v12 = vpop.f32.mrb[103].mxu0 }
 0xacd   : > { %v5063_v1 = vadd.f32 %v5605_v6, %v5062_v12  ;;  %v5090_v45 = vadd.f32 %v5060_v62, %v8653_v14 }
 0xace   : > { %v5093_v46 = vadd.f32 %v5071_v17, %v8664_v61  ;;  %v5106_v0 = vsel %vm491_vm0, %v5092_v35, 0.0 }
 0xacf   : > { %5107 = vadd.xlane.f32.xlu1 %v5106_v0  ;;  %v5091_v2 = vadd.f32 %v5063_v1, %v8655_v42  ;;  %v5100_v41 = vsel %vm491_vm0, %v5090_v45, 0.0 }
 0xad0   : > { %v5109_v24 = vsel %vm491_vm0, %v5093_v46, 0.0 }
 0xad1   : > { %5110 = vadd.xlane.f32.xlu0 %v5109_v24  ;;  %v5103_v11 = vsel %vm491_vm0, %v5091_v2, 0.0 }
 0xad3   : > { %5101 = vadd.xlane.f32.xlu1 %v5100_v41 }
 0xad5   : > { %5104 = vadd.xlane.f32.xlu0 %v5103_v11 }
 0xb0b   : > { %v6126_v18 = vpop.f32.mrb[104].mxu0 }
 0xb0c   : > { %v5075_v56 = vpop.f32.mrb[105].mxu0  ;;  %v5084_v26 = vadd.f32 %v6126_v18, %v5605_v6 }
 0xb0d   : > { %v5076_v14 = vadd.f32 %v5605_v6, %v5075_v56  ;;  %v6127_v28 = vpop.f32.mrb[106].mxu0 }
 0xb0e   : > { %v5078_v61 = vpop.f32.mrb[107].mxu0  ;;  %v5087_v34 = vadd.f32 %v6127_v28, %v5605_v6  ;;  %v5096_v42 = vadd.f32 %v5084_v26, %v8680_v37 }
 0xb0f   : > { %v5094_v13 = vadd.f32 %v5076_v14, %v8671_v59  ;;  %v5079_v52 = vadd.f32 %v5605_v6, %v5078_v61 }
 0xb10   : > { %v5097_v3 = vadd.f32 %v5087_v34, %v8682_v31  ;;  %v5118_v53 = vsel %vm491_vm0, %v5096_v42, 0.0 }
 0xb11   : > { %v5095_v21 = vadd.f32 %v5079_v52, %v8673_v36  ;;  %v5112_v48 = vsel %vm491_vm0, %v5094_v13, 0.0 }
 0xb12   : > { %5113 = vadd.xlane.f32.xlu1 %v5112_v48  ;;  %v5121_v49 = vsel %vm491_vm0, %v5097_v3, 0.0 }
 0xb13   : > { %v5115_v38 = vsel %vm491_vm0, %v5095_v21, 0.0 }
 0xb14   : > { %5116 = vadd.xlane.f32.xlu0 %v5115_v38 }
 0xb16   : > { %5119 = vadd.xlane.f32.xlu1 %v5118_v53  ;;  %v8762_v53 = vld [vmem:[%s8850_s4 + $0x8] ss:$0 sm:$0xff] }
 0xb18   : > { %5122 = vadd.xlane.f32.xlu0 %v5121_v49 }
 0xb5c   : > { %v5108_v59 = vpop.xlane.xlu1 %5107 }
 0xb5d   : > { %v5126_v29 = vmul.f32 0.03125, %v5108_v59 }
 0xb5e   : > { %v5111_v10 = vpop.xlane.xlu0 %5110 }
 0xb5f   : > { %v8719_v37 = vsub.f32 %v5092_v35, %v5126_v29  ;;  %v5127_v36 = vmul.f32 0.03125, %v5111_v10 }
 0xb60   : > { %v5102_v58 = vpop.xlane.xlu1 %5101 }
 0xb61   : > { %v8721_v5 = vsub.f32 %v5093_v46, %v5127_v36  ;;  %v5124_v55 = vmul.f32 0.03125, %v5102_v58  ;;  %v5142_v31 = vmul.f32 %v8719_v37, %v8719_v37 }
 0xb62   : > { %v5105_v23 = vpop.xlane.xlu0 %5104 }
 0xb63   : > { %v5132_v60 = vsub.f32 %v5090_v45, %v5124_v55  ;;  %v5125_v9 = vmul.f32 0.03125, %v5105_v23  ;;  %v5154_v40 = vsel %vm491_vm0, %v5142_v31, 0.0  ;;  %v5143_v7 = vmul.f32 %v8721_v5, %v8721_v5 }
 0xb64   : > { %5155 = vadd.xlane.f32.xlu1 %v5154_v40 }
 0xb65   : > { %v5133_v30 = vsub.f32 %v5091_v2, %v5125_v9  ;;  %v5157_v44 = vsel %vm491_vm0, %v5143_v7, 0.0  ;;  %v5140_v33 = vmul.f32 %v5132_v60, %v5132_v60 }
 0xb66   : > { %5158 = vadd.xlane.f32.xlu0 %v5157_v44 }
 0xb67   : > { %v5148_v25 = vsel %vm491_vm0, %v5140_v33, 0.0  ;;  %v5141_v54 = vmul.f32 %v5133_v30, %v5133_v30 }
 0xb68   : > { %5149 = vadd.xlane.f32.xlu1 %v5148_v25 }
 0xb69   : > { %v5151_v32 = vsel %vm491_vm0, %v5141_v54, 0.0 }
 0xb6a   : > { %5152 = vadd.xlane.f32.xlu0 %v5151_v32 }
 0xb9f   : > { %v5114_v8 = vpop.xlane.xlu1 %5113 }
 0xba0   : > { %v5128_v39 = vmul.f32 0.03125, %v5114_v8 }
 0xba1   : > { %v5117_v4 = vpop.xlane.xlu0 %5116 }
 0xba2   : > { %v8731_v63 = vsub.f32 %v5094_v13, %v5128_v39  ;;  %v5129_v20 = vmul.f32 0.03125, %v5117_v4 }
 0xba3   : > { %v5120_v57 = vpop.xlane.xlu1 %5119 }
 0xba4   : > { %v8733_v47 = vsub.f32 %v5095_v21, %v5129_v20  ;;  %v5130_v16 = vmul.f32 0.03125, %v5120_v57  ;;  %v5144_v50 = vmul.f32 %v8731_v63, %v8731_v63 }
 0xba5   : > { %v5123_v51 = vpop.xlane.xlu0 %5122 }
 0xba6   : > { %v8737_v22 = vsub.f32 %v5096_v42, %v5130_v16  ;;  %v5131_v6 = vmul.f32 0.03125, %v5123_v51  ;;  %v5160_v43 = vsel %vm491_vm0, %v5144_v50, 0.0  ;;  %v5145_v15 = vmul.f32 %v8733_v47, %v8733_v47  ;;  %v8754_v42 = vld [vmem:[%s8850_s4 + $0x7] ss:$0 sm:$0xff] }
 0xba7   : > { %5161 = vadd.xlane.f32.xlu1 %v5160_v43 }
 0xba8   : > { %v8742_v19 = vsub.f32 %v5097_v3, %v5131_v6  ;;  %v5163_v62 = vsel %vm491_vm0, %v5145_v15, 0.0  ;;  %v5146_v27 = vmul.f32 %v8737_v22, %v8737_v22 }
 0xba9   : > { %5164 = vadd.xlane.f32.xlu0 %v5163_v62 }
 0xbaa   : > { %v5166_v35 = vsel %vm491_vm0, %v5146_v27, 0.0  ;;  %v5147_v17 = vmul.f32 %v8742_v19, %v8742_v19 }
 0xbab   : > { %5167 = vadd.xlane.f32.xlu1 %v5166_v35 }
 0xbac   : > { %v5169_v12 = vsel %vm491_vm0, %v5147_v17, 0.0 }
 0xbad   : > { %5170 = vadd.xlane.f32.xlu0 %v5169_v12 }
 0xbf1   : > { %v5156_v45 = vpop.xlane.xlu1 %5155 }
 0xbf2   : > { %v5174_v41 = vmul.f32 0.03125, %v5156_v45 }
 0xbf3   : > { %v5159_v1 = vpop.xlane.xlu0 %5158 }
 0xbf4   : > { %v5182_v56 = vadd.f32 1e-05, %v5174_v41  ;;  %v5175_v26 = vmul.f32 0.03125, %v5159_v1 }
 0xbf5   : > { %v5150_v0 = vpop.xlane.xlu1 %5149 }
 0xbf6   : > { %v5172_v24 = vmul.f32 0.03125, %v5150_v0  ;;  %v5183_v14 = vadd.f32 1e-05, %v5175_v26 }
 0xbf7   : > { %v5153_v46 = vpop.xlane.xlu0 %5152 }
 0xbf8   : > { %v5173_v2 = vmul.f32 0.03125, %v5153_v46  ;;  %v5180_v18 = vadd.f32 1e-05, %v5172_v24 }
 0xbfa   : > { %v5181_v11 = vadd.f32 1e-05, %v5173_v2 }
 0xbfc   : > { %6598 = vrsqrt.f32 %v5181_v11 }
 0xbfd   : > { %6600 = vrsqrt.f32 %v5180_v18 }
 0xbfe   : > { %6602 = vrsqrt.f32 %v5182_v56 }
 0xbff   : > { %6604 = vrsqrt.f32 %v5183_v14 }
 0xc06   : > { %v6599_v28 = vpop.eup %6598 }
 0xc07   : > { %v6601_v61 = vpop.eup %6600  ;;  %v5197_v13 = vmul.f32 %v6599_v28, %v5133_v30 }
 0xc08   : > { %v6603_v34 = vpop.eup %6602  ;;  %v5196_v52 = vmul.f32 %v6601_v61, %v5132_v60 }
 0xc09   : > { %v5198_v21 = vmul.f32 %v6603_v34, %v8719_v37  ;;  %v5209_v48 = vmul.f32 %v8754_v42, %v5197_v13  ;;  %v6605_v38 = vpop.eup %6604 }
 0xc0a   : > { %v5208_v3 = vmul.f32 %v8754_v42, %v5196_v52  ;;  %v5199_v29 = vmul.f32 %v6605_v38, %v8721_v5 }
 0xc0b   : > { %v5210_v49 = vmul.f32 %v8754_v42, %v5198_v21  ;;  %v5221_v59 = vadd.f32 %v8762_v53, %v5209_v48 }
 0xc0c   : > { %v5220_v10 = vadd.f32 %v8762_v53, %v5208_v3  ;;  %v5211_v58 = vmul.f32 %v8754_v42, %v5199_v29 }
 0xc0d   : > { %v5222_v37 = vadd.f32 %v8762_v53, %v5210_v49  ;;  %v5235_v36 = vsel %vm491_vm0, %v5221_v59, 0.0 }
 0xc0e   : > { %v5228_v55 = vsel %vm491_vm0, %v5220_v10, 0.0  ;;  %v5236_v31 = vrot.slane %v5235_v36, 4  ;;  %v5223_v7 = vadd.f32 %v8762_v53, %v5211_v58 }
 0xc0f   : > { %v5242_v60 = vsel %vm491_vm0, %v5222_v37, 0.0  ;;  %v5229_v9 = vrot.slane %v5228_v55, 4 }
 0xc10   : > { %v5243_v33 = vrot.slane %v5242_v60, 4  ;;  %v5237_v25 = vadd.f32 %v5236_v31, %v5235_v36  ;;  %v5249_v4 = vsel %vm491_vm0, %v5223_v7, 0.0 }
 0xc11   : > { %v5230_v32 = vadd.f32 %v5229_v9, %v5228_v55  ;;  %v5250_v6 = vrot.slane %v5249_v4, 4 }
 0xc12   : > { %v5244_v50 = vadd.f32 %v5243_v33, %v5242_v60  ;;  %v5238_v51 = vrot.slane %v5237_v25, 2 }
 0xc13   : > { %v5231_v43 = vrot.slane %v5230_v32, 2  ;;  %v5251_v35 = vadd.f32 %v5250_v6, %v5249_v4 }
 0xc14   : > { %v5239_v62 = vadd.f32 %v5238_v51, %v5237_v25  ;;  %v5245_v27 = vrot.slane %v5244_v50, 2 }
 0xc15   : > { %v5232_v17 = vadd.f32 %v5231_v43, %v5230_v32  ;;  %v5252_v2 = vrot.slane %v5251_v35, 2 }
 0xc16   : > { %v5240_v1 = vrot.slane %v5239_v62, 1  ;;  %v5246_v0 = vadd.f32 %v5245_v27, %v5244_v50 }
 0xc17   : > { %v5233_v24 = vrot.slane %v5232_v17, 1  ;;  %v5253_v34 = vadd.f32 %v5252_v2, %v5251_v35 }
 0xc18   : > { %v5241_v56 = vadd.f32 %v5240_v1, %v5239_v62  ;;  %v5247_v13 = vrot.slane %v5246_v0, 1 }
 0xc19   : > { %v5254_v55 = vrot.slane %v5253_v34, 1 }
 0xc1a   : > { %v5248_v37 = vadd.f32 %v5247_v13, %v5246_v0 }
 0xc1c   : > { %v5287_v33 = vmul.f32 0.125, %v5248_v37 }
 0xc34   : > { %v5162_v23 = vpop.xlane.xlu1 %5161 }
 0xc35   : > { %v5176_v40 = vmul.f32 0.03125, %v5162_v23 }
 0xc36   : > { %v5165_v30 = vpop.xlane.xlu0 %5164 }
 0xc37   : > { %v5184_v5 = vadd.f32 1e-05, %v5176_v40  ;;  %v5177_v44 = vmul.f32 0.03125, %v5165_v30 }
 0xc38   : > { %v5168_v54 = vpop.xlane.xlu1 %5167 }
 0xc39   : > { %6606 = vrsqrt.f32 %v5184_v5  ;;  %v5185_v8 = vadd.f32 1e-05, %v5177_v44  ;;  %v5178_v39 = vmul.f32 0.03125, %v5168_v54  ;;  %v5255_v44 = vadd.f32 %v5254_v55, %v5253_v34 }
 0xc3a   : > { %v5171_v20 = vpop.xlane.xlu0 %5170 }
 0xc3b   : > { %6608 = vrsqrt.f32 %v5185_v8  ;;  %v5186_v57 = vadd.f32 1e-05, %v5178_v39  ;;  %v5179_v16 = vmul.f32 0.03125, %v5171_v20 }
 0xc3d   : > { %6610 = vrsqrt.f32 %v5186_v57  ;;  %v5187_v15 = vadd.f32 1e-05, %v5179_v16  ;;  %v5288_v16 = vmul.f32 0.125, %v5255_v44 }
 0xc3f   : > { %6612 = vrsqrt.f32 %v5187_v15 }
 0xc43   : > { %v6607_v12 = vpop.eup %6606 }
 0xc44   : > { %v5200_v45 = vmul.f32 %v6607_v12, %v8731_v63  ;;  %v5234_v63 = vadd.f32 %v5233_v24, %v5232_v17 }
 0xc45   : > { %v6609_v46 = vpop.eup %6608 }
 0xc46   : > { %v5212_v41 = vmul.f32 %v8754_v42, %v5200_v45  ;;  %v5201_v11 = vmul.f32 %v6609_v46, %v8733_v47  ;;  %v5285_v31 = vmul.f32 0.125, %v5234_v63 }
 0xc47   : > { %v6611_v18 = vpop.eup %6610 }
 0xc48   : > { %v5224_v26 = vadd.f32 %v8762_v53, %v5212_v41  ;;  %v5213_v14 = vmul.f32 %v8754_v42, %v5201_v11  ;;  %v5202_v28 = vmul.f32 %v6611_v18, %v8737_v22  ;;  %v5286_v22 = vmul.f32 0.125, %v5241_v56 }
 0xc49   : > { %v6613_v61 = vpop.eup %6612 }
 0xc4a   : > { %v5256_v52 = vsel %vm491_vm0, %v5224_v26, 0.0  ;;  %v5225_v21 = vadd.f32 %v8762_v53, %v5213_v14  ;;  %v5214_v48 = vmul.f32 %v8754_v42, %v5202_v28  ;;  %v5203_v47 = vmul.f32 %v6613_v61, %v8742_v19 }
 0xc4b   : > { %v5257_v3 = vrot.slane %v5256_v52, 4  ;;  %v5302_v40 = vsel %vm5301_vm3, %v5286_v22, %v5285_v31 }
 0xc4c   : > { %v5263_v38 = vsel %vm491_vm0, %v5225_v21, 0.0  ;;  %v5226_v49 = vadd.f32 %v8762_v53, %v5214_v48  ;;  %v5215_v59 = vmul.f32 %v8754_v42, %v5203_v47  ;;  %v5304_v8 = vsel %vm5303_vm4, %v5287_v33, %v5302_v40 }
 0xc4d   : > { %v5258_v29 = vadd.f32 %v5257_v3, %v5256_v52  ;;  %v5264_v10 = vrot.slane %v5263_v38, 4  ;;  %v5306_v15 = vsel %vm5305_vm5, %v5288_v16, %v5304_v8 }
 0xc4e   : > { %v5270_v36 = vsel %vm491_vm0, %v5226_v49, 0.0  ;;  %v5227_v58 = vadd.f32 %v8762_v53, %v5215_v59 }
 0xc4f   : > { %v5271_v19 = vrot.slane %v5270_v36, 4  ;;  %v5259_v23 = vrot.slane %v5258_v29, 2  ;;  %v5265_v60 = vadd.f32 %v5264_v10, %v5263_v38 }
 0xc50   : > { %v5277_v9 = vsel %vm491_vm0, %v5227_v58, 0.0 }
 0xc51   : > { %v5260_v42 = vadd.f32 %v5259_v23, %v5258_v29  ;;  %v5266_v7 = vrot.slane %v5265_v60, 2  ;;  %v5272_v30 = vadd.f32 %v5271_v19, %v5270_v36  ;;  %v5278_v5 = vrot.slane %v5277_v9, 4 }
 0xc53   : > { %v5261_v25 = vrot.slane %v5260_v42, 1  ;;  %v5267_v54 = vadd.f32 %v5266_v7, %v5265_v60  ;;  %v5273_v53 = vrot.slane %v5272_v30, 2  ;;  %v5279_v32 = vadd.f32 %v5278_v5, %v5277_v9 }
 0xc55   : > { %v5262_v39 = vadd.f32 %v5261_v25, %v5260_v42  ;;  %v5268_v4 = vrot.slane %v5267_v54, 1  ;;  %v5274_v20 = vadd.f32 %v5273_v53, %v5272_v30  ;;  %v5280_v57 = vrot.slane %v5279_v32, 2 }
 0xc57   : > { %v5269_v50 = vadd.f32 %v5268_v4, %v5267_v54  ;;  %v5275_v51 = vrot.slane %v5274_v20, 1  ;;  %v5281_v6 = vadd.f32 %v5280_v57, %v5279_v32  ;;  %v5289_v43 = vmul.f32 0.125, %v5262_v39 }
 0xc59   : > { %v5276_v62 = vadd.f32 %v5275_v51, %v5274_v20  ;;  %v5282_v27 = vrot.slane %v5281_v6, 1  ;;  %v5290_v35 = vmul.f32 0.125, %v5269_v50  ;;  %v5308_v17 = vsel %vm5307_vm6, %v5289_v43, %v5306_v15 }
 0xc5b   : > { %v5283_v12 = vadd.f32 %v5282_v27, %v5281_v6  ;;  %v5291_v1 = vmul.f32 0.125, %v5276_v62  ;;  %v5310_v45 = vsel %vm5309_vm7, %v5290_v35, %v5308_v17 }
 0xc5d   : > { %v5292_v46 = vmul.f32 0.125, %v5283_v12  ;;  %v5312_v0 = vsel %vm5311_vm8, %v5291_v1, %v5310_v45 }
 0xc5f   : > { %v5314_v2 = vsel %vm5313_vm9, %v5292_v46, %v5312_v0 }
 0xc60   : > { %5316 = vst.msk [vmem:[%s407_s17] sm:$0xff] %vm491_vm0, %v5314_v2 }
 0xc61   : > { %6635 = shalt.err (!%p6632_p3)
}
 0xc62   : > { %s6636_s23 = scalar_lea.hbm %s8801_s20, 128  ;;  %s6640_s17 = scalar_lea.hbm %s8858_s12, 256 }
 0xc63   : > { %p6637_p4 = scmp.ne.s32.totalorder %s8801_s20, %s6636_s23  ;;  %p6641_p9 = scmp.lt.u32.totalorder %s8801_s20, %s8858_s12 }
 0xc64   : > { %p6642_p10 = scmp.lt.u32.totalorder %s6640_s17, %s6636_s23  ;;  %p6644_p12 = scmp.lt.u32.totalorder %s6636_s23, %s8801_s20 }
 0xc65   : > { %p6638_p7 = pnand %p6637_p4, %p6793_p5 }
 0xc66   : > { %p6643_p11 = por %p6642_p10, %p6641_p9 }
 0xc67   : > { %p6639_p8 = pneg %p6638_p7 }
 0xc68   : > { %p6645_p13 = por %p6644_p12, %p6643_p11 }
 0xc6a   : > { %p6646_p0 = pnand %p6645_p13, %p6639_p8 }
 0xc6c   : > { %6649 = shalt.err (!%p6646_p0)
}
 0xc6d   : > { %6132 = dma.vmem_to_hbm [thread:$0]  (%p6793_p5), %s8803_s28, 128, %s8801_s20, %s5318_s25  }
 0xc6e PF: > { %p6138_p1 = scmp.ge.s32.totalorder %s6684_s24, 2  ;;  %s5343_s26 = sand.u32 1, %s6672_s21  }
 0xc6f   : > { %s5344_s29 = scalar_lea.sflag [#allocation3], %s5343_s26 }
 0xc70   : > { %p6135_p2 = pnand %p6138_p1, %p6797_p6 }
 0xc72   : > { %6667 = dma.done.wait (!%p6135_p2), %s5344_s29, 128  }
 0xc73   : > { %6669 = vsyncadd (!%p6135_p2), %s5344_s29, 4294967168  ;;  %s9003_s24 = sld [smem:[#allocation6_spill]]  ;;  %s9004_s15 = sld [smem:[#allocation5_spill]] }
 0xc74   : > { %s9005_s23 = sld [smem:[#allocation7_spill]]  ;;  %s9006_s21 = smov %s6676_s22 }
 0xc79   : > { %p22_p3 = scmp.ge.s32.totalorder %s9003_s24, 4   ;;  %s9007_s22 = smov %s9004_s15 }
 0xc7b   :  { %24 = sbr.rel (!%p22_p3) target bundleno = 3 (0x3), region = 104 }
 0xc82   :  { %5349 = vsyncpa [#allocation3], 1 }
 0xc83   :  { %5351 = vsyncpa [#allocation3 + $0x1], 1 }

</bundles_post_ra>
